<compile_context>
chip_gen: v7x
topology: tpu7x:2x2x1
jax: 0.10.0
libtpu: 0.0.40
codegen_flags: <defaults>
</compile_context>

<pallas_src>
import functools
import re

import jax
import jax.numpy as jnp
import numpy as np
from jax import lax
from jax.experimental import pallas as pl
from jax.experimental.pallas import tpu as pltpu


# ---------------------------------------------------------------------------
# Generation-aware configuration.
# ---------------------------------------------------------------------------
def _tpu_generation():
    try:
        kind = jax.devices()[0].device_kind.lower()
        m = re.search(r"v(\d+)", kind)
        if m:
            return int(m.group(1))
    except Exception:
        pass
    return 6


_GEN = _tpu_generation()
# bf16 MXU operands (f32 accumulation) everywhere modern; bf16 VPU/EUP only
# on v6e/v7x (v5e has no bf16 elementwise path -> casts would just add work).
_MXU_DTYPE = jnp.bfloat16 if _GEN >= 4 else jnp.float32
_EW_DTYPE = jnp.bfloat16 if _GEN >= 6 else jnp.float32
if _GEN >= 7:
    _VMEM_LIMIT = 48 * 1024 * 1024    # v7x: 64 MiB physical
elif _GEN >= 5:
    _VMEM_LIMIT = 96 * 1024 * 1024    # v5e/v6e: 128 MiB physical
else:
    _VMEM_LIMIT = 32 * 1024 * 1024


def _batch_tile(B):
    """Largest batch tile (<=8) dividing B that still gives >=2 grid steps."""
    for cand in (8, 4, 2, 1):
        if B % cand == 0 and B // cand >= 2:
            return cand
    return B


# ---------------------------------------------------------------------------
# Kernel 1: fused feature projection  y = x @ [attn_wm | hop_wm]
#   x: [M, D], w_cat: [D, 2H]  -> y: [M, 2H], tiled over M (HBM-bound).
# ---------------------------------------------------------------------------
def _make_proj_kernel(mxu_dtype):
    def kernel(x_ref, w_ref, o_ref):
        o_ref[...] = jnp.dot(x_ref[...].astype(mxu_dtype),
                             w_ref[...].astype(mxu_dtype),
                             preferred_element_type=jnp.float32)
    return kernel


def fused_projection(x2d, w_cat, tm=1024):
    M, D = x2d.shape
    H2 = w_cat.shape[1]
    tm = min(tm, M)
    return pl.pallas_call(
        _make_proj_kernel(_MXU_DTYPE),
        out_shape=jax.ShapeDtypeStruct((M, H2), jnp.float32),
        grid=(pl.cdiv(M, tm),),
        in_specs=[pl.BlockSpec((tm, D), lambda i: (i, 0)),
                  pl.BlockSpec((D, H2), lambda i: (0, 0))],
        out_specs=pl.BlockSpec((tm, H2), lambda i: (i, 0)),
        compiler_params=pltpu.CompilerParams(
            dimension_semantics=("parallel",),
            vmem_limit_bytes=_VMEM_LIMIT),
    )(x2d, w_cat)


# ---------------------------------------------------------------------------
# Kernel 2: multi-layer LSTM over the whole (small) sequence, batch-major,
# gridded over batch tiles ("parallel" -> both v7x TensorCores).
#   x: [B, T, D], h0/c0: [B, L, H]; per layer: wih [Din,4H], whh [H,4H],
#   bias [1,4H] (gate order i,f,g,o).  Output: [B, T, H] (last layer).
# ---------------------------------------------------------------------------
def _make_lstm_kernel(T, tb, D, H, L, mxu_dtype):
    def kernel(x_ref, h0_ref, c0_ref, *rest):
        w_refs = rest[:3 * L]
        out_ref = rest[3 * L]
        xp_ref, seq_ref, h_ref, c_ref = rest[3 * L + 1:]
        h0 = h0_ref[...]                               # [tb, L, H]
        c0 = c0_ref[...]
        for l in range(L):
            wih = w_refs[3 * l][...]                   # [Din, 4H]
            whh = w_refs[3 * l + 1][...]               # [H,   4H]
            bias = w_refs[3 * l + 2][...]              # [1,   4H]
            if l == 0:
                xin = x_ref[...].reshape(tb * T, D)
            else:
                xin = seq_ref[...].reshape(tb * T, H)  # previous layer output
            # Hoisted input projection (one matmul per layer), staged into a
            # VMEM scratch so only one timestep slice is live in the loop.
            xp_ref[...] = (jnp.dot(xin.astype(mxu_dtype), wih.astype(mxu_dtype),
                                   preferred_element_type=jnp.float32)
                           + bias).reshape(tb, T, 4 * H)
            h_ref[...] = h0[:, l, :]
            c_ref[...] = c0[:, l, :]
            dst = out_ref if l == L - 1 else seq_ref
            # Recurrent path kept in f32 (error would compound over T);
            # T is small so the static unroll with ref-staged state is cheap.
            for t in range(T):
                xp_t = xp_ref[:, t:t + 1, :].reshape(tb, 4 * H)
                gates = xp_t + jnp.dot(h_ref[...], whh,
                                       preferred_element_type=jnp.float32)
                i_g = jax.nn.sigmoid(gates[:, 0:H])
                f_g = jax.nn.sigmoid(gates[:, H:2 * H])
                g_g = jnp.tanh(gates[:, 2 * H:3 * H])
                o_g = jax.nn.sigmoid(gates[:, 3 * H:4 * H])
                c_new = f_g * c_ref[...] + i_g * g_g
                h_new = o_g * jnp.tanh(c_new)
                c_ref[...] = c_new
                h_ref[...] = h_new
                dst[:, t:t + 1, :] = h_new.reshape(tb, 1, H)
    return kernel


def lstm_forward(x, h0, c0, lstm_params):
    B, T, D = x.shape
    _, L, H = h0.shape
    tb = _batch_tile(B)
    args = [x, h0, c0]
    in_specs = [pl.BlockSpec((tb, T, D), lambda i: (i, 0, 0)),
                pl.BlockSpec((tb, L, H), lambda i: (i, 0, 0)),
                pl.BlockSpec((tb, L, H), lambda i: (i, 0, 0))]
    for (wih, whh, bias) in lstm_params:
        args += [wih, whh, bias]
        in_specs += [pl.BlockSpec(wih.shape, lambda i: (0, 0)),
                     pl.BlockSpec(whh.shape, lambda i: (0, 0)),
                     pl.BlockSpec(bias.shape, lambda i: (0, 0))]
    return pl.pallas_call(
        _make_lstm_kernel(T, tb, D, H, L, _MXU_DTYPE),
        out_shape=jax.ShapeDtypeStruct((B, T, H), jnp.float32),
        grid=(B // tb,),
        in_specs=in_specs,
        out_specs=pl.BlockSpec((tb, T, H), lambda i: (i, 0, 0)),
        scratch_shapes=[pltpu.VMEM((tb, T, 4 * H), jnp.float32),  # xp
                        pltpu.VMEM((tb, T, H), jnp.float32),      # layer seq
                        pltpu.VMEM((tb, H), jnp.float32),         # h
                        pltpu.VMEM((tb, H), jnp.float32)],        # c
        compiler_params=pltpu.CompilerParams(
            dimension_semantics=("parallel",),
            vmem_limit_bytes=_VMEM_LIMIT),
    )(*args)


# ---------------------------------------------------------------------------
# Kernel 3: fused pointer attention (n_hop glimpse hops + final score).
#   Grid over batch; mem_sizes scalar-prefetched into SMEM.  The Ns axis is
#   processed in chunks with an online-softmax accumulator in each hop so the
#   [Nq, ns_tile, H] tanh intermediate stays small.
#   feats: [B, Ns, 2H] (= [attn_feat | hop_feat]), query: [B, Nq, H].
#   Output: [B, Nq, Ns] unnormalized attention scores.
# ---------------------------------------------------------------------------
def _make_pointer_kernel(Ns, Nq, H, n_hop, ns_tile, ew_dtype, mxu_dtype):
    def kernel(ms_ref, feats_ref, q_ref,
               hop_wq_ref, hop_v_ref, attn_wq_ref, attn_v_ref, out_ref):
        b = pl.program_id(0)
        m_size = ms_ref[b]
        feats = feats_ref[...]                       # [Ns, 2H]
        attn_feat = feats[:, :H]                     # [Ns, H]
        hop_feat = feats[:, H:]                      # [Ns, H]
        hop_wq = hop_wq_ref[...]
        attn_wq = attn_wq_ref[...]
        hop_v = hop_v_ref[...].reshape(1, 1, H)      # f32
        attn_v = attn_v_ref[...].reshape(1, 1, H)
        q = q_ref[...]                               # [Nq, H] f32
        col = lax.broadcasted_iota(jnp.int32, (1, Ns), 1)
        valid = col < m_size                         # [1, Ns]
        NEG = jnp.float32(-1e30)                     # mask fill stays f32

        def score_chunk(feat_chunk, qw, v):
            # tanh runs in bf16 on v6e/v7x (EUP bf16 path), f32 on v5e.
            s = jnp.tanh(feat_chunk[None, :, :].astype(ew_dtype)
                         + qw[:, None, :].astype(ew_dtype))     # [Nq, c, H]
            # VPU mul + last-axis (XLU) reduce: XLU slot is free under the
            # EUP-bound tanh and avoids the [Nq*c,1] matmul-result relayout.
            return jnp.sum(s.astype(jnp.float32) * v, axis=-1)  # [Nq, c]

        for _ in range(n_hop):
            qw = jnp.dot(q.astype(mxu_dtype), hop_wq.astype(mxu_dtype),
                         preferred_element_type=jnp.float32)    # [Nq, H]
            m_run = jnp.full((Nq, 1), -jnp.inf, jnp.float32)
            l_run = jnp.zeros((Nq, 1), jnp.float32)
            acc = jnp.zeros((Nq, H), jnp.float32)
            for s0 in range(0, Ns, ns_tile):
                s1 = min(s0 + ns_tile, Ns)
                fh = hop_feat[s0:s1]                            # [c, H]
                sc = score_chunk(fh, qw, hop_v)
                sc = jnp.where(valid[:, s0:s1], sc, NEG)
                m_new = jnp.maximum(m_run, jnp.max(sc, axis=-1, keepdims=True))
                alpha = jnp.exp(m_run - m_new)
                p = jnp.exp(sc - m_new)                         # [Nq, c]
                l_run = alpha * l_run + jnp.sum(p, axis=-1, keepdims=True)
                acc = alpha * acc + jnp.dot(p, fh,
                                            preferred_element_type=jnp.float32)
                m_run = m_new
            # Exact reciprocal (error budget reserved for the bf16 casts).
            q = acc * pl.reciprocal(l_run, approx=False)

        qw = jnp.dot(q.astype(mxu_dtype), attn_wq.astype(mxu_dtype),
                     preferred_element_type=jnp.float32)
        for s0 in range(0, Ns, ns_tile):
            s1 = min(s0 + ns_tile, Ns)
            out_ref[:, s0:s1] = score_chunk(attn_feat[s0:s1], qw, attn_v)
    return kernel


def pointer_attention(feats, query, hop_wq, hop_v, attn_wq, attn_v,
                      mem_sizes, n_hop):
    B, Ns, H2 = feats.shape
    H = H2 // 2
    Nq = query.shape[1]
    ns_tile = min(Ns, 256)
    return pl.pallas_call(
        _make_pointer_kernel(Ns, Nq, H, n_hop, ns_tile, _EW_DTYPE, _MXU_DTYPE),
        out_shape=jax.ShapeDtypeStruct((B, Nq, Ns), jnp.float32),
        grid_spec=pltpu.PrefetchScalarGridSpec(
            num_scalar_prefetch=1,
            grid=(B,),
            in_specs=[pl.BlockSpec((None, Ns, H2), lambda b, ms: (b, 0, 0)),
                      pl.BlockSpec((None, Nq, H), lambda b, ms: (b, 0, 0)),
                      pl.BlockSpec((H, H), lambda b, ms: (0, 0)),
                      pl.BlockSpec((1, H), lambda b, ms: (0, 0)),
                      pl.BlockSpec((H, H), lambda b, ms: (0, 0)),
                      pl.BlockSpec((1, H), lambda b, ms: (0, 0))],
            out_specs=pl.BlockSpec((None, Nq, Ns), lambda b, ms: (b, 0, 0)),
        ),
        compiler_params=pltpu.CompilerParams(
            dimension_semantics=("parallel",),
            vmem_limit_bytes=_VMEM_LIMIT),
    )(mem_sizes, feats, query, hop_wq, hop_v.reshape(1, H),
      attn_wq, attn_v.reshape(1, H))


# ---------------------------------------------------------------------------
# Full forward (glue under jax.jit, hot paths in Pallas).
# ---------------------------------------------------------------------------
@functools.partial(jax.jit, static_argnames=("n_hop",))
def pointer_net_forward(params, attn_mem, mem_sizes, lstm_in, *, n_hop):
    B, Ns, D = attn_mem.shape
    H = params["attn_wq"].shape[0]
    L = params["init_h"].shape[0]

    # _prepare: one fused projection pass over attn_mem for both feature maps.
    w_cat = jnp.concatenate([params["attn_wm"], params["hop_wm"]], axis=1)  # [D,2H]
    feats = fused_projection(attn_mem.reshape(B * Ns, D), w_cat)            # [B*Ns,2H]
    feats = feats.reshape(B, Ns, 2 * H)

    init_i = jnp.broadcast_to(params["init_i"][None, None, :], (B, 1, D))
    h0 = jnp.broadcast_to(params["init_h"][None, :, :], (B, L, H))
    c0 = jnp.broadcast_to(params["init_c"][None, :, :], (B, L, H))

    # LSTM, batch-major (no JAX-level transposes).
    x = jnp.concatenate([init_i, lstm_in], axis=1)        # [B, Nt+1, D]
    query = lstm_forward(x, h0, c0, params["lstm"])       # [B, Nt+1, H]

    # Fused glimpse hops + final pointer scores.
    return pointer_attention(feats, query,
                             params["hop_wq"], params["hop_v"],
                             params["attn_wq"], params["attn_v"],
                             mem_sizes, n_hop)


# ---------------------------------------------------------------------------
# Pure-JAX reference (same math) for correctness checking.
# ---------------------------------------------------------------------------
def ref_forward(params, attn_mem, mem_sizes, lstm_in, n_hop):
    B, Ns, D = attn_mem.shape
    H = params["attn_wq"].shape[0]
    L = params["init_h"].shape[0]
    attn_feat = attn_mem @ params["attn_wm"]
    hop_feat = attn_mem @ params["hop_wm"]
    init_i = jnp.broadcast_to(params["init_i"][None, None, :], (B, 1, D))
    x = jnp.concatenate([init_i, lstm_in], axis=1)   # [B, T, D]
    T = x.shape[1]
    h = [jnp.broadcast_to(params["init_h"][l][None, :], (B, H)) for l in range(L)]
    c = [jnp.broadcast_to(params["init_c"][l][None, :], (B, H)) for l in range(L)]
    outs = []
    for t in range(T):
        inp = x[:, t, :]
        for l in range(L):
            wih, whh, bias = params["lstm"][l]
            gates = inp @ wih + h[l] @ whh + bias
            i_g = jax.nn.sigmoid(gates[:, :H])
            f_g = jax.nn.sigmoid(gates[:, H:2 * H])
            g_g = jnp.tanh(gates[:, 2 * H:3 * H])
            o_g = jax.nn.sigmoid(gates[:, 3 * H:])
            c[l] = f_g * c[l] + i_g * g_g
            h[l] = o_g * jnp.tanh(c[l])
            inp = h[l]
        outs.append(h[L - 1])
    query = jnp.stack(outs, axis=1)                  # [B, T, H]

    def attn_score(feat, q, v, w):
        sum_ = feat[:, None, :, :] + (q @ w)[:, :, None, :]
        return jnp.einsum("bqsh,h->bqs", jnp.tanh(sum_), v)

    mask = (jnp.arange(Ns)[None, :] < mem_sizes[:, None])[:, None, :]
    for _ in range(n_hop):
        score = attn_score(hop_feat, query, params["hop_v"], params["hop_wq"])
        score = jnp.where(mask, score, -1e18)
        p = jax.nn.softmax(score, axis=-1)
        query = p @ hop_feat
    return attn_score(attn_feat, query, params["attn_v"], params["attn_wq"])


# ---------------------------------------------------------------------------
# Deterministic parameter init (shapes from the PyTorch __init__).
# ---------------------------------------------------------------------------
def init_params(key, input_dim, n_hidden, n_layer):
    INI = 0.01
    keys = jax.random.split(key, 16)

    def xavier(k, shape):
        std = float(np.sqrt(2.0 / (shape[0] + shape[1])))
        return std * jax.random.normal(k, shape, dtype=jnp.float32)

    params = {
        "init_h": jax.random.uniform(keys[0], (n_layer, n_hidden),
                                     minval=-INI, maxval=INI, dtype=jnp.float32),
        "init_c": jax.random.uniform(keys[1], (n_layer, n_hidden),
                                     minval=-INI, maxval=INI, dtype=jnp.float32),
        "init_i": jax.random.uniform(keys[2], (input_dim,),
                                     minval=-0.1, maxval=0.1, dtype=jnp.float32),
        "attn_wm": xavier(keys[3], (input_dim, n_hidden)),
        "attn_wq": xavier(keys[4], (n_hidden, n_hidden)),
        "attn_v": jax.random.uniform(keys[5], (n_hidden,),
                                     minval=-INI, maxval=INI, dtype=jnp.float32),
        "hop_wm": xavier(keys[6], (input_dim, n_hidden)),
        "hop_wq": xavier(keys[7], (n_hidden, n_hidden)),
        "hop_v": jax.random.uniform(keys[8], (n_hidden,),
                                    minval=-INI, maxval=INI, dtype=jnp.float32),
    }
    # LSTM weights (PyTorch default: U(-1/sqrt(H), 1/sqrt(H))), gate order i,f,g,o.
    bound = 1.0 / float(np.sqrt(n_hidden))
    lstm = []
    lkey = keys[9]
    for l in range(n_layer):
        din = input_dim if l == 0 else n_hidden
        lkey, k1, k2, k3, k4 = jax.random.split(lkey, 5)
        wih = jax.random.uniform(k1, (din, 4 * n_hidden),
                                 minval=-bound, maxval=bound, dtype=jnp.float32)
        whh = jax.random.uniform(k2, (n_hidden, 4 * n_hidden),
                                 minval=-bound, maxval=bound, dtype=jnp.float32)
        b_ih = jax.random.uniform(k3, (4 * n_hidden,),
                                  minval=-bound, maxval=bound, dtype=jnp.float32)
        b_hh = jax.random.uniform(k4, (4 * n_hidden,),
                                  minval=-bound, maxval=bound, dtype=jnp.float32)
        lstm.append((wih, whh, (b_ih + b_hh).reshape(1, 4 * n_hidden)))
    params["lstm"] = lstm
    return params


if __name__ == "__main__":
    # Small shapes consistent with the module's forward.
    B, Ns, Nt = 2, 8, 4            # batch, max_sent_num, decode steps
    D, H, L, n_hop = 16, 32, 2, 2  # input_dim, n_hidden, n_layer, n_hop

    key = jax.random.PRNGKey(0)
    kp, ka, kl = jax.random.split(key, 3)
    params = init_params(kp, D, H, L)

    attn_mem = 0.5 * jax.random.normal(ka, (B, Ns, D), dtype=jnp.float32)
    lstm_in = 0.5 * jax.random.normal(kl, (B, Nt, D), dtype=jnp.float32)
    mem_sizes = jnp.array([Ns, Ns - 3], dtype=jnp.int32)

    out = pointer_net_forward(params, attn_mem, mem_sizes, lstm_in, n_hop=n_hop)
    out = jax.block_until_ready(out)

    ref = jax.block_until_ready(
        ref_forward(params, attn_mem, mem_sizes, lstm_in, n_hop))

    assert out.shape == (B, Nt + 1, Ns), out.shape
    np.testing.assert_allclose(np.asarray(out), np.asarray(ref),
                               rtol=2e-2, atol=5e-3)
    print("KERNEL_OK")
</pallas_src>

<mosaic_0001>
module attributes {stable_mosaic.version = 11 : i64} {
  func.func @kernel(%arg0: i32, %arg1: memref<1x5x16xf32, #tpu.memory_space<vmem>>, %arg2: memref<1x2x32xf32, #tpu.memory_space<vmem>>, %arg3: memref<1x2x32xf32, #tpu.memory_space<vmem>>, %arg4: memref<16x128xf32, #tpu.memory_space<vmem>>, %arg5: memref<32x128xf32, #tpu.memory_space<vmem>>, %arg6: memref<1x128xf32, #tpu.memory_space<vmem>>, %arg7: memref<32x128xf32, #tpu.memory_space<vmem>>, %arg8: memref<32x128xf32, #tpu.memory_space<vmem>>, %arg9: memref<1x128xf32, #tpu.memory_space<vmem>>, %arg10: memref<1x5x32xf32, #tpu.memory_space<vmem>>, %arg11: memref<1x5x128xf32, #tpu.memory_space<vmem>>, %arg12: memref<1x5x32xf32, #tpu.memory_space<vmem>>, %arg13: memref<1x32xf32, #tpu.memory_space<vmem>>, %arg14: memref<1x32xf32, #tpu.memory_space<vmem>>) attributes {dimension_semantics = [#tpu.dimension_semantics<parallel>], iteration_bounds = array<i64: 2>, scalar_prefetch = 0 : i64, scratch_operands = 4 : i64, tpu.core_type = #tpu.core_type<tc>, window_params = [{transform_indices = @transform_0, window_bounds = array<i64: 1, 5, 16>}, {transform_indices = @transform_1, window_bounds = array<i64: 1, 2, 32>}, {transform_indices = @transform_2, window_bounds = array<i64: 1, 2, 32>}, {pipeline_mode = #tpu.pipeline_mode<synchronous>, transform_indices = @transform_3, window_bounds = array<i64: 16, 128>}, {pipeline_mode = #tpu.pipeline_mode<synchronous>, transform_indices = @transform_4, window_bounds = array<i64: 32, 128>}, {pipeline_mode = #tpu.pipeline_mode<synchronous>, transform_indices = @transform_5, window_bounds = array<i64: 1, 128>}, {pipeline_mode = #tpu.pipeline_mode<synchronous>, transform_indices = @transform_6, window_bounds = array<i64: 32, 128>}, {pipeline_mode = #tpu.pipeline_mode<synchronous>, transform_indices = @transform_7, window_bounds = array<i64: 32, 128>}, {pipeline_mode = #tpu.pipeline_mode<synchronous>, transform_indices = @transform_8, window_bounds = array<i64: 1, 128>}, {transform_indices = @transform_9, window_bounds = array<i64: 1, 5, 32>}]} {
    %c0 = arith.constant 0 : index
    %c0_0 = arith.constant 0 : index
    %c0_1 = arith.constant 0 : index
    %0 = vector.load %arg2[%c0, %c0_0, %c0_1] : memref<1x2x32xf32, #tpu.memory_space<vmem>>, vector<1x2x32xf32>
    %c0_2 = arith.constant 0 : index
    %c0_3 = arith.constant 0 : index
    %c0_4 = arith.constant 0 : index
    %1 = vector.load %arg3[%c0_2, %c0_3, %c0_4] : memref<1x2x32xf32, #tpu.memory_space<vmem>>, vector<1x2x32xf32>
    %c0_5 = arith.constant 0 : index
    %c0_6 = arith.constant 0 : index
    %2 = vector.load %arg4[%c0_5, %c0_6] : memref<16x128xf32, #tpu.memory_space<vmem>>, vector<16x128xf32>
    %c0_7 = arith.constant 0 : index
    %c0_8 = arith.constant 0 : index
    %3 = vector.load %arg5[%c0_7, %c0_8] : memref<32x128xf32, #tpu.memory_space<vmem>>, vector<32x128xf32>
    %c0_9 = arith.constant 0 : index
    %c0_10 = arith.constant 0 : index
    %4 = vector.load %arg6[%c0_9, %c0_10] : memref<1x128xf32, #tpu.memory_space<vmem>>, vector<1x128xf32>
    %c0_11 = arith.constant 0 : index
    %c0_12 = arith.constant 0 : index
    %c0_13 = arith.constant 0 : index
    %5 = vector.load %arg1[%c0_11, %c0_12, %c0_13] : memref<1x5x16xf32, #tpu.memory_space<vmem>>, vector<1x5x16xf32>
    %6 = vector.shape_cast %5 : vector<1x5x16xf32> to vector<5x16xf32>
    %7 = arith.truncf %6 : vector<5x16xf32> to vector<5x16xbf16>
    %8 = arith.truncf %2 : vector<16x128xf32> to vector<16x128xbf16>
    %cst = arith.constant dense<0.000000e+00> : vector<5x128xf32>
    %9 = tpu.matmul %7, %8, %cst {dimension_numbers = #tpu.dot_dimension_numbers<[1], [0], [0], [1], [0, 0, 1, 1], [], []>} : vector<5x16xbf16>, vector<16x128xbf16>, vector<5x128xf32> -> vector<5x128xf32>
    %10 = vector.broadcast %4 : vector<1x128xf32> to vector<5x128xf32>
    %11 = arith.addf %9, %10 : vector<5x128xf32>
    %12 = vector.shape_cast %11 : vector<5x128xf32> to vector<1x5x128xf32>
    %c0_14 = arith.constant 0 : index
    %c0_15 = arith.constant 0 : index
    %c0_16 = arith.constant 0 : index
    %13 = vector.load %arg11[%c0_14, %c0_15, %c0_16] : memref<1x5x128xf32, #tpu.memory_space<vmem>>, vector<1x5x128xf32>
    tpu.vector_store %arg11[%c0_14, %c0_15, %c0_16], %12 {strides = array<i32>} : memref<1x5x128xf32, #tpu.memory_space<vmem>>, vector<1x5x128xf32>,
    %14 = vector.extract_strided_slice %0 {offsets = [0, 0, 0], sizes = [1, 1, 32], strides = [1, 1, 1]} : vector<1x2x32xf32> to vector<1x1x32xf32>
    %15 = vector.shape_cast %14 : vector<1x1x32xf32> to vector<1x32xf32>
    %c0_17 = arith.constant 0 : index
    %c0_18 = arith.constant 0 : index
    %16 = vector.load %arg13[%c0_17, %c0_18] : memref<1x32xf32, #tpu.memory_space<vmem>>, vector<1x32xf32>
    tpu.vector_store %arg13[%c0_17, %c0_18], %15 {strides = array<i32>} : memref<1x32xf32, #tpu.memory_space<vmem>>, vector<1x32xf32>,
    %17 = vector.extract_strided_slice %1 {offsets = [0, 0, 0], sizes = [1, 1, 32], strides = [1, 1, 1]} : vector<1x2x32xf32> to vector<1x1x32xf32>
    %18 = vector.shape_cast %17 : vector<1x1x32xf32> to vector<1x32xf32>
    %c0_19 = arith.constant 0 : index
    %c0_20 = arith.constant 0 : index
    %19 = vector.load %arg14[%c0_19, %c0_20] : memref<1x32xf32, #tpu.memory_space<vmem>>, vector<1x32xf32>
    tpu.vector_store %arg14[%c0_19, %c0_20], %18 {strides = array<i32>} : memref<1x32xf32, #tpu.memory_space<vmem>>, vector<1x32xf32>,
    %c0_21 = arith.constant 0 : index
    %c0_22 = arith.constant 0 : index
    %c0_23 = arith.constant 0 : index
    %20 = vector.load %arg11[%c0_21, %c0_22, %c0_23] : memref<1x5x128xf32, #tpu.memory_space<vmem>>, vector<1x1x128xf32>
    %21 = vector.shape_cast %20 : vector<1x1x128xf32> to vector<1x128xf32>
    %c0_24 = arith.constant 0 : index
    %c0_25 = arith.constant 0 : index
    %22 = vector.load %arg13[%c0_24, %c0_25] : memref<1x32xf32, #tpu.memory_space<vmem>>, vector<1x32xf32>
    %cst_26 = arith.constant dense<0.000000e+00> : vector<1x128xf32>
    %23 = tpu.matmul %22, %3, %cst_26 {dimension_numbers = #tpu.dot_dimension_numbers<[1], [0], [0], [1], [0, 0, 1, 1], [], []>} : vector<1x32xf32>, vector<32x128xf32>, vector<1x128xf32> -> vector<1x128xf32>
    %24 = arith.addf %21, %23 : vector<1x128xf32>
    %25 = vector.extract_strided_slice %24 {offsets = [0, 0], sizes = [1, 32], strides = [1, 1]} : vector<1x128xf32> to vector<1x32xf32>
    %26 = arith.negf %25 : vector<1x32xf32>
    %27 = math.exp %26 : vector<1x32xf32>
    %cst_27 = arith.constant 1.000000e+00 : f32
    %28 = vector.broadcast %cst_27 : f32 to vector<1x32xf32>
    %29 = arith.addf %28, %27 : vector<1x32xf32>
    %30 = arith.divf %28, %29 : vector<1x32xf32>
    %31 = vector.extract_strided_slice %24 {offsets = [0, 32], sizes = [1, 32], strides = [1, 1]} : vector<1x128xf32> to vector<1x32xf32>
    %32 = arith.negf %31 : vector<1x32xf32>
    %33 = math.exp %32 : vector<1x32xf32>
    %cst_28 = arith.constant 1.000000e+00 : f32
    %34 = vector.broadcast %cst_28 : f32 to vector<1x32xf32>
    %35 = arith.addf %34, %33 : vector<1x32xf32>
    %36 = arith.divf %34, %35 : vector<1x32xf32>
    %37 = vector.extract_strided_slice %24 {offsets = [0, 64], sizes = [1, 32], strides = [1, 1]} : vector<1x128xf32> to vector<1x32xf32>
    %38 = math.tanh %37 : vector<1x32xf32>
    %39 = vector.extract_strided_slice %24 {offsets = [0, 96], sizes = [1, 32], strides = [1, 1]} : vector<1x128xf32> to vector<1x32xf32>
    %40 = arith.negf %39 : vector<1x32xf32>
    %41 = math.exp %40 : vector<1x32xf32>
    %cst_29 = arith.constant 1.000000e+00 : f32
    %42 = vector.broadcast %cst_29 : f32 to vector<1x32xf32>
    %43 = arith.addf %42, %41 : vector<1x32xf32>
    %44 = arith.divf %42, %43 : vector<1x32xf32>
    %c0_30 = arith.constant 0 : index
    %c0_31 = arith.constant 0 : index
    %45 = vector.load %arg14[%c0_30, %c0_31] : memref<1x32xf32, #tpu.memory_space<vmem>>, vector<1x32xf32>
    %46 = arith.mulf %36, %45 : vector<1x32xf32>
    %47 = arith.mulf %30, %38 : vector<1x32xf32>
    %48 = arith.addf %46, %47 : vector<1x32xf32>
    %49 = math.tanh %48 : vector<1x32xf32>
    %50 = arith.mulf %44, %49 : vector<1x32xf32>
    %c0_32 = arith.constant 0 : index
    %c0_33 = arith.constant 0 : index
    %51 = vector.load %arg14[%c0_32, %c0_33] : memref<1x32xf32, #tpu.memory_space<vmem>>, vector<1x32xf32>
    tpu.vector_store %arg14[%c0_32, %c0_33], %48 {strides = array<i32>} : memref<1x32xf32, #tpu.memory_space<vmem>>, vector<1x32xf32>,
    %c0_34 = arith.constant 0 : index
    %c0_35 = arith.constant 0 : index
    %52 = vector.load %arg13[%c0_34, %c0_35] : memref<1x32xf32, #tpu.memory_space<vmem>>, vector<1x32xf32>
    tpu.vector_store %arg13[%c0_34, %c0_35], %50 {strides = array<i32>} : memref<1x32xf32, #tpu.memory_space<vmem>>, vector<1x32xf32>,
    %53 = vector.shape_cast %50 : vector<1x32xf32> to vector<1x1x32xf32>
    %c0_36 = arith.constant 0 : index
    %c0_37 = arith.constant 0 : index
    %c0_38 = arith.constant 0 : index
    %54 = vector.load %arg12[%c0_36, %c0_37, %c0_38] : memref<1x5x32xf32, #tpu.memory_space<vmem>>, vector<1x1x32xf32>
    tpu.vector_store %arg12[%c0_36, %c0_37, %c0_38], %53 {strides = array<i32>} : memref<1x5x32xf32, #tpu.memory_space<vmem>>, vector<1x1x32xf32>,
    %c0_39 = arith.constant 0 : index
    %c1 = arith.constant 1 : index
    %c0_40 = arith.constant 0 : index
    %55 = vector.load %arg11[%c0_39, %c1, %c0_40] : memref<1x5x128xf32, #tpu.memory_space<vmem>>, vector<1x1x128xf32>
    %56 = vector.shape_cast %55 : vector<1x1x128xf32> to vector<1x128xf32>
    %c0_41 = arith.constant 0 : index
    %c0_42 = arith.constant 0 : index
    %57 = vector.load %arg13[%c0_41, %c0_42] : memref<1x32xf32, #tpu.memory_space<vmem>>, vector<1x32xf32>
    %cst_43 = arith.constant dense<0.000000e+00> : vector<1x128xf32>
    %58 = tpu.matmul %57, %3, %cst_43 {dimension_numbers = #tpu.dot_dimension_numbers<[1], [0], [0], [1], [0, 0, 1, 1], [], []>} : vector<1x32xf32>, vector<32x128xf32>, vector<1x128xf32> -> vector<1x128xf32>
    %59 = arith.addf %56, %58 : vector<1x128xf32>
    %60 = vector.extract_strided_slice %59 {offsets = [0, 0], sizes = [1, 32], strides = [1, 1]} : vector<1x128xf32> to vector<1x32xf32>
    %61 = arith.negf %60 : vector<1x32xf32>
    %62 = math.exp %61 : vector<1x32xf32>
    %cst_44 = arith.constant 1.000000e+00 : f32
    %63 = vector.broadcast %cst_44 : f32 to vector<1x32xf32>
    %64 = arith.addf %63, %62 : vector<1x32xf32>
    %65 = arith.divf %63, %64 : vector<1x32xf32>
    %66 = vector.extract_strided_slice %59 {offsets = [0, 32], sizes = [1, 32], strides = [1, 1]} : vector<1x128xf32> to vector<1x32xf32>
    %67 = arith.negf %66 : vector<1x32xf32>
    %68 = math.exp %67 : vector<1x32xf32>
    %cst_45 = arith.constant 1.000000e+00 : f32
    %69 = vector.broadcast %cst_45 : f32 to vector<1x32xf32>
    %70 = arith.addf %69, %68 : vector<1x32xf32>
    %71 = arith.divf %69, %70 : vector<1x32xf32>
    %72 = vector.extract_strided_slice %59 {offsets = [0, 64], sizes = [1, 32], strides = [1, 1]} : vector<1x128xf32> to vector<1x32xf32>
    %73 = math.tanh %72 : vector<1x32xf32>
    %74 = vector.extract_strided_slice %59 {offsets = [0, 96], sizes = [1, 32], strides = [1, 1]} : vector<1x128xf32> to vector<1x32xf32>
    %75 = arith.negf %74 : vector<1x32xf32>
    %76 = math.exp %75 : vector<1x32xf32>
    %cst_46 = arith.constant 1.000000e+00 : f32
    %77 = vector.broadcast %cst_46 : f32 to vector<1x32xf32>
    %78 = arith.addf %77, %76 : vector<1x32xf32>
    %79 = arith.divf %77, %78 : vector<1x32xf32>
    %c0_47 = arith.constant 0 : index
    %c0_48 = arith.constant 0 : index
    %80 = vector.load %arg14[%c0_47, %c0_48] : memref<1x32xf32, #tpu.memory_space<vmem>>, vector<1x32xf32>
    %81 = arith.mulf %71, %80 : vector<1x32xf32>
    %82 = arith.mulf %65, %73 : vector<1x32xf32>
    %83 = arith.addf %81, %82 : vector<1x32xf32>
    %84 = math.tanh %83 : vector<1x32xf32>
    %85 = arith.mulf %79, %84 : vector<1x32xf32>
    %c0_49 = arith.constant 0 : index
    %c0_50 = arith.constant 0 : index
    %86 = vector.load %arg14[%c0_49, %c0_50] : memref<1x32xf32, #tpu.memory_space<vmem>>, vector<1x32xf32>
    tpu.vector_store %arg14[%c0_49, %c0_50], %83 {strides = array<i32>} : memref<1x32xf32, #tpu.memory_space<vmem>>, vector<1x32xf32>,
    %c0_51 = arith.constant 0 : index
    %c0_52 = arith.constant 0 : index
    %87 = vector.load %arg13[%c0_51, %c0_52] : memref<1x32xf32, #tpu.memory_space<vmem>>, vector<1x32xf32>
    tpu.vector_store %arg13[%c0_51, %c0_52], %85 {strides = array<i32>} : memref<1x32xf32, #tpu.memory_space<vmem>>, vector<1x32xf32>,
    %88 = vector.shape_cast %85 : vector<1x32xf32> to vector<1x1x32xf32>
    %c0_53 = arith.constant 0 : index
    %c1_54 = arith.constant 1 : index
    %c0_55 = arith.constant 0 : index
    %89 = vector.load %arg12[%c0_53, %c1_54, %c0_55] : memref<1x5x32xf32, #tpu.memory_space<vmem>>, vector<1x1x32xf32>
    tpu.vector_store %arg12[%c0_53, %c1_54, %c0_55], %88 {strides = array<i32>} : memref<1x5x32xf32, #tpu.memory_space<vmem>>, vector<1x1x32xf32>,
    %c0_56 = arith.constant 0 : index
    %c2 = arith.constant 2 : index
    %c0_57 = arith.constant 0 : index
    %90 = vector.load %arg11[%c0_56, %c2, %c0_57] : memref<1x5x128xf32, #tpu.memory_space<vmem>>, vector<1x1x128xf32>
    %91 = vector.shape_cast %90 : vector<1x1x128xf32> to vector<1x128xf32>
    %c0_58 = arith.constant 0 : index
    %c0_59 = arith.constant 0 : index
    %92 = vector.load %arg13[%c0_58, %c0_59] : memref<1x32xf32, #tpu.memory_space<vmem>>, vector<1x32xf32>
    %cst_60 = arith.constant dense<0.000000e+00> : vector<1x128xf32>
    %93 = tpu.matmul %92, %3, %cst_60 {dimension_numbers = #tpu.dot_dimension_numbers<[1], [0], [0], [1], [0, 0, 1, 1], [], []>} : vector<1x32xf32>, vector<32x128xf32>, vector<1x128xf32> -> vector<1x128xf32>
    %94 = arith.addf %91, %93 : vector<1x128xf32>
    %95 = vector.extract_strided_slice %94 {offsets = [0, 0], sizes = [1, 32], strides = [1, 1]} : vector<1x128xf32> to vector<1x32xf32>
    %96 = arith.negf %95 : vector<1x32xf32>
    %97 = math.exp %96 : vector<1x32xf32>
    %cst_61 = arith.constant 1.000000e+00 : f32
    %98 = vector.broadcast %cst_61 : f32 to vector<1x32xf32>
    %99 = arith.addf %98, %97 : vector<1x32xf32>
    %100 = arith.divf %98, %99 : vector<1x32xf32>
    %101 = vector.extract_strided_slice %94 {offsets = [0, 32], sizes = [1, 32], strides = [1, 1]} : vector<1x128xf32> to vector<1x32xf32>
    %102 = arith.negf %101 : vector<1x32xf32>
    %103 = math.exp %102 : vector<1x32xf32>
    %cst_62 = arith.constant 1.000000e+00 : f32
    %104 = vector.broadcast %cst_62 : f32 to vector<1x32xf32>
    %105 = arith.addf %104, %103 : vector<1x32xf32>
    %106 = arith.divf %104, %105 : vector<1x32xf32>
    %107 = vector.extract_strided_slice %94 {offsets = [0, 64], sizes = [1, 32], strides = [1, 1]} : vector<1x128xf32> to vector<1x32xf32>
    %108 = math.tanh %107 : vector<1x32xf32>
    %109 = vector.extract_strided_slice %94 {offsets = [0, 96], sizes = [1, 32], strides = [1, 1]} : vector<1x128xf32> to vector<1x32xf32>
    %110 = arith.negf %109 : vector<1x32xf32>
    %111 = math.exp %110 : vector<1x32xf32>
    %cst_63 = arith.constant 1.000000e+00 : f32
    %112 = vector.broadcast %cst_63 : f32 to vector<1x32xf32>
    %113 = arith.addf %112, %111 : vector<1x32xf32>
    %114 = arith.divf %112, %113 : vector<1x32xf32>
    %c0_64 = arith.constant 0 : index
    %c0_65 = arith.constant 0 : index
    %115 = vector.load %arg14[%c0_64, %c0_65] : memref<1x32xf32, #tpu.memory_space<vmem>>, vector<1x32xf32>
    %116 = arith.mulf %106, %115 : vector<1x32xf32>
    %117 = arith.mulf %100, %108 : vector<1x32xf32>
    %118 = arith.addf %116, %117 : vector<1x32xf32>
    %119 = math.tanh %118 : vector<1x32xf32>
    %120 = arith.mulf %114, %119 : vector<1x32xf32>
    %c0_66 = arith.constant 0 : index
    %c0_67 = arith.constant 0 : index
    %121 = vector.load %arg14[%c0_66, %c0_67] : memref<1x32xf32, #tpu.memory_space<vmem>>, vector<1x32xf32>
    tpu.vector_store %arg14[%c0_66, %c0_67], %118 {strides = array<i32>} : memref<1x32xf32, #tpu.memory_space<vmem>>, vector<1x32xf32>,
    %c0_68 = arith.constant 0 : index
    %c0_69 = arith.constant 0 : index
    %122 = vector.load %arg13[%c0_68, %c0_69] : memref<1x32xf32, #tpu.memory_space<vmem>>, vector<1x32xf32>
    tpu.vector_store %arg13[%c0_68, %c0_69], %120 {strides = array<i32>} : memref<1x32xf32, #tpu.memory_space<vmem>>, vector<1x32xf32>,
    %123 = vector.shape_cast %120 : vector<1x32xf32> to vector<1x1x32xf32>
    %c0_70 = arith.constant 0 : index
    %c2_71 = arith.constant 2 : index
    %c0_72 = arith.constant 0 : index
    %124 = vector.load %arg12[%c0_70, %c2_71, %c0_72] : memref<1x5x32xf32, #tpu.memory_space<vmem>>, vector<1x1x32xf32>
    tpu.vector_store %arg12[%c0_70, %c2_71, %c0_72], %123 {strides = array<i32>} : memref<1x5x32xf32, #tpu.memory_space<vmem>>, vector<1x1x32xf32>,
    %c0_73 = arith.constant 0 : index
    %c3 = arith.constant 3 : index
    %c0_74 = arith.constant 0 : index
    %125 = vector.load %arg11[%c0_73, %c3, %c0_74] : memref<1x5x128xf32, #tpu.memory_space<vmem>>, vector<1x1x128xf32>
    %126 = vector.shape_cast %125 : vector<1x1x128xf32> to vector<1x128xf32>
    %c0_75 = arith.constant 0 : index
    %c0_76 = arith.constant 0 : index
    %127 = vector.load %arg13[%c0_75, %c0_76] : memref<1x32xf32, #tpu.memory_space<vmem>>, vector<1x32xf32>
    %cst_77 = arith.constant dense<0.000000e+00> : vector<1x128xf32>
    %128 = tpu.matmul %127, %3, %cst_77 {dimension_numbers = #tpu.dot_dimension_numbers<[1], [0], [0], [1], [0, 0, 1, 1], [], []>} : vector<1x32xf32>, vector<32x128xf32>, vector<1x128xf32> -> vector<1x128xf32>
    %129 = arith.addf %126, %128 : vector<1x128xf32>
    %130 = vector.extract_strided_slice %129 {offsets = [0, 0], sizes = [1, 32], strides = [1, 1]} : vector<1x128xf32> to vector<1x32xf32>
    %131 = arith.negf %130 : vector<1x32xf32>
    %132 = math.exp %131 : vector<1x32xf32>
    %cst_78 = arith.constant 1.000000e+00 : f32
    %133 = vector.broadcast %cst_78 : f32 to vector<1x32xf32>
    %134 = arith.addf %133, %132 : vector<1x32xf32>
    %135 = arith.divf %133, %134 : vector<1x32xf32>
    %136 = vector.extract_strided_slice %129 {offsets = [0, 32], sizes = [1, 32], strides = [1, 1]} : vector<1x128xf32> to vector<1x32xf32>
    %137 = arith.negf %136 : vector<1x32xf32>
    %138 = math.exp %137 : vector<1x32xf32>
    %cst_79 = arith.constant 1.000000e+00 : f32
    %139 = vector.broadcast %cst_79 : f32 to vector<1x32xf32>
    %140 = arith.addf %139, %138 : vector<1x32xf32>
    %141 = arith.divf %139, %140 : vector<1x32xf32>
    %142 = vector.extract_strided_slice %129 {offsets = [0, 64], sizes = [1, 32], strides = [1, 1]} : vector<1x128xf32> to vector<1x32xf32>
    %143 = math.tanh %142 : vector<1x32xf32>
    %144 = vector.extract_strided_slice %129 {offsets = [0, 96], sizes = [1, 32], strides = [1, 1]} : vector<1x128xf32> to vector<1x32xf32>
    %145 = arith.negf %144 : vector<1x32xf32>
    %146 = math.exp %145 : vector<1x32xf32>
    %cst_80 = arith.constant 1.000000e+00 : f32
    %147 = vector.broadcast %cst_80 : f32 to vector<1x32xf32>
    %148 = arith.addf %147, %146 : vector<1x32xf32>
    %149 = arith.divf %147, %148 : vector<1x32xf32>
    %c0_81 = arith.constant 0 : index
    %c0_82 = arith.constant 0 : index
    %150 = vector.load %arg14[%c0_81, %c0_82] : memref<1x32xf32, #tpu.memory_space<vmem>>, vector<1x32xf32>
    %151 = arith.mulf %141, %150 : vector<1x32xf32>
    %152 = arith.mulf %135, %143 : vector<1x32xf32>
    %153 = arith.addf %151, %152 : vector<1x32xf32>
    %154 = math.tanh %153 : vector<1x32xf32>
    %155 = arith.mulf %149, %154 : vector<1x32xf32>
    %c0_83 = arith.constant 0 : index
    %c0_84 = arith.constant 0 : index
    %156 = vector.load %arg14[%c0_83, %c0_84] : memref<1x32xf32, #tpu.memory_space<vmem>>, vector<1x32xf32>
    tpu.vector_store %arg14[%c0_83, %c0_84], %153 {strides = array<i32>} : memref<1x32xf32, #tpu.memory_space<vmem>>, vector<1x32xf32>,
    %c0_85 = arith.constant 0 : index
    %c0_86 = arith.constant 0 : index
    %157 = vector.load %arg13[%c0_85, %c0_86] : memref<1x32xf32, #tpu.memory_space<vmem>>, vector<1x32xf32>
    tpu.vector_store %arg13[%c0_85, %c0_86], %155 {strides = array<i32>} : memref<1x32xf32, #tpu.memory_space<vmem>>, vector<1x32xf32>,
    %158 = vector.shape_cast %155 : vector<1x32xf32> to vector<1x1x32xf32>
    %c0_87 = arith.constant 0 : index
    %c3_88 = arith.constant 3 : index
    %c0_89 = arith.constant 0 : index
    %159 = vector.load %arg12[%c0_87, %c3_88, %c0_89] : memref<1x5x32xf32, #tpu.memory_space<vmem>>, vector<1x1x32xf32>
    tpu.vector_store %arg12[%c0_87, %c3_88, %c0_89], %158 {strides = array<i32>} : memref<1x5x32xf32, #tpu.memory_space<vmem>>, vector<1x1x32xf32>,
    %c0_90 = arith.constant 0 : index
    %c4 = arith.constant 4 : index
    %c0_91 = arith.constant 0 : index
    %160 = vector.load %arg11[%c0_90, %c4, %c0_91] : memref<1x5x128xf32, #tpu.memory_space<vmem>>, vector<1x1x128xf32>
    %161 = vector.shape_cast %160 : vector<1x1x128xf32> to vector<1x128xf32>
    %c0_92 = arith.constant 0 : index
    %c0_93 = arith.constant 0 : index
    %162 = vector.load %arg13[%c0_92, %c0_93] : memref<1x32xf32, #tpu.memory_space<vmem>>, vector<1x32xf32>
    %cst_94 = arith.constant dense<0.000000e+00> : vector<1x128xf32>
    %163 = tpu.matmul %162, %3, %cst_94 {dimension_numbers = #tpu.dot_dimension_numbers<[1], [0], [0], [1], [0, 0, 1, 1], [], []>} : vector<1x32xf32>, vector<32x128xf32>, vector<1x128xf32> -> vector<1x128xf32>
    %164 = arith.addf %161, %163 : vector<1x128xf32>
    %165 = vector.extract_strided_slice %164 {offsets = [0, 0], sizes = [1, 32], strides = [1, 1]} : vector<1x128xf32> to vector<1x32xf32>
    %166 = arith.negf %165 : vector<1x32xf32>
    %167 = math.exp %166 : vector<1x32xf32>
    %cst_95 = arith.constant 1.000000e+00 : f32
    %168 = vector.broadcast %cst_95 : f32 to vector<1x32xf32>
    %169 = arith.addf %168, %167 : vector<1x32xf32>
    %170 = arith.divf %168, %169 : vector<1x32xf32>
    %171 = vector.extract_strided_slice %164 {offsets = [0, 32], sizes = [1, 32], strides = [1, 1]} : vector<1x128xf32> to vector<1x32xf32>
    %172 = arith.negf %171 : vector<1x32xf32>
    %173 = math.exp %172 : vector<1x32xf32>
    %cst_96 = arith.constant 1.000000e+00 : f32
    %174 = vector.broadcast %cst_96 : f32 to vector<1x32xf32>
    %175 = arith.addf %174, %173 : vector<1x32xf32>
    %176 = arith.divf %174, %175 : vector<1x32xf32>
    %177 = vector.extract_strided_slice %164 {offsets = [0, 64], sizes = [1, 32], strides = [1, 1]} : vector<1x128xf32> to vector<1x32xf32>
    %178 = math.tanh %177 : vector<1x32xf32>
    %179 = vector.extract_strided_slice %164 {offsets = [0, 96], sizes = [1, 32], strides = [1, 1]} : vector<1x128xf32> to vector<1x32xf32>
    %180 = arith.negf %179 : vector<1x32xf32>
    %181 = math.exp %180 : vector<1x32xf32>
    %cst_97 = arith.constant 1.000000e+00 : f32
    %182 = vector.broadcast %cst_97 : f32 to vector<1x32xf32>
    %183 = arith.addf %182, %181 : vector<1x32xf32>
    %184 = arith.divf %182, %183 : vector<1x32xf32>
    %c0_98 = arith.constant 0 : index
    %c0_99 = arith.constant 0 : index
    %185 = vector.load %arg14[%c0_98, %c0_99] : memref<1x32xf32, #tpu.memory_space<vmem>>, vector<1x32xf32>
    %186 = arith.mulf %176, %185 : vector<1x32xf32>
    %187 = arith.mulf %170, %178 : vector<1x32xf32>
    %188 = arith.addf %186, %187 : vector<1x32xf32>
    %189 = math.tanh %188 : vector<1x32xf32>
    %190 = arith.mulf %184, %189 : vector<1x32xf32>
    %c0_100 = arith.constant 0 : index
    %c0_101 = arith.constant 0 : index
    %191 = vector.load %arg14[%c0_100, %c0_101] : memref<1x32xf32, #tpu.memory_space<vmem>>, vector<1x32xf32>
    tpu.vector_store %arg14[%c0_100, %c0_101], %188 {strides = array<i32>} : memref<1x32xf32, #tpu.memory_space<vmem>>, vector<1x32xf32>,
    %c0_102 = arith.constant 0 : index
    %c0_103 = arith.constant 0 : index
    %192 = vector.load %arg13[%c0_102, %c0_103] : memref<1x32xf32, #tpu.memory_space<vmem>>, vector<1x32xf32>
    tpu.vector_store %arg13[%c0_102, %c0_103], %190 {strides = array<i32>} : memref<1x32xf32, #tpu.memory_space<vmem>>, vector<1x32xf32>,
    %193 = vector.shape_cast %190 : vector<1x32xf32> to vector<1x1x32xf32>
    %c0_104 = arith.constant 0 : index
    %c4_105 = arith.constant 4 : index
    %c0_106 = arith.constant 0 : index
    %194 = vector.load %arg12[%c0_104, %c4_105, %c0_106] : memref<1x5x32xf32, #tpu.memory_space<vmem>>, vector<1x1x32xf32>
    tpu.vector_store %arg12[%c0_104, %c4_105, %c0_106], %193 {strides = array<i32>} : memref<1x5x32xf32, #tpu.memory_space<vmem>>, vector<1x1x32xf32>,
    %c0_107 = arith.constant 0 : index
    %c0_108 = arith.constant 0 : index
    %195 = vector.load %arg7[%c0_107, %c0_108] : memref<32x128xf32, #tpu.memory_space<vmem>>, vector<32x128xf32>
    %c0_109 = arith.constant 0 : index
    %c0_110 = arith.constant 0 : index
    %196 = vector.load %arg8[%c0_109, %c0_110] : memref<32x128xf32, #tpu.memory_space<vmem>>, vector<32x128xf32>
    %c0_111 = arith.constant 0 : index
    %c0_112 = arith.constant 0 : index
    %197 = vector.load %arg9[%c0_111, %c0_112] : memref<1x128xf32, #tpu.memory_space<vmem>>, vector<1x128xf32>
    %c0_113 = arith.constant 0 : index
    %c0_114 = arith.constant 0 : index
    %c0_115 = arith.constant 0 : index
    %198 = vector.load %arg12[%c0_113, %c0_114, %c0_115] : memref<1x5x32xf32, #tpu.memory_space<vmem>>, vector<1x5x32xf32>
    %199 = vector.shape_cast %198 : vector<1x5x32xf32> to vector<5x32xf32>
    %200 = arith.truncf %199 : vector<5x32xf32> to vector<5x32xbf16>
    %201 = arith.truncf %195 : vector<32x128xf32> to vector<32x128xbf16>
    %cst_116 = arith.constant dense<0.000000e+00> : vector<5x128xf32>
    %202 = tpu.matmul %200, %201, %cst_116 {dimension_numbers = #tpu.dot_dimension_numbers<[1], [0], [0], [1], [0, 0, 1, 1], [], []>} : vector<5x32xbf16>, vector<32x128xbf16>, vector<5x128xf32> -> vector<5x128xf32>
    %203 = vector.broadcast %197 : vector<1x128xf32> to vector<5x128xf32>
    %204 = arith.addf %202, %203 : vector<5x128xf32>
    %205 = vector.shape_cast %204 : vector<5x128xf32> to vector<1x5x128xf32>
    %c0_117 = arith.constant 0 : index
    %c0_118 = arith.constant 0 : index
    %c0_119 = arith.constant 0 : index
    %206 = vector.load %arg11[%c0_117, %c0_118, %c0_119] : memref<1x5x128xf32, #tpu.memory_space<vmem>>, vector<1x5x128xf32>
    tpu.vector_store %arg11[%c0_117, %c0_118, %c0_119], %205 {strides = array<i32>} : memref<1x5x128xf32, #tpu.memory_space<vmem>>, vector<1x5x128xf32>,
    %207 = vector.extract_strided_slice %0 {offsets = [0, 1, 0], sizes = [1, 1, 32], strides = [1, 1, 1]} : vector<1x2x32xf32> to vector<1x1x32xf32>
    %208 = vector.shape_cast %207 : vector<1x1x32xf32> to vector<1x32xf32>
    %c0_120 = arith.constant 0 : index
    %c0_121 = arith.constant 0 : index
    %209 = vector.load %arg13[%c0_120, %c0_121] : memref<1x32xf32, #tpu.memory_space<vmem>>, vector<1x32xf32>
    tpu.vector_store %arg13[%c0_120, %c0_121], %208 {strides = array<i32>} : memref<1x32xf32, #tpu.memory_space<vmem>>, vector<1x32xf32>,
    %210 = vector.extract_strided_slice %1 {offsets = [0, 1, 0], sizes = [1, 1, 32], strides = [1, 1, 1]} : vector<1x2x32xf32> to vector<1x1x32xf32>
    %211 = vector.shape_cast %210 : vector<1x1x32xf32> to vector<1x32xf32>
    %c0_122 = arith.constant 0 : index
    %c0_123 = arith.constant 0 : index
    %212 = vector.load %arg14[%c0_122, %c0_123] : memref<1x32xf32, #tpu.memory_space<vmem>>, vector<1x32xf32>
    tpu.vector_store %arg14[%c0_122, %c0_123], %211 {strides = array<i32>} : memref<1x32xf32, #tpu.memory_space<vmem>>, vector<1x32xf32>,
    %c0_124 = arith.constant 0 : index
    %c0_125 = arith.constant 0 : index
    %c0_126 = arith.constant 0 : index
    %213 = vector.load %arg11[%c0_124, %c0_125, %c0_126] : memref<1x5x128xf32, #tpu.memory_space<vmem>>, vector<1x1x128xf32>
    %214 = vector.shape_cast %213 : vector<1x1x128xf32> to vector<1x128xf32>
    %c0_127 = arith.constant 0 : index
    %c0_128 = arith.constant 0 : index
    %215 = vector.load %arg13[%c0_127, %c0_128] : memref<1x32xf32, #tpu.memory_space<vmem>>, vector<1x32xf32>
    %cst_129 = arith.constant dense<0.000000e+00> : vector<1x128xf32>
    %216 = tpu.matmul %215, %196, %cst_129 {dimension_numbers = #tpu.dot_dimension_numbers<[1], [0], [0], [1], [0, 0, 1, 1], [], []>} : vector<1x32xf32>, vector<32x128xf32>, vector<1x128xf32> -> vector<1x128xf32>
    %217 = arith.addf %214, %216 : vector<1x128xf32>
    %218 = vector.extract_strided_slice %217 {offsets = [0, 0], sizes = [1, 32], strides = [1, 1]} : vector<1x128xf32> to vector<1x32xf32>
    %219 = arith.negf %218 : vector<1x32xf32>
    %220 = math.exp %219 : vector<1x32xf32>
    %cst_130 = arith.constant 1.000000e+00 : f32
    %221 = vector.broadcast %cst_130 : f32 to vector<1x32xf32>
    %222 = arith.addf %221, %220 : vector<1x32xf32>
    %223 = arith.divf %221, %222 : vector<1x32xf32>
    %224 = vector.extract_strided_slice %217 {offsets = [0, 32], sizes = [1, 32], strides = [1, 1]} : vector<1x128xf32> to vector<1x32xf32>
    %225 = arith.negf %224 : vector<1x32xf32>
    %226 = math.exp %225 : vector<1x32xf32>
    %cst_131 = arith.constant 1.000000e+00 : f32
    %227 = vector.broadcast %cst_131 : f32 to vector<1x32xf32>
    %228 = arith.addf %227, %226 : vector<1x32xf32>
    %229 = arith.divf %227, %228 : vector<1x32xf32>
    %230 = vector.extract_strided_slice %217 {offsets = [0, 64], sizes = [1, 32], strides = [1, 1]} : vector<1x128xf32> to vector<1x32xf32>
    %231 = math.tanh %230 : vector<1x32xf32>
    %232 = vector.extract_strided_slice %217 {offsets = [0, 96], sizes = [1, 32], strides = [1, 1]} : vector<1x128xf32> to vector<1x32xf32>
    %233 = arith.negf %232 : vector<1x32xf32>
    %234 = math.exp %233 : vector<1x32xf32>
    %cst_132 = arith.constant 1.000000e+00 : f32
    %235 = vector.broadcast %cst_132 : f32 to vector<1x32xf32>
    %236 = arith.addf %235, %234 : vector<1x32xf32>
    %237 = arith.divf %235, %236 : vector<1x32xf32>
    %c0_133 = arith.constant 0 : index
    %c0_134 = arith.constant 0 : index
    %238 = vector.load %arg14[%c0_133, %c0_134] : memref<1x32xf32, #tpu.memory_space<vmem>>, vector<1x32xf32>
    %239 = arith.mulf %229, %238 : vector<1x32xf32>
    %240 = arith.mulf %223, %231 : vector<1x32xf32>
    %241 = arith.addf %239, %240 : vector<1x32xf32>
    %242 = math.tanh %241 : vector<1x32xf32>
    %243 = arith.mulf %237, %242 : vector<1x32xf32>
    %c0_135 = arith.constant 0 : index
    %c0_136 = arith.constant 0 : index
    %244 = vector.load %arg14[%c0_135, %c0_136] : memref<1x32xf32, #tpu.memory_space<vmem>>, vector<1x32xf32>
    tpu.vector_store %arg14[%c0_135, %c0_136], %241 {strides = array<i32>} : memref<1x32xf32, #tpu.memory_space<vmem>>, vector<1x32xf32>,
    %c0_137 = arith.constant 0 : index
    %c0_138 = arith.constant 0 : index
    %245 = vector.load %arg13[%c0_137, %c0_138] : memref<1x32xf32, #tpu.memory_space<vmem>>, vector<1x32xf32>
    tpu.vector_store %arg13[%c0_137, %c0_138], %243 {strides = array<i32>} : memref<1x32xf32, #tpu.memory_space<vmem>>, vector<1x32xf32>,
    %246 = vector.shape_cast %243 : vector<1x32xf32> to vector<1x1x32xf32>
    %c0_139 = arith.constant 0 : index
    %c0_140 = arith.constant 0 : index
    %c0_141 = arith.constant 0 : index
    %247 = vector.load %arg10[%c0_139, %c0_140, %c0_141] : memref<1x5x32xf32, #tpu.memory_space<vmem>>, vector<1x1x32xf32>
    tpu.vector_store %arg10[%c0_139, %c0_140, %c0_141], %246 {strides = array<i32>} : memref<1x5x32xf32, #tpu.memory_space<vmem>>, vector<1x1x32xf32>,
    %c0_142 = arith.constant 0 : index
    %c1_143 = arith.constant 1 : index
    %c0_144 = arith.constant 0 : index
    %248 = vector.load %arg11[%c0_142, %c1_143, %c0_144] : memref<1x5x128xf32, #tpu.memory_space<vmem>>, vector<1x1x128xf32>
    %249 = vector.shape_cast %248 : vector<1x1x128xf32> to vector<1x128xf32>
    %c0_145 = arith.constant 0 : index
    %c0_146 = arith.constant 0 : index
    %250 = vector.load %arg13[%c0_145, %c0_146] : memref<1x32xf32, #tpu.memory_space<vmem>>, vector<1x32xf32>
    %cst_147 = arith.constant dense<0.000000e+00> : vector<1x128xf32>
    %251 = tpu.matmul %250, %196, %cst_147 {dimension_numbers = #tpu.dot_dimension_numbers<[1], [0], [0], [1], [0, 0, 1, 1], [], []>} : vector<1x32xf32>, vector<32x128xf32>, vector<1x128xf32> -> vector<1x128xf32>
    %252 = arith.addf %249, %251 : vector<1x128xf32>
    %253 = vector.extract_strided_slice %252 {offsets = [0, 0], sizes = [1, 32], strides = [1, 1]} : vector<1x128xf32> to vector<1x32xf32>
    %254 = arith.negf %253 : vector<1x32xf32>
    %255 = math.exp %254 : vector<1x32xf32>
    %cst_148 = arith.constant 1.000000e+00 : f32
    %256 = vector.broadcast %cst_148 : f32 to vector<1x32xf32>
    %257 = arith.addf %256, %255 : vector<1x32xf32>
    %258 = arith.divf %256, %257 : vector<1x32xf32>
    %259 = vector.extract_strided_slice %252 {offsets = [0, 32], sizes = [1, 32], strides = [1, 1]} : vector<1x128xf32> to vector<1x32xf32>
    %260 = arith.negf %259 : vector<1x32xf32>
    %261 = math.exp %260 : vector<1x32xf32>
    %cst_149 = arith.constant 1.000000e+00 : f32
    %262 = vector.broadcast %cst_149 : f32 to vector<1x32xf32>
    %263 = arith.addf %262, %261 : vector<1x32xf32>
    %264 = arith.divf %262, %263 : vector<1x32xf32>
    %265 = vector.extract_strided_slice %252 {offsets = [0, 64], sizes = [1, 32], strides = [1, 1]} : vector<1x128xf32> to vector<1x32xf32>
    %266 = math.tanh %265 : vector<1x32xf32>
    %267 = vector.extract_strided_slice %252 {offsets = [0, 96], sizes = [1, 32], strides = [1, 1]} : vector<1x128xf32> to vector<1x32xf32>
    %268 = arith.negf %267 : vector<1x32xf32>
    %269 = math.exp %268 : vector<1x32xf32>
    %cst_150 = arith.constant 1.000000e+00 : f32
    %270 = vector.broadcast %cst_150 : f32 to vector<1x32xf32>
    %271 = arith.addf %270, %269 : vector<1x32xf32>
    %272 = arith.divf %270, %271 : vector<1x32xf32>
    %c0_151 = arith.constant 0 : index
    %c0_152 = arith.constant 0 : index
    %273 = vector.load %arg14[%c0_151, %c0_152] : memref<1x32xf32, #tpu.memory_space<vmem>>, vector<1x32xf32>
    %274 = arith.mulf %264, %273 : vector<1x32xf32>
    %275 = arith.mulf %258, %266 : vector<1x32xf32>
    %276 = arith.addf %274, %275 : vector<1x32xf32>
    %277 = math.tanh %276 : vector<1x32xf32>
    %278 = arith.mulf %272, %277 : vector<1x32xf32>
    %c0_153 = arith.constant 0 : index
    %c0_154 = arith.constant 0 : index
    %279 = vector.load %arg14[%c0_153, %c0_154] : memref<1x32xf32, #tpu.memory_space<vmem>>, vector<1x32xf32>
    tpu.vector_store %arg14[%c0_153, %c0_154], %276 {strides = array<i32>} : memref<1x32xf32, #tpu.memory_space<vmem>>, vector<1x32xf32>,
    %c0_155 = arith.constant 0 : index
    %c0_156 = arith.constant 0 : index
    %280 = vector.load %arg13[%c0_155, %c0_156] : memref<1x32xf32, #tpu.memory_space<vmem>>, vector<1x32xf32>
    tpu.vector_store %arg13[%c0_155, %c0_156], %278 {strides = array<i32>} : memref<1x32xf32, #tpu.memory_space<vmem>>, vector<1x32xf32>,
    %281 = vector.shape_cast %278 : vector<1x32xf32> to vector<1x1x32xf32>
    %c0_157 = arith.constant 0 : index
    %c1_158 = arith.constant 1 : index
    %c0_159 = arith.constant 0 : index
    %282 = vector.load %arg10[%c0_157, %c1_158, %c0_159] : memref<1x5x32xf32, #tpu.memory_space<vmem>>, vector<1x1x32xf32>
    tpu.vector_store %arg10[%c0_157, %c1_158, %c0_159], %281 {strides = array<i32>} : memref<1x5x32xf32, #tpu.memory_space<vmem>>, vector<1x1x32xf32>,
    %c0_160 = arith.constant 0 : index
    %c2_161 = arith.constant 2 : index
    %c0_162 = arith.constant 0 : index
    %283 = vector.load %arg11[%c0_160, %c2_161, %c0_162] : memref<1x5x128xf32, #tpu.memory_space<vmem>>, vector<1x1x128xf32>
    %284 = vector.shape_cast %283 : vector<1x1x128xf32> to vector<1x128xf32>
    %c0_163 = arith.constant 0 : index
    %c0_164 = arith.constant 0 : index
    %285 = vector.load %arg13[%c0_163, %c0_164] : memref<1x32xf32, #tpu.memory_space<vmem>>, vector<1x32xf32>
    %cst_165 = arith.constant dense<0.000000e+00> : vector<1x128xf32>
    %286 = tpu.matmul %285, %196, %cst_165 {dimension_numbers = #tpu.dot_dimension_numbers<[1], [0], [0], [1], [0, 0, 1, 1], [], []>} : vector<1x32xf32>, vector<32x128xf32>, vector<1x128xf32> -> vector<1x128xf32>
    %287 = arith.addf %284, %286 : vector<1x128xf32>
    %288 = vector.extract_strided_slice %287 {offsets = [0, 0], sizes = [1, 32], strides = [1, 1]} : vector<1x128xf32> to vector<1x32xf32>
    %289 = arith.negf %288 : vector<1x32xf32>
    %290 = math.exp %289 : vector<1x32xf32>
    %cst_166 = arith.constant 1.000000e+00 : f32
    %291 = vector.broadcast %cst_166 : f32 to vector<1x32xf32>
    %292 = arith.addf %291, %290 : vector<1x32xf32>
    %293 = arith.divf %291, %292 : vector<1x32xf32>
    %294 = vector.extract_strided_slice %287 {offsets = [0, 32], sizes = [1, 32], strides = [1, 1]} : vector<1x128xf32> to vector<1x32xf32>
    %295 = arith.negf %294 : vector<1x32xf32>
    %296 = math.exp %295 : vector<1x32xf32>
    %cst_167 = arith.constant 1.000000e+00 : f32
    %297 = vector.broadcast %cst_167 : f32 to vector<1x32xf32>
    %298 = arith.addf %297, %296 : vector<1x32xf32>
    %299 = arith.divf %297, %298 : vector<1x32xf32>
    %300 = vector.extract_strided_slice %287 {offsets = [0, 64], sizes = [1, 32], strides = [1, 1]} : vector<1x128xf32> to vector<1x32xf32>
    %301 = math.tanh %300 : vector<1x32xf32>
    %302 = vector.extract_strided_slice %287 {offsets = [0, 96], sizes = [1, 32], strides = [1, 1]} : vector<1x128xf32> to vector<1x32xf32>
    %303 = arith.negf %302 : vector<1x32xf32>
    %304 = math.exp %303 : vector<1x32xf32>
    %cst_168 = arith.constant 1.000000e+00 : f32
    %305 = vector.broadcast %cst_168 : f32 to vector<1x32xf32>
    %306 = arith.addf %305, %304 : vector<1x32xf32>
    %307 = arith.divf %305, %306 : vector<1x32xf32>
    %c0_169 = arith.constant 0 : index
    %c0_170 = arith.constant 0 : index
    %308 = vector.load %arg14[%c0_169, %c0_170] : memref<1x32xf32, #tpu.memory_space<vmem>>, vector<1x32xf32>
    %309 = arith.mulf %299, %308 : vector<1x32xf32>
    %310 = arith.mulf %293, %301 : vector<1x32xf32>
    %311 = arith.addf %309, %310 : vector<1x32xf32>
    %312 = math.tanh %311 : vector<1x32xf32>
    %313 = arith.mulf %307, %312 : vector<1x32xf32>
    %c0_171 = arith.constant 0 : index
    %c0_172 = arith.constant 0 : index
    %314 = vector.load %arg14[%c0_171, %c0_172] : memref<1x32xf32, #tpu.memory_space<vmem>>, vector<1x32xf32>
    tpu.vector_store %arg14[%c0_171, %c0_172], %311 {strides = array<i32>} : memref<1x32xf32, #tpu.memory_space<vmem>>, vector<1x32xf32>,
    %c0_173 = arith.constant 0 : index
    %c0_174 = arith.constant 0 : index
    %315 = vector.load %arg13[%c0_173, %c0_174] : memref<1x32xf32, #tpu.memory_space<vmem>>, vector<1x32xf32>
    tpu.vector_store %arg13[%c0_173, %c0_174], %313 {strides = array<i32>} : memref<1x32xf32, #tpu.memory_space<vmem>>, vector<1x32xf32>,
    %316 = vector.shape_cast %313 : vector<1x32xf32> to vector<1x1x32xf32>
    %c0_175 = arith.constant 0 : index
    %c2_176 = arith.constant 2 : index
    %c0_177 = arith.constant 0 : index
    %317 = vector.load %arg10[%c0_175, %c2_176, %c0_177] : memref<1x5x32xf32, #tpu.memory_space<vmem>>, vector<1x1x32xf32>
    tpu.vector_store %arg10[%c0_175, %c2_176, %c0_177], %316 {strides = array<i32>} : memref<1x5x32xf32, #tpu.memory_space<vmem>>, vector<1x1x32xf32>,
    %c0_178 = arith.constant 0 : index
    %c3_179 = arith.constant 3 : index
    %c0_180 = arith.constant 0 : index
    %318 = vector.load %arg11[%c0_178, %c3_179, %c0_180] : memref<1x5x128xf32, #tpu.memory_space<vmem>>, vector<1x1x128xf32>
    %319 = vector.shape_cast %318 : vector<1x1x128xf32> to vector<1x128xf32>
    %c0_181 = arith.constant 0 : index
    %c0_182 = arith.constant 0 : index
    %320 = vector.load %arg13[%c0_181, %c0_182] : memref<1x32xf32, #tpu.memory_space<vmem>>, vector<1x32xf32>
    %cst_183 = arith.constant dense<0.000000e+00> : vector<1x128xf32>
    %321 = tpu.matmul %320, %196, %cst_183 {dimension_numbers = #tpu.dot_dimension_numbers<[1], [0], [0], [1], [0, 0, 1, 1], [], []>} : vector<1x32xf32>, vector<32x128xf32>, vector<1x128xf32> -> vector<1x128xf32>
    %322 = arith.addf %319, %321 : vector<1x128xf32>
    %323 = vector.extract_strided_slice %322 {offsets = [0, 0], sizes = [1, 32], strides = [1, 1]} : vector<1x128xf32> to vector<1x32xf32>
    %324 = arith.negf %323 : vector<1x32xf32>
    %325 = math.exp %324 : vector<1x32xf32>
    %cst_184 = arith.constant 1.000000e+00 : f32
    %326 = vector.broadcast %cst_184 : f32 to vector<1x32xf32>
    %327 = arith.addf %326, %325 : vector<1x32xf32>
    %328 = arith.divf %326, %327 : vector<1x32xf32>
    %329 = vector.extract_strided_slice %322 {offsets = [0, 32], sizes = [1, 32], strides = [1, 1]} : vector<1x128xf32> to vector<1x32xf32>
    %330 = arith.negf %329 : vector<1x32xf32>
    %331 = math.exp %330 : vector<1x32xf32>
    %cst_185 = arith.constant 1.000000e+00 : f32
    %332 = vector.broadcast %cst_185 : f32 to vector<1x32xf32>
    %333 = arith.addf %332, %331 : vector<1x32xf32>
    %334 = arith.divf %332, %333 : vector<1x32xf32>
    %335 = vector.extract_strided_slice %322 {offsets = [0, 64], sizes = [1, 32], strides = [1, 1]} : vector<1x128xf32> to vector<1x32xf32>
    %336 = math.tanh %335 : vector<1x32xf32>
    %337 = vector.extract_strided_slice %322 {offsets = [0, 96], sizes = [1, 32], strides = [1, 1]} : vector<1x128xf32> to vector<1x32xf32>
    %338 = arith.negf %337 : vector<1x32xf32>
    %339 = math.exp %338 : vector<1x32xf32>
    %cst_186 = arith.constant 1.000000e+00 : f32
    %340 = vector.broadcast %cst_186 : f32 to vector<1x32xf32>
    %341 = arith.addf %340, %339 : vector<1x32xf32>
    %342 = arith.divf %340, %341 : vector<1x32xf32>
    %c0_187 = arith.constant 0 : index
    %c0_188 = arith.constant 0 : index
    %343 = vector.load %arg14[%c0_187, %c0_188] : memref<1x32xf32, #tpu.memory_space<vmem>>, vector<1x32xf32>
    %344 = arith.mulf %334, %343 : vector<1x32xf32>
    %345 = arith.mulf %328, %336 : vector<1x32xf32>
    %346 = arith.addf %344, %345 : vector<1x32xf32>
    %347 = math.tanh %346 : vector<1x32xf32>
    %348 = arith.mulf %342, %347 : vector<1x32xf32>
    %c0_189 = arith.constant 0 : index
    %c0_190 = arith.constant 0 : index
    %349 = vector.load %arg14[%c0_189, %c0_190] : memref<1x32xf32, #tpu.memory_space<vmem>>, vector<1x32xf32>
    tpu.vector_store %arg14[%c0_189, %c0_190], %346 {strides = array<i32>} : memref<1x32xf32, #tpu.memory_space<vmem>>, vector<1x32xf32>,
    %c0_191 = arith.constant 0 : index
    %c0_192 = arith.constant 0 : index
    %350 = vector.load %arg13[%c0_191, %c0_192] : memref<1x32xf32, #tpu.memory_space<vmem>>, vector<1x32xf32>
    tpu.vector_store %arg13[%c0_191, %c0_192], %348 {strides = array<i32>} : memref<1x32xf32, #tpu.memory_space<vmem>>, vector<1x32xf32>,
    %351 = vector.shape_cast %348 : vector<1x32xf32> to vector<1x1x32xf32>
    %c0_193 = arith.constant 0 : index
    %c3_194 = arith.constant 3 : index
    %c0_195 = arith.constant 0 : index
    %352 = vector.load %arg10[%c0_193, %c3_194, %c0_195] : memref<1x5x32xf32, #tpu.memory_space<vmem>>, vector<1x1x32xf32>
    tpu.vector_store %arg10[%c0_193, %c3_194, %c0_195], %351 {strides = array<i32>} : memref<1x5x32xf32, #tpu.memory_space<vmem>>, vector<1x1x32xf32>,
    %c0_196 = arith.constant 0 : index
    %c4_197 = arith.constant 4 : index
    %c0_198 = arith.constant 0 : index
    %353 = vector.load %arg11[%c0_196, %c4_197, %c0_198] : memref<1x5x128xf32, #tpu.memory_space<vmem>>, vector<1x1x128xf32>
    %354 = vector.shape_cast %353 : vector<1x1x128xf32> to vector<1x128xf32>
    %c0_199 = arith.constant 0 : index
    %c0_200 = arith.constant 0 : index
    %355 = vector.load %arg13[%c0_199, %c0_200] : memref<1x32xf32, #tpu.memory_space<vmem>>, vector<1x32xf32>
    %cst_201 = arith.constant dense<0.000000e+00> : vector<1x128xf32>
    %356 = tpu.matmul %355, %196, %cst_201 {dimension_numbers = #tpu.dot_dimension_numbers<[1], [0], [0], [1], [0, 0, 1, 1], [], []>} : vector<1x32xf32>, vector<32x128xf32>, vector<1x128xf32> -> vector<1x128xf32>
    %357 = arith.addf %354, %356 : vector<1x128xf32>
    %358 = vector.extract_strided_slice %357 {offsets = [0, 0], sizes = [1, 32], strides = [1, 1]} : vector<1x128xf32> to vector<1x32xf32>
    %359 = arith.negf %358 : vector<1x32xf32>
    %360 = math.exp %359 : vector<1x32xf32>
    %cst_202 = arith.constant 1.000000e+00 : f32
    %361 = vector.broadcast %cst_202 : f32 to vector<1x32xf32>
    %362 = arith.addf %361, %360 : vector<1x32xf32>
    %363 = arith.divf %361, %362 : vector<1x32xf32>
    %364 = vector.extract_strided_slice %357 {offsets = [0, 32], sizes = [1, 32], strides = [1, 1]} : vector<1x128xf32> to vector<1x32xf32>
    %365 = arith.negf %364 : vector<1x32xf32>
    %366 = math.exp %365 : vector<1x32xf32>
    %cst_203 = arith.constant 1.000000e+00 : f32
    %367 = vector.broadcast %cst_203 : f32 to vector<1x32xf32>
    %368 = arith.addf %367, %366 : vector<1x32xf32>
    %369 = arith.divf %367, %368 : vector<1x32xf32>
    %370 = vector.extract_strided_slice %357 {offsets = [0, 64], sizes = [1, 32], strides = [1, 1]} : vector<1x128xf32> to vector<1x32xf32>
    %371 = math.tanh %370 : vector<1x32xf32>
    %372 = vector.extract_strided_slice %357 {offsets = [0, 96], sizes = [1, 32], strides = [1, 1]} : vector<1x128xf32> to vector<1x32xf32>
    %373 = arith.negf %372 : vector<1x32xf32>
    %374 = math.exp %373 : vector<1x32xf32>
    %cst_204 = arith.constant 1.000000e+00 : f32
    %375 = vector.broadcast %cst_204 : f32 to vector<1x32xf32>
    %376 = arith.addf %375, %374 : vector<1x32xf32>
    %377 = arith.divf %375, %376 : vector<1x32xf32>
    %c0_205 = arith.constant 0 : index
    %c0_206 = arith.constant 0 : index
    %378 = vector.load %arg14[%c0_205, %c0_206] : memref<1x32xf32, #tpu.memory_space<vmem>>, vector<1x32xf32>
    %379 = arith.mulf %369, %378 : vector<1x32xf32>
    %380 = arith.mulf %363, %371 : vector<1x32xf32>
    %381 = arith.addf %379, %380 : vector<1x32xf32>
    %382 = math.tanh %381 : vector<1x32xf32>
    %383 = arith.mulf %377, %382 : vector<1x32xf32>
    %c0_207 = arith.constant 0 : index
    %c0_208 = arith.constant 0 : index
    %384 = vector.load %arg14[%c0_207, %c0_208] : memref<1x32xf32, #tpu.memory_space<vmem>>, vector<1x32xf32>
    tpu.vector_store %arg14[%c0_207, %c0_208], %381 {strides = array<i32>} : memref<1x32xf32, #tpu.memory_space<vmem>>, vector<1x32xf32>,
    %c0_209 = arith.constant 0 : index
    %c0_210 = arith.constant 0 : index
    %385 = vector.load %arg13[%c0_209, %c0_210] : memref<1x32xf32, #tpu.memory_space<vmem>>, vector<1x32xf32>
    tpu.vector_store %arg13[%c0_209, %c0_210], %383 {strides = array<i32>} : memref<1x32xf32, #tpu.memory_space<vmem>>, vector<1x32xf32>,
    %386 = vector.shape_cast %383 : vector<1x32xf32> to vector<1x1x32xf32>
    %c0_211 = arith.constant 0 : index
    %c4_212 = arith.constant 4 : index
    %c0_213 = arith.constant 0 : index
    %387 = vector.load %arg10[%c0_211, %c4_212, %c0_213] : memref<1x5x32xf32, #tpu.memory_space<vmem>>, vector<1x1x32xf32>
    tpu.vector_store %arg10[%c0_211, %c4_212, %c0_213], %386 {strides = array<i32>} : memref<1x5x32xf32, #tpu.memory_space<vmem>>, vector<1x1x32xf32>,
    return
  }
  func.func @transform_0(%arg0: i32) -> (i32, i32, i32) {
    %c0_i32 = arith.constant 0 : i32
    %c0_i32_0 = arith.constant 0 : i32
    %c0_i32_1 = arith.constant 0 : i32
    return %arg0, %c0_i32, %c0_i32_0 : i32, i32, i32
  }
  func.func @transform_1(%arg0: i32) -> (i32, i32, i32) {
    %c0_i32 = arith.constant 0 : i32
    %c0_i32_0 = arith.constant 0 : i32
    %c0_i32_1 = arith.constant 0 : i32
    return %arg0, %c0_i32, %c0_i32_0 : i32, i32, i32
  }
  func.func @transform_2(%arg0: i32) -> (i32, i32, i32) {
    %c0_i32 = arith.constant 0 : i32
    %c0_i32_0 = arith.constant 0 : i32
    %c0_i32_1 = arith.constant 0 : i32
    return %arg0, %c0_i32, %c0_i32_0 : i32, i32, i32
  }
  func.func @transform_3(%arg0: i32) -> (i32, i32) {
    %c0_i32 = arith.constant 0 : i32
    %c0_i32_0 = arith.constant 0 : i32
    %c0_i32_1 = arith.constant 0 : i32
    return %c0_i32, %c0_i32_0 : i32, i32
  }
  func.func @transform_4(%arg0: i32) -> (i32, i32) {
    %c0_i32 = arith.constant 0 : i32
    %c0_i32_0 = arith.constant 0 : i32
    %c0_i32_1 = arith.constant 0 : i32
    return %c0_i32, %c0_i32_0 : i32, i32
  }
  func.func @transform_5(%arg0: i32) -> (i32, i32) {
    %c0_i32 = arith.constant 0 : i32
    %c0_i32_0 = arith.constant 0 : i32
    %c0_i32_1 = arith.constant 0 : i32
    return %c0_i32, %c0_i32_0 : i32, i32
  }
  func.func @transform_6(%arg0: i32) -> (i32, i32) {
    %c0_i32 = arith.constant 0 : i32
    %c0_i32_0 = arith.constant 0 : i32
    %c0_i32_1 = arith.constant 0 : i32
    return %c0_i32, %c0_i32_0 : i32, i32
  }
  func.func @transform_7(%arg0: i32) -> (i32, i32) {
    %c0_i32 = arith.constant 0 : i32
    %c0_i32_0 = arith.constant 0 : i32
    %c0_i32_1 = arith.constant 0 : i32
    return %c0_i32, %c0_i32_0 : i32, i32
  }
  func.func @transform_8(%arg0: i32) -> (i32, i32) {
    %c0_i32 = arith.constant 0 : i32
    %c0_i32_0 = arith.constant 0 : i32
    %c0_i32_1 = arith.constant 0 : i32
    return %c0_i32, %c0_i32_0 : i32, i32
  }
  func.func @transform_9(%arg0: i32) -> (i32, i32, i32) {
    %c0_i32 = arith.constant 0 : i32
    %c0_i32_0 = arith.constant 0 : i32
    %c0_i32_1 = arith.constant 0 : i32
    return %arg0, %c0_i32, %c0_i32_0 : i32, i32, i32
  }
}

module attributes {stable_mosaic.version = 11 : i64} {
  func.func @kernel(%arg0: i32, %arg1: memref<2xi32, #tpu.memory_space<smem>>, %arg2: memref<1x8x64xf32, #tpu.memory_space<vmem>>, %arg3: memref<1x5x32xf32, #tpu.memory_space<vmem>>, %arg4: memref<32x32xf32, #tpu.memory_space<vmem>>, %arg5: memref<1x32xf32, #tpu.memory_space<vmem>>, %arg6: memref<32x32xf32, #tpu.memory_space<vmem>>, %arg7: memref<1x32xf32, #tpu.memory_space<vmem>>, %arg8: memref<1x5x8xf32, #tpu.memory_space<vmem>>) attributes {dimension_semantics = [#tpu.dimension_semantics<parallel>], iteration_bounds = array<i64: 2>, scalar_prefetch = 1 : i64, scratch_operands = 0 : i64, tpu.core_type = #tpu.core_type<tc>, window_params = [{transform_indices = @transform_0, window_bounds = array<i64: 1, 8, 64>}, {transform_indices = @transform_1, window_bounds = array<i64: 1, 5, 32>}, {pipeline_mode = #tpu.pipeline_mode<synchronous>, transform_indices = @transform_2, window_bounds = array<i64: 32, 32>}, {pipeline_mode = #tpu.pipeline_mode<synchronous>, transform_indices = @transform_3, window_bounds = array<i64: 1, 32>}, {pipeline_mode = #tpu.pipeline_mode<synchronous>, transform_indices = @transform_4, window_bounds = array<i64: 32, 32>}, {pipeline_mode = #tpu.pipeline_mode<synchronous>, transform_indices = @transform_5, window_bounds = array<i64: 1, 32>}, {transform_indices = @transform_6, window_bounds = array<i64: 1, 5, 8>}]} {
    %0 = arith.index_cast %arg0 : i32 to index
    %1 = memref.load %arg1[%0] : memref<2xi32, #tpu.memory_space<smem>>
    %c0 = arith.constant 0 : index
    %c0_0 = arith.constant 0 : index
    %c0_1 = arith.constant 0 : index
    %2 = vector.load %arg2[%c0, %c0_0, %c0_1] : memref<1x8x64xf32, #tpu.memory_space<vmem>>, vector<1x8x64xf32>
    %3 = vector.shape_cast %2 : vector<1x8x64xf32> to vector<8x64xf32>
    %4 = vector.extract_strided_slice %3 {offsets = [0, 0], sizes = [8, 32], strides = [1, 1]} : vector<8x64xf32> to vector<8x32xf32>
    %5 = vector.extract_strided_slice %3 {offsets = [0, 32], sizes = [8, 32], strides = [1, 1]} : vector<8x64xf32> to vector<8x32xf32>
    %c0_2 = arith.constant 0 : index
    %c0_3 = arith.constant 0 : index
    %6 = vector.load %arg4[%c0_2, %c0_3] : memref<32x32xf32, #tpu.memory_space<vmem>>, vector<32x32xf32>
    %c0_4 = arith.constant 0 : index
    %c0_5 = arith.constant 0 : index
    %7 = vector.load %arg6[%c0_4, %c0_5] : memref<32x32xf32, #tpu.memory_space<vmem>>, vector<32x32xf32>
    %c0_6 = arith.constant 0 : index
    %c0_7 = arith.constant 0 : index
    %8 = vector.load %arg5[%c0_6, %c0_7] : memref<1x32xf32, #tpu.memory_space<vmem>>, vector<1x32xf32>
    %9 = vector.shape_cast %8 : vector<1x32xf32> to vector<1x1x32xf32>
    %c0_8 = arith.constant 0 : index
    %c0_9 = arith.constant 0 : index
    %10 = vector.load %arg7[%c0_8, %c0_9] : memref<1x32xf32, #tpu.memory_space<vmem>>, vector<1x32xf32>
    %11 = vector.shape_cast %10 : vector<1x32xf32> to vector<1x1x32xf32>
    %c0_10 = arith.constant 0 : index
    %c0_11 = arith.constant 0 : index
    %c0_12 = arith.constant 0 : index
    %12 = vector.load %arg3[%c0_10, %c0_11, %c0_12] : memref<1x5x32xf32, #tpu.memory_space<vmem>>, vector<1x5x32xf32>
    %13 = vector.shape_cast %12 : vector<1x5x32xf32> to vector<5x32xf32>
    %14 = tpu.iota {dimensions = array<i32: 1>} : vector<1x8xi32>
    %15 = vector.broadcast %1 : i32 to vector<1x8xi32>
    %16 = arith.cmpi slt, %14, %15 : vector<1x8xi32>
    %17 = arith.truncf %13 : vector<5x32xf32> to vector<5x32xbf16>
    %18 = arith.truncf %6 : vector<32x32xf32> to vector<32x32xbf16>
    %cst = arith.constant dense<0.000000e+00> : vector<5x32xf32>
    %19 = tpu.matmul %17, %18, %cst {dimension_numbers = #tpu.dot_dimension_numbers<[1], [0], [0], [1], [0, 0, 1, 1], [], []>} : vector<5x32xbf16>, vector<32x32xbf16>, vector<5x32xf32> -> vector<5x32xf32>
    %cst_13 = arith.constant 0xFF800000 : f32
    %20 = vector.broadcast %cst_13 : f32 to vector<5x1xf32>
    %cst_14 = arith.constant 0.000000e+00 : f32
    %21 = vector.broadcast %cst_14 : f32 to vector<5x1xf32>
    %cst_15 = arith.constant 0.000000e+00 : f32
    %22 = vector.broadcast %cst_15 : f32 to vector<5x32xf32>
    %23 = vector.shape_cast %5 : vector<8x32xf32> to vector<1x8x32xf32>
    %24 = arith.truncf %23 : vector<1x8x32xf32> to vector<1x8x32xbf16>
    %25 = vector.shape_cast %19 : vector<5x32xf32> to vector<5x1x32xf32>
    %26 = arith.truncf %25 : vector<5x1x32xf32> to vector<5x1x32xbf16>
    %27 = vector.broadcast %24 : vector<1x8x32xbf16> to vector<5x8x32xbf16>
    %28 = vector.broadcast %26 : vector<5x1x32xbf16> to vector<5x8x32xbf16>
    %29 = arith.addf %27, %28 : vector<5x8x32xbf16>
    %30 = math.tanh %29 : vector<5x8x32xbf16>
    %31 = arith.extf %30 : vector<5x8x32xbf16> to vector<5x8x32xf32>
    %32 = vector.broadcast %9 : vector<1x1x32xf32> to vector<5x8x32xf32>
    %33 = arith.mulf %31, %32 : vector<5x8x32xf32>
    %cst_16 = arith.constant dense<0.000000e+00> : vector<5x8xf32>
    %34 = vector.multi_reduction <add>, %33, %cst_16 [2] : vector<5x8x32xf32> to vector<5x8xf32>
    %cst_17 = arith.constant -1.000000e+30 : f32
    %35 = vector.shape_cast %16 : vector<1x8xi1> to vector<1x8xi1>
    %36 = vector.broadcast %35 : vector<1x8xi1> to vector<5x8xi1>
    %37 = vector.broadcast %cst_17 : f32 to vector<5x8xf32>
    %38 = arith.select %36, %34, %37 : vector<5x8xi1>, vector<5x8xf32>
    %cst_18 = arith.constant dense<0xFF800000> : vector<5xf32>
    %39 = vector.multi_reduction <maximumf>, %38, %cst_18 [1] : vector<5x8xf32> to vector<5xf32>
    %40 = vector.shape_cast %39 : vector<5xf32> to vector<5x1xf32>
    %41 = arith.maximumf %20, %40 : vector<5x1xf32>
    %42 = arith.subf %20, %41 : vector<5x1xf32>
    %43 = math.exp %42 : vector<5x1xf32>
    %44 = vector.broadcast %41 : vector<5x1xf32> to vector<5x8xf32>
    %45 = arith.subf %38, %44 : vector<5x8xf32>
    %46 = math.exp %45 : vector<5x8xf32>
    %47 = arith.mulf %43, %21 : vector<5x1xf32>
    %cst_19 = arith.constant dense<0.000000e+00> : vector<5xf32>
    %48 = vector.multi_reduction <add>, %46, %cst_19 [1] : vector<5x8xf32> to vector<5xf32>
    %49 = vector.shape_cast %48 : vector<5xf32> to vector<5x1xf32>
    %50 = arith.addf %47, %49 : vector<5x1xf32>
    %51 = vector.broadcast %43 : vector<5x1xf32> to vector<5x32xf32>
    %52 = arith.mulf %51, %22 : vector<5x32xf32>
    %cst_20 = arith.constant dense<0.000000e+00> : vector<5x32xf32>
    %53 = tpu.matmul %46, %5, %cst_20 {dimension_numbers = #tpu.dot_dimension_numbers<[1], [0], [0], [1], [0, 0, 1, 1], [], []>} : vector<5x8xf32>, vector<8x32xf32>, vector<5x32xf32> -> vector<5x32xf32>
    %54 = arith.addf %52, %53 : vector<5x32xf32>
    %55 = tpu.reciprocal %50 : vector<5x1xf32> -> vector<5x1xf32>
    %56 = vector.broadcast %55 : vector<5x1xf32> to vector<5x32xf32>
    %57 = arith.mulf %54, %56 : vector<5x32xf32>
    %58 = arith.truncf %57 : vector<5x32xf32> to vector<5x32xbf16>
    %59 = arith.truncf %6 : vector<32x32xf32> to vector<32x32xbf16>
    %cst_21 = arith.constant dense<0.000000e+00> : vector<5x32xf32>
    %60 = tpu.matmul %58, %59, %cst_21 {dimension_numbers = #tpu.dot_dimension_numbers<[1], [0], [0], [1], [0, 0, 1, 1], [], []>} : vector<5x32xbf16>, vector<32x32xbf16>, vector<5x32xf32> -> vector<5x32xf32>
    %cst_22 = arith.constant 0xFF800000 : f32
    %61 = vector.broadcast %cst_22 : f32 to vector<5x1xf32>
    %cst_23 = arith.constant 0.000000e+00 : f32
    %62 = vector.broadcast %cst_23 : f32 to vector<5x1xf32>
    %cst_24 = arith.constant 0.000000e+00 : f32
    %63 = vector.broadcast %cst_24 : f32 to vector<5x32xf32>
    %64 = vector.shape_cast %5 : vector<8x32xf32> to vector<1x8x32xf32>
    %65 = arith.truncf %64 : vector<1x8x32xf32> to vector<1x8x32xbf16>
    %66 = vector.shape_cast %60 : vector<5x32xf32> to vector<5x1x32xf32>
    %67 = arith.truncf %66 : vector<5x1x32xf32> to vector<5x1x32xbf16>
    %68 = vector.broadcast %65 : vector<1x8x32xbf16> to vector<5x8x32xbf16>
    %69 = vector.broadcast %67 : vector<5x1x32xbf16> to vector<5x8x32xbf16>
    %70 = arith.addf %68, %69 : vector<5x8x32xbf16>
    %71 = math.tanh %70 : vector<5x8x32xbf16>
    %72 = arith.extf %71 : vector<5x8x32xbf16> to vector<5x8x32xf32>
    %73 = vector.broadcast %9 : vector<1x1x32xf32> to vector<5x8x32xf32>
    %74 = arith.mulf %72, %73 : vector<5x8x32xf32>
    %cst_25 = arith.constant dense<0.000000e+00> : vector<5x8xf32>
    %75 = vector.multi_reduction <add>, %74, %cst_25 [2] : vector<5x8x32xf32> to vector<5x8xf32>
    %cst_26 = arith.constant -1.000000e+30 : f32
    %76 = vector.shape_cast %16 : vector<1x8xi1> to vector<1x8xi1>
    %77 = vector.broadcast %76 : vector<1x8xi1> to vector<5x8xi1>
    %78 = vector.broadcast %cst_26 : f32 to vector<5x8xf32>
    %79 = arith.select %77, %75, %78 : vector<5x8xi1>, vector<5x8xf32>
    %cst_27 = arith.constant dense<0xFF800000> : vector<5xf32>
    %80 = vector.multi_reduction <maximumf>, %79, %cst_27 [1] : vector<5x8xf32> to vector<5xf32>
    %81 = vector.shape_cast %80 : vector<5xf32> to vector<5x1xf32>
    %82 = arith.maximumf %61, %81 : vector<5x1xf32>
    %83 = arith.subf %61, %82 : vector<5x1xf32>
    %84 = math.exp %83 : vector<5x1xf32>
    %85 = vector.broadcast %82 : vector<5x1xf32> to vector<5x8xf32>
    %86 = arith.subf %79, %85 : vector<5x8xf32>
    %87 = math.exp %86 : vector<5x8xf32>
    %88 = arith.mulf %84, %62 : vector<5x1xf32>
    %cst_28 = arith.constant dense<0.000000e+00> : vector<5xf32>
    %89 = vector.multi_reduction <add>, %87, %cst_28 [1] : vector<5x8xf32> to vector<5xf32>
    %90 = vector.shape_cast %89 : vector<5xf32> to vector<5x1xf32>
    %91 = arith.addf %88, %90 : vector<5x1xf32>
    %92 = vector.broadcast %84 : vector<5x1xf32> to vector<5x32xf32>
    %93 = arith.mulf %92, %63 : vector<5x32xf32>
    %cst_29 = arith.constant dense<0.000000e+00> : vector<5x32xf32>
    %94 = tpu.matmul %87, %5, %cst_29 {dimension_numbers = #tpu.dot_dimension_numbers<[1], [0], [0], [1], [0, 0, 1, 1], [], []>} : vector<5x8xf32>, vector<8x32xf32>, vector<5x32xf32> -> vector<5x32xf32>
    %95 = arith.addf %93, %94 : vector<5x32xf32>
    %96 = tpu.reciprocal %91 : vector<5x1xf32> -> vector<5x1xf32>
    %97 = vector.broadcast %96 : vector<5x1xf32> to vector<5x32xf32>
    %98 = arith.mulf %95, %97 : vector<5x32xf32>
    %99 = arith.truncf %98 : vector<5x32xf32> to vector<5x32xbf16>
    %100 = arith.truncf %7 : vector<32x32xf32> to vector<32x32xbf16>
    %cst_30 = arith.constant dense<0.000000e+00> : vector<5x32xf32>
    %101 = tpu.matmul %99, %100, %cst_30 {dimension_numbers = #tpu.dot_dimension_numbers<[1], [0], [0], [1], [0, 0, 1, 1], [], []>} : vector<5x32xbf16>, vector<32x32xbf16>, vector<5x32xf32> -> vector<5x32xf32>
    %102 = vector.shape_cast %4 : vector<8x32xf32> to vector<1x8x32xf32>
    %103 = arith.truncf %102 : vector<1x8x32xf32> to vector<1x8x32xbf16>
    %104 = vector.shape_cast %101 : vector<5x32xf32> to vector<5x1x32xf32>
    %105 = arith.truncf %104 : vector<5x1x32xf32> to vector<5x1x32xbf16>
    %106 = vector.broadcast %103 : vector<1x8x32xbf16> to vector<5x8x32xbf16>
    %107 = vector.broadcast %105 : vector<5x1x32xbf16> to vector<5x8x32xbf16>
    %108 = arith.addf %106, %107 : vector<5x8x32xbf16>
    %109 = math.tanh %108 : vector<5x8x32xbf16>
    %110 = arith.extf %109 : vector<5x8x32xbf16> to vector<5x8x32xf32>
    %111 = vector.broadcast %11 : vector<1x1x32xf32> to vector<5x8x32xf32>
    %112 = arith.mulf %110, %111 : vector<5x8x32xf32>
    %cst_31 = arith.constant dense<0.000000e+00> : vector<5x8xf32>
    %113 = vector.multi_reduction <add>, %112, %cst_31 [2] : vector<5x8x32xf32> to vector<5x8xf32>
    %c0_32 = arith.constant 0 : index
    %c0_33 = arith.constant 0 : index
    %c0_34 = arith.constant 0 : index
    %114 = vector.load %arg8[%c0_32, %c0_33, %c0_34] : memref<1x5x8xf32, #tpu.memory_space<vmem>>, vector<1x5x8xf32>
    %115 = vector.shape_cast %114 : vector<1x5x8xf32> to vector<5x8xf32>
    %116 = vector.shape_cast %113 : vector<5x8xf32> to vector<1x5x8xf32>
    tpu.vector_store %arg8[%c0_32, %c0_33, %c0_34], %116 {strides = array<i32>} : memref<1x5x8xf32, #tpu.memory_space<vmem>>, vector<1x5x8xf32>,
    return
  }
  func.func @transform_0(%arg0: i32, %arg1: memref<2xi32, #tpu.memory_space<smem>>) -> (i32, i32, i32) {
    %c0_i32 = arith.constant 0 : i32
    %c0_i32_0 = arith.constant 0 : i32
    %c0_i32_1 = arith.constant 0 : i32
    return %arg0, %c0_i32, %c0_i32_0 : i32, i32, i32
  }
  func.func @transform_1(%arg0: i32, %arg1: memref<2xi32, #tpu.memory_space<smem>>) -> (i32, i32, i32) {
    %c0_i32 = arith.constant 0 : i32
    %c0_i32_0 = arith.constant 0 : i32
    %c0_i32_1 = arith.constant 0 : i32
    return %arg0, %c0_i32, %c0_i32_0 : i32, i32, i32
  }
  func.func @transform_2(%arg0: i32, %arg1: memref<2xi32, #tpu.memory_space<smem>>) -> (i32, i32) {
    %c0_i32 = arith.constant 0 : i32
    %c0_i32_0 = arith.constant 0 : i32
    %c0_i32_1 = arith.constant 0 : i32
    return %c0_i32, %c0_i32_0 : i32, i32
  }
  func.func @transform_3(%arg0: i32, %arg1: memref<2xi32, #tpu.memory_space<smem>>) -> (i32, i32) {
    %c0_i32 = arith.constant 0 : i32
    %c0_i32_0 = arith.constant 0 : i32
    %c0_i32_1 = arith.constant 0 : i32
    return %c0_i32, %c0_i32_0 : i32, i32
  }
  func.func @transform_4(%arg0: i32, %arg1: memref<2xi32, #tpu.memory_space<smem>>) -> (i32, i32) {
    %c0_i32 = arith.constant 0 : i32
    %c0_i32_0 = arith.constant 0 : i32
    %c0_i32_1 = arith.constant 0 : i32
    return %c0_i32, %c0_i32_0 : i32, i32
  }
  func.func @transform_5(%arg0: i32, %arg1: memref<2xi32, #tpu.memory_space<smem>>) -> (i32, i32) {
    %c0_i32 = arith.constant 0 : i32
    %c0_i32_0 = arith.constant 0 : i32
    %c0_i32_1 = arith.constant 0 : i32
    return %c0_i32, %c0_i32_0 : i32, i32
  }
  func.func @transform_6(%arg0: i32, %arg1: memref<2xi32, #tpu.memory_space<smem>>) -> (i32, i32, i32) {
    %c0_i32 = arith.constant 0 : i32
    %c0_i32_0 = arith.constant 0 : i32
    %c0_i32_1 = arith.constant 0 : i32
    return %arg0, %c0_i32, %c0_i32_0 : i32, i32, i32
  }
}

module attributes {stable_mosaic.version = 11 : i64} {
  func.func @kernel(%arg0: i32, %arg1: memref<16x16xf32, #tpu.memory_space<vmem>>, %arg2: memref<16x64xf32, #tpu.memory_space<vmem>>, %arg3: memref<16x64xf32, #tpu.memory_space<vmem>>) attributes {dimension_semantics = [#tpu.dimension_semantics<parallel>], iteration_bounds = array<i64: 1>, scalar_prefetch = 0 : i64, scratch_operands = 0 : i64, tpu.core_type = #tpu.core_type<tc>, window_params = [{transform_indices = @transform_0, window_bounds = array<i64: 16, 16>}, {pipeline_mode = #tpu.pipeline_mode<synchronous>, transform_indices = @transform_1, window_bounds = array<i64: 16, 64>}, {transform_indices = @transform_2, window_bounds = array<i64: 16, 64>}]} {
    %c0 = arith.constant 0 : index
    %c0_0 = arith.constant 0 : index
    %0 = vector.load %arg1[%c0, %c0_0] : memref<16x16xf32, #tpu.memory_space<vmem>>, vector<16x16xf32>
    %1 = arith.truncf %0 : vector<16x16xf32> to vector<16x16xbf16>
    %c0_1 = arith.constant 0 : index
    %c0_2 = arith.constant 0 : index
    %2 = vector.load %arg2[%c0_1, %c0_2] : memref<16x64xf32, #tpu.memory_space<vmem>>, vector<16x64xf32>
    %3 = arith.truncf %2 : vector<16x64xf32> to vector<16x64xbf16>
    %cst = arith.constant dense<0.000000e+00> : vector<16x64xf32>
    %4 = tpu.matmul %1, %3, %cst {dimension_numbers = #tpu.dot_dimension_numbers<[1], [0], [0], [1], [0, 0, 1, 1], [], []>} : vector<16x16xbf16>, vector<16x64xbf16>, vector<16x64xf32> -> vector<16x64xf32>
    %c0_3 = arith.constant 0 : index
    %c0_4 = arith.constant 0 : index
    %5 = vector.load %arg3[%c0_3, %c0_4] : memref<16x64xf32, #tpu.memory_space<vmem>>, vector<16x64xf32>
    tpu.vector_store %arg3[%c0_3, %c0_4], %4 {strides = array<i32>} : memref<16x64xf32, #tpu.memory_space<vmem>>, vector<16x64xf32>,
    return
  }
  func.func @transform_0(%arg0: i32) -> (i32, i32) {
    %c0_i32 = arith.constant 0 : i32
    %c0_i32_0 = arith.constant 0 : i32
    return %arg0, %c0_i32 : i32, i32
  }
  func.func @transform_1(%arg0: i32) -> (i32, i32) {
    %c0_i32 = arith.constant 0 : i32
    %c0_i32_0 = arith.constant 0 : i32
    %c0_i32_1 = arith.constant 0 : i32
    return %c0_i32, %c0_i32_0 : i32, i32
  }
  func.func @transform_2(%arg0: i32) -> (i32, i32) {
    %c0_i32 = arith.constant 0 : i32
    %c0_i32_0 = arith.constant 0 : i32
    return %arg0, %c0_i32 : i32, i32
  }
}

</mosaic_0001>

<bundles_post_ra>
// kernel: pointer_net_forward.3
= control target key start
LH: loop header
LB: loop body
LE: loop exit
PB: predicated region body
PF: predicated region fallthrough
CT: control target
= control target key end

     0   :  { %7 = vsyncpa [#allocation3], 0  ;;  %s268_s0 = inlined_call_operand.hbm [shape: f32[16,16], index: 0, kind: input, shape index: {}]   ;;  %s269_s1 = inlined_call_operand.hbm [shape: f32[16,64], index: 1, kind: input, shape index: {}]   ;;  %s270_s2 = inlined_call_operand.hbm [shape: f32[16,64], index: 2, kind: output, shape index: {}]  }
   0x1   :  { %8 = vsyncpa [#allocation6], 0 }
   0x2   :  { %9 = vsyncpa [#allocation4], 0  ;;  %s201_s9 = smov [#allocation2]   ;;  %s129_s13 = scalar_lea.hbm %s268_s0, 256 }
   0x3   :  { %s15_s10 = sshll.u32 %s201_s9, 4  ;;  %p130_p0 = scmp.ne.s32.totalorder %s268_s0, %s129_s13  ;;  %s16_s10 = int_to_ptr.vmem [resolvable:$true] %s15_s10 }
   0x4   :  { %p133_p1 = scmp.lt.u32.totalorder %s129_s13, %s268_s0 }
   0x6   :  { %p135_p2 = pnand %p133_p1, %p130_p0 }
   0x8   :  { %138 = shalt.err (!%p135_p2)
}
   0x9   :  { %s139_s18 = scalar_lea.vmem %s16_s10, 256  ;;  %p144_p4 = scmp.lt.s32.totalorder %s16_s10, %s16_s10 }
   0xa   :  { %p140_p3 = scmp.ne.s32.totalorder %s16_s10, %s139_s18  ;;  %p145_p5 = scmp.lt.s32.totalorder %s139_s18, %s139_s18 }
   0xc   :  { %p146_p6 = por %p145_p5, %p144_p4 }
   0xe   :  { %p147_p7 = pnand %p146_p6, %p140_p3 }
  0x10   :  { %150 = shalt.err (!%p147_p7)
}
  0x11   :  { %s202_s19 = smov 128   ;;  %s203_s20 = smov 8  }
  0x12   :  { %21 = dma.hbm_to_vmem [thread:$0]  %s268_s0, 256, %s16_s10, [#allocation3], %s202_s19, %s202_s19, %s203_s20  }
  0x13   :  { %s204_s23 = smov [#allocation5]   ;;  %s151_s27 = scalar_lea.hbm %s269_s1, 256 }
  0x14   :  { %s27_s24 = sshll.u32 %s204_s23, 4  ;;  %p152_p8 = scmp.ne.s32.totalorder %s269_s1, %s151_s27  ;;  %s28_s24 = int_to_ptr.vmem [resolvable:$true] %s27_s24 }
  0x15   :  { %p155_p9 = scmp.lt.u32.totalorder %s151_s27, %s269_s1 }
  0x17   :  { %p157_p10 = pnand %p155_p9, %p152_p8 }
  0x19   :  { %160 = shalt.err (!%p157_p10)
}
  0x1a   :  { %s161_s4 = scalar_lea.vmem %s28_s24, 256  ;;  %p166_p12 = scmp.lt.s32.totalorder %s28_s24, %s28_s24 }
  0x1b   :  { %p162_p11 = scmp.ne.s32.totalorder %s28_s24, %s161_s4  ;;  %p167_p13 = scmp.lt.s32.totalorder %s161_s4, %s161_s4 }
  0x1d   :  { %p168_p0 = por %p167_p13, %p166_p12 }
  0x1f   :  { %p169_p1 = pnand %p168_p0, %p162_p11 }
  0x21   :  { %172 = shalt.err (!%p169_p1)
}
  0x22   :  { %33 = dma.hbm_to_vmem [thread:$0]  %s269_s1, 256, %s28_s24, [#allocation6], %s202_s19, %s202_s19, %s203_s20  }
  0x23   :  { %195 = dma.done.wait [#allocation3], 256  }
  0x24   :  { %196 = vsyncadd [#allocation3], 4294967040 }
  0x25   :  { %197 = dma.done.wait [#allocation6], 256  }
  0x26   :  { %198 = vsyncadd [#allocation6], 4294967040  ;;  %v205_v0 = vmov 0.0   ;;  %vm206_vm0 = vmmov 0   ;;  %v44_v1 = vld [vmem:[#allocation5] sm:$0xff]  ;;  %v45_v2 = vld [vmem:[#allocation5 + $0x8] sm:$0xff] }
  0x27   :  { %116 = vmatprep.subr.bf16.mxu0 %v205_v0  ;;  %118 = vmatprep.mubr.msk.bf16.mxu0 %vm206_vm0, %v205_v0  ;;  %v41_v3 = vld [vmem:[#allocation2] sm:$0xff]  ;;  %v46_v4 = vpack.c.bf16 %v45_v2, %v44_v1  ;;  %v42_v5 = vld [vmem:[#allocation2 + $0x8] sm:$0xff]  ;;  %vm47_vm1 = vcmask 130048   ;;  %vm92_vm2 = vcmask 523264   ;;  %s207_s6 = smov [#allocation7]  }
  0x28   :  { %v43_v6 = vpack.c.bf16 %v42_v5, %v41_v3  ;;  %s100_s1 = sshll.u32 %s207_s6, 4  ;;  %s101_s1 = int_to_ptr.vmem [resolvable:$true] %s100_s1 }
  0x29   :  { %117 = vmatpush3.bf16.msra.mxu0 %v46_v4  ;;  %s173_s7 = scalar_lea.vmem %s101_s1, 256  ;;  %p178_p3 = scmp.lt.s32.totalorder %s101_s1, %s101_s1 }
  0x2a   :  { %p174_p2 = scmp.ne.s32.totalorder %s101_s1, %s173_s7  ;;  %p179_p4 = scmp.lt.s32.totalorder %s173_s7, %s173_s7 }
  0x2c   :  { %119 = vmatmul.mubr.msk.bf16.vlgmr.msra.gmra.mrb[0].mxu0 %vm47_vm1, %v43_v6  ;;  %p180_p5 = por %p179_p4, %p178_p3 }
  0x2e   :  { %p181_p6 = pnand %p180_p5, %p174_p2 }
  0xff   :  { %v85_v7 = vpop.f32.mrb[0].mxu0 }
 0x100   :  { %93 = vst.msk [vmem:[#allocation7] sm:$0xff] %vm92_vm2, %v85_v7  ;;  %v120_v8 = vpop.f32.mrb[1].mxu0 }
 0x101   :  { %v88_v9 = vpop.f32.mrb[2].mxu0 }
 0x102   :  { %94 = vst.msk [vmem:[#allocation7 + $0x8] sm:$0xff] %vm92_vm2, %v88_v9  ;;  %v121_v10 = vpop.f32.mrb[3].mxu0 }
 0x103   :  { %184 = shalt.err (!%p181_p6)
}
 0x104   :  { %s185_s10 = scalar_lea.hbm %s270_s2, 256 }
 0x105   :  { %p186_p7 = scmp.ne.s32.totalorder %s270_s2, %s185_s10  ;;  %p189_p8 = scmp.lt.u32.totalorder %s185_s10, %s270_s2 }
 0x107   :  { %p191_p9 = pnand %p189_p8, %p186_p7 }
 0x109   :  { %194 = shalt.err (!%p191_p9)
}
 0x10a   :  { %106 = dma.vmem_to_hbm [thread:$0]  %s101_s1, 256, %s270_s2, [#allocation4], %s202_s19, %s202_s19, %s203_s20  }
 0x10b   :  { %199 = dma.done.wait [#allocation4], 256  }
 0x10c   :  { %200 = vsyncadd [#allocation4], 4294967040 }
 0x10d   :  { %110 = vsyncpa [#allocation3], 1 }
 0x10e   :  { %111 = vsyncpa [#allocation6], 1 }
 0x10f   :  { %112 = vsyncpa [#allocation4], 1 }

// kernel: pointer_net_forward.5
= control target key start
LH: loop header
LB: loop body
LE: loop exit
PB: predicated region body
PF: predicated region fallthrough
CT: control target
= control target key end

     0   :  { %s2464_s0 = inlined_call_operand.hbm [shape: s32[2], index: 0, kind: input, shape index: {}]   ;;  %s2465_s1 = inlined_call_operand.hbm [shape: f32[2,8,64], index: 1, kind: input, shape index: {}]   ;;  %s2466_s2 = inlined_call_operand.hbm [shape: f32[2,5,32], index: 2, kind: input, shape index: {}]   ;;  %s2467_s3 = inlined_call_operand.hbm [shape: f32[32,32], index: 3, kind: input, shape index: {}]   ;;  %s2468_s4 = inlined_call_operand.hbm [shape: f32[1,32], index: 4, kind: input, shape index: {}]   ;;  %s2469_s5 = inlined_call_operand.hbm [shape: f32[32,32], index: 5, kind: input, shape index: {}]   ;;  %s2470_s6 = inlined_call_operand.hbm [shape: f32[1,32], index: 6, kind: input, shape index: {}]   ;;  %s2471_s7 = inlined_call_operand.hbm [shape: f32[2,5,8], index: 7, kind: output, shape index: {}]  }
   0x1   :  { %2476 = sst [smem:[#allocation23_spill]] %s2467_s3  ;;  %s1622_s26 = scalar_lea.hbm %s2464_s0, 16 }
   0x2   :  { %2477 = sst [smem:[#allocation24_spill]] %s2468_s4  ;;  %p1623_p0 = scmp.ne.s32.totalorder %s2464_s0, %s1622_s26 }
   0x3   :  { %2478 = sst [smem:[#allocation25_spill]] %s2469_s5  ;;  %p1626_p1 = scmp.lt.u32.totalorder %s1622_s26, %s2464_s0 }
   0x5   :  { %p1628_p2 = pnand %p1626_p1, %p1623_p0 }
   0x7   :  { %1631 = shalt.err (!%p1628_p2)  }
   0x8   :  { %s1890_s8 = smov [#allocation3]  }
   0x9   :  { %13 = dma.hbm_to_smem %s2464_s0, 16, %s1890_s8, [#allocation2] }
   0xa   :  { %1848 = dma.done.wait [#allocation2], 16 }
   0xb   :  { %1849 = vsyncadd [#allocation2], 4294967280 }
   0xc   :  { %15 = sfence }
   0xd   :  { %16 = vsyncpa [#allocation5], 0 }
   0xe   :  { %18 = vsyncpa [#allocation5 + $0x1], 0 }
   0xf   :  { %19 = vsyncpa [#allocation8], 0 }
  0x10   :  { %21 = vsyncpa [#allocation8 + $0x1], 0 }
  0x11   :  { %22 = vsyncpa [#allocation11], 0 }
  0x12   :  { %23 = vsyncpa [#allocation14], 0 }
  0x13   :  { %24 = vsyncpa [#allocation6], 0 }
  0x14   :  { %26 = vsyncpa [#allocation6 + $0x1], 0  ;;  %s1957_s11 = smov 0   ;;  %s1959_s12 = smov 0  }
  0x15   :  { %s1961_s13 = smov 0   ;;  %s1963_s14 = smov 0  }
  0x16 LB: > { %s1891_s0 = smov [#allocation9]   ;;  %s1978_s16 = sadd.s32 4294967295, %s1888_s14   ;;  %s1888_s14 = sphi %s1963_s14, %s2507_s14   ;;  %s1884_s13 = sphi %s1961_s13, %s2506_s13   ;;  %s1880_s12 = sphi %s1959_s12, %s2505_s12   ;;  %s1876_s11 = sphi %s1957_s11, %s2504_s11  }
  0x17   : > { %s211_s15 = sshll.u32 %s1891_s0, 4  ;;  %p1404_p3 = scmp.ge.s32.totalorder %s1888_s14, 1  ;;  %s1983_s15 = int_to_ptr.vmem [resolvable:$true] %s211_s15 }
  0x18   : > { %p2472_p4 = scmp.eq.s32.totalorder %s1978_s16, 0  ;;  %p199_p5 = scmp.lt.s32.totalorder %s1888_s14, 3 }
  0x19   : > { %s1892_s18 = smov [#allocation10]   ;;  %s1893_s21 = smov [#allocation12]  }
  0x1a   : > { %p1985_p6 = pnand %p1404_p3, %p199_p5  ;;  %s225_s19 = sshll.u32 %s1892_s18, 4  ;;  %s1998_s19 = int_to_ptr.vmem [resolvable:$true] %s225_s19 }
  0x1b   : > { %s235_s22 = sshll.u32 %s1893_s21, 4  ;;  %s2481_s3 = sld [smem:[#allocation23_spill]]  ;;  %s2000_s22 = int_to_ptr.vmem [resolvable:$true] %s235_s22 }
  0x1c   : > { %s2479_s17 = scalar_select %p1985_p6, 1, 0 }
  0x1d   : > { %p1502_p8 = pneg %p1985_p6 }
  0x1f   : > { %p1994_p9 = pnand %p1502_p8, %p2472_p4 }
  0x21   : > { %s1632_s25 = scalar_lea.hbm %s2481_s3, 512  ;;  %p2010_p11 = pneg %p1994_p9 }
  0x22   : > { %p1633_p10 = scmp.ne.s32.totalorder %s2481_s3, %s1632_s25  ;;  %p1639_p0 = scmp.lt.u32.totalorder %s1632_s25, %s2481_s3 }
  0x24   : > { %p1635_p12 = pnand %p2010_p11, %p1633_p10 }
  0x26   : > { %p1636_p13 = pneg %p1635_p12 }
  0x28   : > { %p1641_p1 = pnand %p1639_p0, %p1636_p13 }
  0x2a   : > { %1644 = shalt.err (!%p1641_p1)
}
  0x2b   : > { %s1645_s8 = scalar_lea.vmem %s1983_s15, 512  ;;  %p1653_p8 = scmp.lt.s32.totalorder %s1983_s15, %s1983_s15 }
  0x2c   : > { %p1646_p2 = scmp.ne.s32.totalorder %s1983_s15, %s1645_s8  ;;  %p1654_p7 = scmp.lt.s32.totalorder %s1645_s8, %s1645_s8 }
  0x2e   : > { %p1648_p3 = pnand %p1646_p2, %p2010_p11  ;;  %p1655_p10 = por %p1654_p7, %p1653_p8 }
  0x30   : > { %p1649_p5 = pneg %p1648_p3 }
  0x32   : > { %p1656_p12 = pnand %p1655_p10, %p1649_p5 }
  0x34   : > { %1659 = shalt.err (!%p1656_p12)
}
  0x35   : > { %s1894_s9 = smov 128   ;;  %s1895_s10 = smov 8  }
  0x36   : > { %1505 = dma.hbm_to_vmem [thread:$0]  (!%p1994_p9), %s2481_s3, 512, %s1983_s15, [#allocation8], %s1894_s9, %s1894_s9, %s1895_s10  }
  0x37   : > { %s2483_s4 = sld [smem:[#allocation24_spill]] }
  0x3d   : > { %s1660_s24 = scalar_lea.hbm %s2483_s4, 16 }
  0x3e   : > { %p1661_p7 = scmp.ne.s32.totalorder %s2483_s4, %s1660_s24  ;;  %p1667_p1 = scmp.lt.u32.totalorder %s1660_s24, %s2483_s4 }
  0x40   : > { %p1663_p13 = pnand %p1661_p7, %p2010_p11 }
  0x42   : > { %p1664_p0 = pneg %p1663_p13 }
  0x44   : > { %p1669_p2 = pnand %p1667_p1, %p1664_p0 }
  0x46   : > { %1672 = shalt.err (!%p1669_p2)
}
  0x47   : > { %s1673_s15 = scalar_lea.vmem %s1998_s19, 16  ;;  %s1680_s30 = scalar_lea.vmem %s1998_s19, 32 }
  0x48   : > { %p1674_p3 = scmp.ne.s32.totalorder %s1998_s19, %s1673_s15  ;;  %p1681_p10 = scmp.lt.s32.totalorder %s1998_s19, %s1998_s19 }
  0x49   : > { %p1682_p12 = scmp.lt.s32.totalorder %s1680_s30, %s1673_s15 }
  0x4a   : > { %p1676_p5 = pnand %p1674_p3, %p2010_p11 }
  0x4b   : > { %p1683_p7 = por %p1682_p12, %p1681_p10 }
  0x4c   : > { %p1677_p8 = pneg %p1676_p5 }
  0x4e   : > { %p1684_p13 = pnand %p1683_p7, %p1677_p8 }
  0x50   : > { %1687 = shalt.err (!%p1684_p13)
}
  0x51   : > { %1508 = dma.hbm_to_vmem [thread:$0]  (!%p1994_p9), %s2483_s4, 16, %s1998_s19, [#allocation11]  }
  0x52   : > { %s2484_s5 = sld [smem:[#allocation25_spill]] }
  0x58   : > { %s1688_s23 = scalar_lea.hbm %s2484_s5, 512 }
  0x59   : > { %p1689_p0 = scmp.ne.s32.totalorder %s2484_s5, %s1688_s23  ;;  %p1695_p3 = scmp.lt.u32.totalorder %s1688_s23, %s2484_s5 }
  0x5b   : > { %p1691_p1 = pnand %p1689_p0, %p2010_p11 }
  0x5d   : > { %p1692_p2 = pneg %p1691_p1 }
  0x5f   : > { %p1697_p5 = pnand %p1695_p3, %p1692_p2 }
  0x61   : > { %1700 = shalt.err (!%p1697_p5)
}
  0x62   : > { %s1701_s19 = scalar_lea.vmem %s2000_s22, 512  ;;  %p1709_p7 = scmp.lt.s32.totalorder %s2000_s22, %s2000_s22 }
  0x63   : > { %p1702_p8 = scmp.ne.s32.totalorder %s2000_s22, %s1701_s19  ;;  %p1710_p13 = scmp.lt.s32.totalorder %s1701_s19, %s1701_s19 }
  0x65   : > { %p1704_p10 = pnand %p1702_p8, %p2010_p11  ;;  %p1711_p0 = por %p1710_p13, %p1709_p7 }
  0x67   : > { %p1705_p12 = pneg %p1704_p10 }
  0x69   : > { %p1712_p1 = pnand %p1711_p0, %p1705_p12 }
  0x6b   : > { %1715 = shalt.err (!%p1712_p1)
}
  0x6c   : > { %1511 = dma.hbm_to_vmem [thread:$0]  (!%p1994_p9), %s2484_s5, 512, %s2000_s22, [#allocation11], %s1894_s9, %s1894_s9, %s1895_s10  }
  0x6d   : > { %s1896_s30 = smov [#allocation13]   ;;  %s1716_s21 = scalar_lea.hbm %s2470_s6, 16 }
  0x6e   : > { %s249_s8 = sshll.u32 %s1896_s30, 4  ;;  %p1717_p2 = scmp.ne.s32.totalorder %s2470_s6, %s1716_s21  ;;  %s250_s8 = int_to_ptr.vmem [resolvable:$true] %s249_s8 }
  0x6f   : > { %p1723_p8 = scmp.lt.u32.totalorder %s1716_s21, %s2470_s6 }
  0x70   : > { %p1719_p3 = pnand %p1717_p2, %p2010_p11 }
  0x72   : > { %p1720_p5 = pneg %p1719_p3 }
  0x74   : > { %p1725_p10 = pnand %p1723_p8, %p1720_p5 }
  0x76   : > { %1728 = shalt.err (!%p1725_p10)
}
  0x77   : > { %s1729_s22 = scalar_lea.vmem %s250_s8, 16  ;;  %s1736_s9 = scalar_lea.vmem %s250_s8, 32 }
  0x78   : > { %p1730_p12 = scmp.ne.s32.totalorder %s250_s8, %s1729_s22  ;;  %p1737_p0 = scmp.lt.s32.totalorder %s250_s8, %s250_s8 }
  0x79   : > { %p1738_p1 = scmp.lt.s32.totalorder %s1736_s9, %s1729_s22 }
  0x7a   : > { %p1732_p7 = pnand %p1730_p12, %p2010_p11 }
  0x7b   : > { %p1739_p4 = por %p1738_p1, %p1737_p0 }
  0x7c   : > { %p1733_p13 = pneg %p1732_p7 }
  0x7e   : > { %p1740_p6 = pnand %p1739_p4, %p1733_p13 }
  0x80   : > { %1743 = shalt.err (!%p1740_p6)
}
  0x81   : > { %1514 = dma.hbm_to_vmem [thread:$0]  (!%p1994_p9), %s2470_s6, 16, %s250_s8, [#allocation14]  }
  0x82   : > { %s1403_s28 = sadd.s32 4294967294, %s1888_s14   ;;  %s2104_s20 = sadd.s32 1, %s1888_s14  }
  0x83   : > { %s36_s19 = ssub.s32 %s1888_s14, %s2104_s20  ;;  %s39_s29 = sadd.s32 1, %s1884_s13 }
  0x84   : > { %p37_p4 = scmp.eq.s32.totalorder %s36_s19, 0  ;;  %p46_p6 = scmp.ne.s32.totalorder %s1884_s13, %s1880_s12 }
  0x85   : > { %p47_p11 = scmp.eq.s32.totalorder %s1888_s14, 0  ;;  %p52_p2 = scmp.ne.s32.totalorder %s1880_s12, %s1876_s11 }
  0x86   : > { %s2115_s15 = scalar_select %p37_p4, %s1884_s13, %s39_s29  }
  0x87   : > { %p2117_p3 = por %p47_p11, %p46_p6  ;;  %p2486_p5 = scmp.eq.s32.totalorder %s1978_s16, 0 }
  0x88   : > { %p186_p8 = scmp.eq.s32.totalorder %s1978_s16, 1  ;;  %p192_p10 = scmp.eq.s32.totalorder %s1403_s28, 1 }
  0x89   : > { %p2123_p9 = por %p2486_p5, %p52_p2  ;;  %p1530_p12 = scmp.lt.s32.totalorder %s1888_s14, 2 }
  0x8a   : > { %s260_s0 = sand.u32 1, %s1884_s13   ;;  %p2130_p7 = por %p186_p8, %p46_p6 }
  0x8b   : > { %s2487_s8 = scalar_select %p2123_p9, 1, 0 }
  0x8c   : > { %s2488_s18 = scalar_select %p2130_p7, 1, 0 }
  0x8d   : > { %p2134_p13 = por %p192_p10, %p52_p2  ;;  %s2138_s23 = sshll.u32 %s260_s0, 3 }
  0x8e   : > { %s1411_s24 = sshll.u32 %s1888_s14, 7  ;;  %s264_s9 = scalar_lea.vmem [#allocation4], %s2138_s23 }
  0x8f   : > { %s2489_s21 = scalar_select %p2134_p13, 1, 0 }
  0x90   : > { %s2144_s22 = scalar_lea.hbm %s2465_s1, %s1411_s24  ;;  %s271_s10 = sshll.u32 %s264_s9, 4  ;;  %s2147_s10 = int_to_ptr.vmem [resolvable:$true] %s271_s10 }
  0x91   : > { %p2151_p0 = pnand %p1530_p12, %p2117_p3  ;;  %s2158_s29 = scalar_lea.hbm %s2466_s2, %s1411_s24 }
  0x92   : > { %s278_s25 = sand.u32 1, %s1888_s14   ;;  %s261_s26 = scalar_lea.sflag [#allocation5], %s260_s0 }
  0x93   : > { %s1744_s3 = scalar_lea.hbm %s2144_s22, 128  ;;  %p1746_p4 = pneg %p2151_p0 }
  0x94   : > { %p1745_p1 = scmp.ne.s32.totalorder %s2144_s22, %s1744_s3  ;;  %s1749_s4 = scalar_lea.hbm %s2465_s1, 256 }
  0x95   : > { %p1750_p2 = scmp.lt.u32.totalorder %s2144_s22, %s2465_s1  ;;  %p1751_p3 = scmp.lt.u32.totalorder %s1749_s4, %s1744_s3 }
  0x96   : > { %p1747_p6 = pnand %p1746_p4, %p1745_p1  ;;  %p1753_p8 = scmp.lt.u32.totalorder %s1744_s3, %s2144_s22 }
  0x97   : > { %p1752_p5 = por %p1751_p3, %p1750_p2 }
  0x98   : > { %p1748_p11 = pneg %p1747_p6 }
  0x99   : > { %p1754_p10 = por %p1753_p8, %p1752_p5 }
  0x9b   : > { %p1755_p12 = pnand %p1754_p10, %p1748_p11 }
  0x9d   : > { %1758 = shalt.err (!%p1755_p12)
}
  0x9e   : > { %s1759_s0 = scalar_lea.vmem %s2147_s10, 128  ;;  %s1897_s24 = smov [#allocation4]  }
  0x9f   : > { %p1760_p1 = scmp.ne.s32.totalorder %s2147_s10, %s1759_s0  ;;  %s1764_s19 = sshll.u32 %s1897_s24, 4  ;;  %s1765_s19 = int_to_ptr.vmem [resolvable:$false] %s1764_s19 }
  0xa0   : > { %s1766_s5 = scalar_lea.vmem %s1765_s19, 256  ;;  %p1767_p7 = scmp.lt.s32.totalorder %s2147_s10, %s1765_s19 }
  0xa1   : > { %p1762_p6 = pnand %p1760_p1, %p1746_p4  ;;  %p1768_p2 = scmp.lt.s32.totalorder %s1766_s5, %s1759_s0 }
  0xa3   : > { %p1763_p13 = pneg %p1762_p6  ;;  %p1769_p3 = por %p1768_p2, %p1767_p7 }
  0xa5   : > { %p1770_p5 = pnand %p1769_p3, %p1763_p13 }
  0xa7   : > { %1773 = shalt.err (!%p1770_p5)
}
  0xa8   : > { %1518 = dma.hbm_to_vmem [thread:$0]  (!%p2151_p0), %s2144_s22, 128, %s2147_s10, %s261_s26  }
  0xa9   : > { %s282_s3 = scalar_lea.vmem [#allocation7], %s2138_s23  ;;  %s279_s30 = scalar_lea.sflag [#allocation8], %s278_s25 }
  0xaa   : > { %s289_s4 = sshll.u32 %s282_s3, 4  ;;  %s1774_s9 = scalar_lea.hbm %s2158_s29, 128  ;;  %s290_s4 = int_to_ptr.vmem [resolvable:$true] %s289_s4 }
  0xab   : > { %p1775_p7 = scmp.ne.s32.totalorder %s2158_s29, %s1774_s9  ;;  %s1779_s24 = scalar_lea.hbm %s2466_s2, 256 }
  0xac   : > { %p1780_p8 = scmp.lt.u32.totalorder %s2158_s29, %s2466_s2  ;;  %p1781_p10 = scmp.lt.u32.totalorder %s1779_s24, %s1774_s9 }
  0xad   : > { %p1777_p13 = pnand %p1775_p7, %p1746_p4  ;;  %p1783_p1 = scmp.lt.u32.totalorder %s1774_s9, %s2158_s29 }
  0xae   : > { %p1782_p12 = por %p1781_p10, %p1780_p8 }
  0xaf   : > { %p1778_p11 = pneg %p1777_p13 }
  0xb0   : > { %p1784_p6 = por %p1783_p1, %p1782_p12 }
  0xb2   : > { %p1785_p2 = pnand %p1784_p6, %p1778_p11 }
  0xb4   : > { %1788 = shalt.err (!%p1785_p2)
}
  0xb5   : > { %s1789_s23 = scalar_lea.vmem %s290_s4, 128  ;;  %s1898_s22 = smov [#allocation7]  }
  0xb6   : > { %p1790_p3 = scmp.ne.s32.totalorder %s290_s4, %s1789_s23  ;;  %s1794_s10 = sshll.u32 %s1898_s22, 4  ;;  %s1795_s10 = int_to_ptr.vmem [resolvable:$false] %s1794_s10 }
  0xb7   : > { %s1796_s25 = scalar_lea.vmem %s1795_s10, 256  ;;  %p1797_p13 = scmp.lt.s32.totalorder %s290_s4, %s1795_s10 }
  0xb8   : > { %p1792_p5 = pnand %p1790_p3, %p1746_p4  ;;  %p1798_p9 = scmp.lt.s32.totalorder %s1796_s25, %s1789_s23 }
  0xba   : > { %p1793_p7 = pneg %p1792_p5  ;;  %p1799_p8 = por %p1798_p9, %p1797_p13 }
  0xbc   : > { %p1800_p10 = pnand %p1799_p8, %p1793_p7 }
  0xbe   : > { %1803 = shalt.err (!%p1800_p10)
}
  0xbf   : > { %1521 = dma.hbm_to_vmem [thread:$0]  (!%p2151_p0), %s2158_s29, 128, %s290_s4, %s279_s30  }
  0xc0   : > { %p2491_p11 = scmp.ne.s32.totalorder %s2479_s17, 0 }
  0xc1   : > { %s2211_s26 = sand.u32 (!%p2491_p11), 1, %s1880_s12   ;;  %p2492_p9 = scmp.ne.s32.totalorder (!%p2491_p11), %s2487_s8, 0 }
  0xc2   : > { %298 = sbr.rel (%p2491_p11) target bundleno = 2641 (0xa51), region = 44  ;;  %s2214_s3 = sshll.u32 (!%p2491_p11), %s2211_s26, 3 }
  0xc3   : > { %s301_s9 = scalar_lea.sflag (!%p2491_p11), [#allocation5], %s2211_s26  ;;  %s304_s28 = scalar_lea.vmem (!%p2491_p11), [#allocation4], %s2214_s3 }
  0xc9   : > { %1851 = dma.done.wait (%p2492_p9), %s301_s9, 128  }
  0xca   : > { %1853 = vsyncadd (%p2492_p9), %s301_s9, 4294967168  ;;  %s309_s17 = sand.u32 1, %s1978_s16   ;;  %s313_s29 = scalar_lea.vmem [#allocation7], %s2214_s3 }
  0xcb   : > { %s310_s27 = scalar_lea.sflag [#allocation8], %s309_s17 }
  0xcc   : > { %1855 = dma.done.wait (%p2492_p9), %s310_s27, 128  }
  0xcd   : > { %1857 = vsyncadd (%p2492_p9), %s310_s27, 4294967168  ;;  %p2493_p0 = scmp.eq.s32.totalorder %s1978_s16, 0 }
  0xcf   : > { %1859 = dma.done.wait (%p2493_p0), [#allocation8], 512   ;;  %p2494_p4 = pmov %p2493_p0 }
  0xd0   : > { %p2495_p12 = pmov %p2493_p0 }
  0xd1   : > { %1861 = vsyncadd (%p2494_p4), [#allocation8], 4294966784 }
  0xd2   : > { %1863 = dma.done.wait (%p2495_p12), [#allocation11], 528   ;;  %p2496_p1 = pmov %p2493_p0 }
  0xd3   : > { %p2497_p6 = pmov %p2493_p0 }
  0xd4   : > { %1865 = vsyncadd (%p2496_p1), [#allocation11], 4294966768 }
  0xd5   : > { %1867 = dma.done.wait (%p2497_p6), [#allocation14], 16   ;;  %p2498_p2 = pmov %p2493_p0 }
  0xd6   : > { %v1899_v0 = vmov 0.0   ;;  %vm1900_vm0 = vmmov 0   ;;  %v366_v1 = vld [vmem:[#allocation9] sm:$0xff]  ;;  %v367_v2 = vld [vmem:[#allocation9 + $0x8] sm:$0xff]  ;;  %v368_v3 = vld [vmem:[#allocation9 + $0x10] sm:$0xff]  ;;  %vm384_vm1 = vcmask 261120   ;;  %v377_v9 = vlaneseq }
  0xd7   : > { %1869 = vsyncadd (%p2498_p2), [#allocation14], 4294967280  ;;  %1446 = vmatprep.subr.bf16.mxu0 %v1899_v0  ;;  %1450 = vmatprep.mubr.msk.bf16.mxu0 %vm1900_vm0, %v1899_v0  ;;  %v382_v4 = vpack.c.bf16 %v367_v2, %v366_v1  ;;  %v369_v5 = vld [vmem:[#allocation9 + $0x18] sm:$0xff]  ;;  %v1901_v10 = vmov 1966171168   ;;  %s1902_s8 = smov 32  }
  0xd8   : > { %1459 = vmatprep.subr.bf16.mxu1 %v1899_v0  ;;  %1463 = vmatprep.mubr.msk.bf16.mxu1 %vm1900_vm0, %v1899_v0  ;;  %v383_v6 = vpack.c.bf16 %v369_v5, %v368_v3  ;;  %v376_v7 = vld [vmem:[%s313_s29] sm:$0x1f]  ;;  %v432_v11 = vunpack.c.l.s4 %v1901_v10  ;;  %v2254_v13 = vshrl.u32 %v377_v9, 7  ;;  %v1423_v44 = vld [vmem:[#allocation10] ss:$0 sm:$0xff]  ;;  %s1903_s4 = smov 96  }
  0xd9   : > { %1447 = vmatpush3.bf16.msra.mxu0 %v382_v4  ;;  %1460 = vmatpush3.bf16.msra.mxu1 %v382_v4  ;;  %v381_v8 = vpack.c.bf16 %v376_v7, %v376_v7  ;;  %v365_v45 = vld [vmem:[%s304_s28] sm:$0xff]  ;;  %s364_s30 = sld [smem:[#allocation3 + %s1978_s16]]  ;;  %vm624_vm2 = vcmask 1041409   ;;  %vm626_vm3 = vcmask 1042434   ;;  %vm628_vm4 = vcmask 1043459   ;;  %s1430_s0 = sshll.u32 %s1978_s16, 7 }
  0xda   : > { %1448 = vmatprep.subr.bf16.mxu0 %v1899_v0  ;;  %1461 = vmatprep.subr.bf16.mxu1 %v1899_v0  ;;  %v433_v12 = vunpack.c.0.s8 %v432_v11  ;;  %v2263_v24 = vsub.s32 0, %v2254_v13  ;;  %v2280_v46 = vpack.c.bf16 %v365_v45, %v365_v45  ;;  %vm630_vm5 = vcmask 1044484   ;;  %s362_s24 = scalar_lea.vmem [#allocation15], %s2214_s3  ;;  %s2418_s22 = scalar_lea.hbm %s2471_s7, %s1430_s0 }
  0xdb   : > { %vm634_vm7 = vcmask 61440   ;;  %vm653_vm8 = vcmask 64512   ;;  %s1272_s19 = sshll.u32 %s362_s24, 4  ;;  %s1259_s16 = scalar_lea.sflag [#allocation6], %s2211_s26  ;;  %s2420_s19 = int_to_ptr.vmem [resolvable:$true] %s1272_s19 }
  0xdc   : > { %v2257_v14 = vsub.s32 %v433_v12, %v2254_v13  ;;  %s1804_s10 = scalar_lea.vmem %s2420_s19, 128  ;;  %p2501_p5 = scmp.ne.s32.totalorder %s2488_s18, 0 }
  0xdd   : > { %1449 = vmatpush3.bf16.msra.mxu0 %v383_v6  ;;  %1462 = vmatpush3.bf16.msra.mxu1 %v383_v6  ;;  %p1805_p3 = scmp.ne.s32.totalorder %s2420_s19, %s1804_s10  ;;  %s1904_s25 = smov [#allocation15]  }
  0xde   : > { %1454 = vmatprep.subr.mxu0 %v1899_v0  ;;  %1472 = vmatprep.subr.bf16.mxu1 %v1899_v0  ;;  %s1808_s3 = sshll.u32 %s1904_s25, 4  ;;  %s1809_s3 = int_to_ptr.vmem [resolvable:$false] %s1808_s3 }
  0xdf   : > { %p1806_p7 = pnand %p1805_p3, %p2501_p5  ;;  %s1810_s9 = scalar_lea.vmem %s1809_s3, 256 }
  0xe0   : > { %1451 = vmatmul.mubr.msk.bf16.vlgmr.msra.gmra.mrb[0].mxu0 %vm384_vm1, %v381_v8  ;;  %p1811_p8 = scmp.lt.s32.totalorder %s2420_s19, %s1809_s3  ;;  %p1812_p10 = scmp.lt.s32.totalorder %s1810_s9, %s1804_s10 }
  0xe1   : > { %1456 = vmatprep.mubr.msk.f32.mxu0 %vm1900_vm0, %v1899_v0  ;;  %p1807_p13 = pneg %p1806_p7 }
  0xe2   : > { %p1813_p11 = por %p1812_p10, %p1811_p8 }
  0xe4   : > { %p1814_p9 = pnand %p1813_p11, %p1807_p13 }
 0x1b3   : > { %v422_v15 = vpop.f32.mrb[0].mxu0 }
 0x1b4   : > { %v430_v16 = vcombine.high %v422_v15, %v422_v15  ;;  %v437_v17 = vrot.slane %v422_v15, %v2257_v14  ;;  %v1452_v18 = vpop.f32.mrb[1].mxu0 }
 0x1b5   : > { %v425_v19 = vpop.f32.mrb[2].mxu0 }
 0x1b6   : > { %v444_v20 = vrot.slane %v430_v16, %v2257_v14  ;;  %v445_v21 = vcombine.high %v437_v17, %v437_v17  ;;  %v452_v22 = vrot.slane %v437_v17, %v2257_v14  ;;  %v1453_v23 = vpop.f32.mrb[3].mxu0 }
 0x1b7   : > { %v378_v23 = vand.u32 127, %v377_v9 }
 0x1b8   : > { %v459_v25 = vrot.slane %v444_v20, %v2257_v14  ;;  %v466_v26 = vrot.slane %v445_v21, %v2257_v14  ;;  %v474_v27 = vpack.c.bf16 %v452_v22, %v452_v22  ;;  %v467_v28 = vcombine.high %v452_v22, %v452_v22 }
 0x1ba   : > { %v480_v29 = vpack.i.b16 %v474_v27, %v474_v27  ;;  %v476_v30 = vpack.c.bf16 %v467_v28, %v467_v28  ;;  %v475_v31 = vpack.c.bf16 %v466_v26, %v466_v26  ;;  %v468_v32 = vcombine.high %v466_v26, %v466_v26 }
 0x1bb   : > { %v478_v33 = vpack.c.bf16 %v459_v25, %v459_v25  ;;  %v2308_v25 = vsub.s32 %v378_v23, %v2254_v13 }
 0x1bc   : > { %v485_v34 = vrot.slane %v480_v29, %v2263_v24  ;;  %v494_v35 = vpack.i.b16 %v476_v30, %v476_v30  ;;  %v487_v36 = vpack.i.b16 %v475_v31, %v475_v31  ;;  %v477_v37 = vpack.c.bf16 %v468_v32, %v468_v32 }
 0x1bd   : > { %v508_v41 = vpack.i.b16 %v478_v33, %v478_v33 }
 0x1be   : > { %519 = vrot.lane.b32.xlu0 %v485_v34, %s1902_s8  ;;  %v499_v38 = vrot.slane %v494_v35, %v2263_v24  ;;  %v501_v39 = vpack.i.b16 %v477_v37, %v477_v37  ;;  %v492_v40 = vrot.slane %v487_v36, %v2263_v24  ;;  %v379_v34 = vstv %s364_s30  ;;  %v372_v37 = vld [vmem:[#allocation12 + $0x10] sm:$0xff] }
 0x1bf   : > { %v513_v43 = vrot.slane %v508_v41, %v2263_v24  ;;  %vm2317_vm6 = vcmp.lt.s32.totalorder %v378_v23, %v379_v34 }
 0x1c0   : > { %523 = vrot.lane.b32.xlu1 %v499_v38, %s1902_s8  ;;  %v506_v42 = vrot.slane %v501_v39, %v2263_v24 }
 0x1c2   : > { %521 = vrot.lane.b32.xlu0 %v492_v40, %s1902_s8 }
 0x1c4   : > { %525 = vrot.lane.b32.xlu1 %v506_v42, %s1902_s8 }
 0x1c6   : > { %527 = vrot.lane.b32.xlu0 %v513_v43, %s1902_s8 }
 0x1c8   : > { %554 = vrot.lane.b32.xlu1 %v1423_v44, %s1902_s8 }
 0x230   : > { %v520_v47 = vpop.permute.xlu0 %519 }
 0x231   : > { %v534_v48 = vadd.bf16 %v520_v47, %v2280_v46 }
 0x232   : > { %v524_v49 = vpop.permute.xlu1 %523 }
 0x233   : > { %1580 = vtanh.bf16 %v534_v48  ;;  %v536_v50 = vadd.bf16 %v524_v49, %v2280_v46 }
 0x234   : > { %v522_v51 = vpop.permute.xlu0 %521 }
 0x235   : > { %1582 = vtanh.bf16 %v536_v50  ;;  %v535_v52 = vadd.bf16 %v522_v51, %v2280_v46 }
 0x236   : > { %v526_v53 = vpop.permute.xlu1 %525 }
 0x237   : > { %1584 = vtanh.bf16 %v535_v52  ;;  %v537_v54 = vadd.bf16 %v526_v53, %v2280_v46 }
 0x238   : > { %v528_v55 = vpop.permute.xlu0 %527 }
 0x239   : > { %1586 = vtanh.bf16 %v537_v54  ;;  %v538_v56 = vadd.bf16 %v528_v55, %v2280_v46 }
 0x23a   : > { %v2287_v58 = vpop.permute.xlu1 %554 }
 0x23b   : > { %1588 = vtanh.bf16 %v538_v56 }
 0x23e   : > { %v1581_v57 = vpop.eup %1580 }
 0x23f   : > { %v544_v59 = vunpack.c.l.bf16 %v1581_v57 }
 0x240   : > { %v1583_v60 = vpop.eup %1582 }
 0x241   : > { %v546_v61 = vunpack.c.l.bf16 %v1583_v60  ;;  %v557_v62 = vmul.f32 %v2287_v58, %v544_v59 }
 0x242   : > { %v1585_v63 = vpop.eup %1584 }
 0x243   : > { %v545_v1 = vunpack.c.l.bf16 %v1585_v63  ;;  %567 = vrot.lane.b32.xlu0 %v557_v62, %s1903_s4  ;;  %v559_v5 = vmul.f32 %v2287_v58, %v546_v61 }
 0x244   : > { %v1587_v2 = vpop.eup %1586 }
 0x245   : > { %v547_v3 = vunpack.c.l.bf16 %v1587_v2  ;;  %v558_v4 = vmul.f32 %v2287_v58, %v545_v1 }
 0x246   : > { %v1589_v6 = vpop.eup %1588 }
 0x247   : > { %v548_v7 = vunpack.c.l.bf16 %v1589_v6  ;;  %569 = vrot.lane.b32.xlu1 %v558_v4, %s1903_s4  ;;  %571 = vrot.lane.b32.xlu0 %v559_v5, %s1903_s4  ;;  %v560_v8 = vmul.f32 %v2287_v58, %v547_v3 }
 0x249   : > { %v561_v10 = vmul.f32 %v2287_v58, %v548_v7 }
 0x24b   : > { %573 = vrot.lane.b32.xlu1 %v560_v8, %s1903_s4  ;;  %575 = vrot.lane.b32.xlu0 %v561_v10, %s1903_s4 }
 0x2b5   : > { %v568_v11 = vpop.permute.xlu0 %567 }
 0x2b6   : > { %v582_v12 = vsel %vm384_vm1, %v568_v11, 0.0 }
 0x2b7   : > { %583 = vadd.xlane.f32.xlu1 %v582_v12 }
 0x2b9   : > { %v570_v15 = vpop.permute.xlu1 %569  ;;  %v572_v16 = vpop.permute.xlu0 %571 }
 0x2ba   : > { %v585_v17 = vsel %vm384_vm1, %v570_v15, 0.0  ;;  %v588_v20 = vsel %vm384_vm1, %v572_v16, 0.0 }
 0x2bb   : > { %586 = vadd.xlane.f32.xlu0 %v585_v17 }
 0x2bd   : > { %v574_v18 = vpop.permute.xlu1 %573  ;;  %v576_v21 = vpop.permute.xlu0 %575 }
 0x2be   : > { %v591_v19 = vsel %vm384_vm1, %v574_v18, 0.0  ;;  %v594_v22 = vsel %vm384_vm1, %v576_v21, 0.0 }
 0x2bf   : > { %592 = vadd.xlane.f32.xlu1 %v591_v19  ;;  %589 = vadd.xlane.f32.xlu0 %v588_v20 }
 0x2c3   : > { %595 = vadd.xlane.f32.xlu0 %v594_v22 }
 0x2d9   : > { %650 = vrot.lane.b32.xlu0 %v365_v45, %s1903_s4 }
 0x344   : > { %v584_v26 = vpop.xlane.xlu1 %583 }
 0x345   : > { %v607_v29 = vrot.slane %v584_v26, %v2308_v25 }
 0x348   : > { %v587_v27 = vpop.xlane.xlu0 %586 }
 0x349   : > { %v611_v28 = vrot.slane %v587_v27, %v2308_v25 }
 0x34b   : > { %v625_v33 = vsel %vm624_vm2, %v611_v28, %v607_v29 }
 0x34c   : > { %v593_v30 = vpop.xlane.xlu1 %592  ;;  %v590_v31 = vpop.xlane.xlu0 %589 }
 0x34d   : > { %v615_v32 = vrot.slane %v590_v31, %v2308_v25  ;;  %v619_v9 = vrot.slane %v593_v30, %v2308_v25 }
 0x34f   : > { %v627_v13 = vsel %vm626_vm3, %v615_v32, %v625_v33 }
 0x350   : > { %v596_v35 = vpop.xlane.xlu0 %595  ;;  %v629_v38 = vsel %vm628_vm4, %v619_v9, %v627_v13 }
 0x351   : > { %v623_v36 = vrot.slane %v596_v35, %v2308_v25 }
 0x353   : > { %v631_v39 = vsel %vm630_vm5, %v623_v36, %v629_v38 }
 0x354   : > { %v633_v40 = vsel %vm2317_vm6, %v631_v39, -1e+30  ;;  %v651_v42 = vpop.permute.xlu0 %650 }
 0x355   : > { %v635_v41 = vsel %vm634_vm7, %v633_v40, -inf  ;;  %1455 = vmatpush3.msra.mxu0 %v651_v42 }
 0x356   : > { %636 = vmax.xlane.f32.xlu1 %v635_v41  ;;  %1467 = vmatprep.subr.mxu0 %v1899_v0 }
 0x3e3   : > { %v637_v43 = vpop.xlane.xlu1 %636 }
 0x3e4   : > { %v641_v44 = vsub.f32 %v633_v40, %v637_v43  ;;  %v638_v49 = vsub.f32 -inf, %v637_v43 }
 0x3e6   : > { %v642_v45 = vmul.f32 1.442695, %v641_v44  ;;  %v639_v50 = vmul.f32 1.442695, %v638_v49 }
 0x3e8   : > { %1590 = vpow2.f32 %v642_v45 }
 0x3e9   : > { %1592 = vpow2.f32 %v639_v50 }
 0x3f2   : > { %v1591_v47 = vpop.eup %1590 }
 0x3f3   : > { %1457 = vmatmul.mubr.msk.f32.vlgmr.msra.gmra.mrb[4].mxu0 %vm653_vm8, %v1591_v47  ;;  %v645_v48 = vsel %vm634_vm7, %v1591_v47, 0.0  ;;  %v1593_v51 = vpop.eup %1592 }
 0x3f4   : > { %1468 = vmatpush3.msra.mxu0 %v651_v42  ;;  %646 = vadd.xlane.f32.xlu1 %v645_v48  ;;  %v644_v53 = vmul.f32 0.0, %v1593_v51 }
 0x3f5   : > { %1469 = vmatprep.mubr.msk.f32.mxu0 %vm1900_vm0, %v1899_v0 }
 0x481   : > { %v647_v52 = vpop.xlane.xlu1 %646 }
 0x482   : > { %v648_v54 = vadd.f32 %v647_v52, %v644_v53 }
 0x484   : > { %1594 = vrcp.f32 %v648_v54 }
 0x48e   : > { %v1595_v59 = vpop.eup %1594 }
 0x4c6   : > { %v723_v55 = vpop.f32.mrb[4].mxu0 }
 0x4c7   : > { %v727_v56 = vadd.f32 %v723_v55, %v644_v53  ;;  %v1458_v57 = vpop.f32.mrb[5].mxu0 }
 0x4c9   : > { %v729_v60 = vmul.f32 %v1595_v59, %v727_v56 }
 0x4cb   : > { %v730_v61 = vpack.c.bf16 %v729_v60, %v729_v60 }
 0x4cd   : > { %1464 = vmatmul.mubr.msk.bf16.vlgmr.msra.gmra.mrb[0].mxu1 %vm384_vm1, %v730_v61 }
 0x4ce   : > { %1476 = vmatprep.mubr.msk.bf16.mxu1 %vm1900_vm0, %v1899_v0 }
 0x5a0   : > { %v768_v62 = vpop.f32.mrb[0].mxu1 }
 0x5a1   : > { %v775_v63 = vcombine.high %v768_v62, %v768_v62  ;;  %v782_v1 = vrot.slane %v768_v62, %v2257_v14  ;;  %v1465_v2 = vpop.f32.mrb[1].mxu1 }
 0x5a2   : > { %v771_v3 = vpop.f32.mrb[2].mxu1 }
 0x5a3   : > { %v789_v4 = vrot.slane %v775_v63, %v2257_v14  ;;  %v790_v5 = vcombine.high %v782_v1, %v782_v1  ;;  %v797_v6 = vrot.slane %v782_v1, %v2257_v14  ;;  %v1466_v7 = vpop.f32.mrb[3].mxu1 }
 0x5a5   : > { %v804_v8 = vrot.slane %v789_v4, %v2257_v14  ;;  %v811_v10 = vrot.slane %v790_v5, %v2257_v14  ;;  %v812_v11 = vcombine.high %v797_v6, %v797_v6  ;;  %v819_v12 = vpack.c.bf16 %v797_v6, %v797_v6 }
 0x5a7   : > { %v821_v15 = vpack.c.bf16 %v812_v11, %v812_v11  ;;  %v825_v16 = vpack.i.b16 %v819_v12, %v819_v12  ;;  %v820_v17 = vpack.c.bf16 %v811_v10, %v811_v10  ;;  %v813_v18 = vcombine.high %v811_v10, %v811_v10 }
 0x5a8   : > { %v823_v19 = vpack.c.bf16 %v804_v8, %v804_v8 }
 0x5a9   : > { %v830_v20 = vrot.slane %v825_v16, %v2263_v24  ;;  %v832_v21 = vpack.i.b16 %v820_v17, %v820_v17  ;;  %v839_v22 = vpack.i.b16 %v821_v15, %v821_v15  ;;  %v822_v23 = vpack.c.bf16 %v813_v18, %v813_v18 }
 0x5aa   : > { %v853_v29 = vpack.i.b16 %v823_v19, %v823_v19 }
 0x5ab   : > { %864 = vrot.lane.b32.xlu1 %v830_v20, %s1902_s8  ;;  %v837_v26 = vrot.slane %v832_v21, %v2263_v24  ;;  %v846_v27 = vpack.i.b16 %v822_v23, %v822_v23  ;;  %v844_v28 = vrot.slane %v839_v22, %v2263_v24 }
 0x5ac   : > { %v858_v31 = vrot.slane %v853_v29, %v2263_v24 }
 0x5ad   : > { %866 = vrot.lane.b32.xlu0 %v837_v26, %s1902_s8  ;;  %v851_v30 = vrot.slane %v846_v27, %v2263_v24 }
 0x5af   : > { %868 = vrot.lane.b32.xlu1 %v844_v28, %s1902_s8 }
 0x5b1   : > { %870 = vrot.lane.b32.xlu0 %v851_v30, %s1902_s8  ;;  %v370_v30 = vld [vmem:[#allocation12] sm:$0xff] }
 0x5b3   : > { %872 = vrot.lane.b32.xlu1 %v858_v31, %s1902_s8  ;;  %v371_v31 = vld [vmem:[#allocation12 + $0x8] sm:$0xff] }
 0x61d   : > { %v865_v32 = vpop.permute.xlu1 %864 }
 0x61e   : > { %v879_v33 = vadd.bf16 %v865_v32, %v2280_v46  ;;  %v1056_v32 = vpack.c.bf16 %v371_v31, %v370_v30 }
 0x61f   : > { %v867_v9 = vpop.permute.xlu0 %866 }
 0x620   : > { %1596 = vtanh.bf16 %v879_v33  ;;  %v880_v34 = vadd.bf16 %v867_v9, %v2280_v46  ;;  %1473 = vmatpush3.bf16.msra.mxu1 %v1056_v32  ;;  %v373_v33 = vld [vmem:[#allocation12 + $0x18] sm:$0xff] }
 0x621   : > { %v869_v13 = vpop.permute.xlu1 %868  ;;  %1474 = vmatprep.subr.bf16.mxu1 %v1899_v0  ;;  %v1057_v9 = vpack.c.bf16 %v373_v33, %v372_v37 }
 0x622   : > { %1598 = vtanh.bf16 %v880_v34  ;;  %v881_v35 = vadd.bf16 %v869_v13, %v2280_v46 }
 0x623   : > { %v871_v36 = vpop.permute.xlu0 %870 }
 0x624   : > { %1600 = vtanh.bf16 %v881_v35  ;;  %v882_v38 = vadd.bf16 %v871_v36, %v2280_v46  ;;  %1475 = vmatpush3.bf16.msra.mxu1 %v1057_v9 }
 0x625   : > { %v873_v39 = vpop.permute.xlu1 %872 }
 0x626   : > { %1602 = vtanh.bf16 %v882_v38  ;;  %v883_v40 = vadd.bf16 %v873_v39, %v2280_v46 }
 0x628   : > { %1604 = vtanh.bf16 %v883_v40 }
 0x62b   : > { %v1597_v41 = vpop.eup %1596 }
 0x62c   : > { %v889_v42 = vunpack.c.l.bf16 %v1597_v41 }
 0x62d   : > { %v1599_v43 = vpop.eup %1598 }
 0x62e   : > { %v890_v44 = vunpack.c.l.bf16 %v1599_v43  ;;  %v894_v45 = vmul.f32 %v889_v42, %v2287_v58 }
 0x62f   : > { %v1601_v47 = vpop.eup %1600 }
 0x630   : > { %v891_v48 = vunpack.c.l.bf16 %v1601_v47  ;;  %904 = vrot.lane.b32.xlu0 %v894_v45, %s1903_s4  ;;  %v895_v49 = vmul.f32 %v890_v44, %v2287_v58 }
 0x631   : > { %v1603_v50 = vpop.eup %1602 }
 0x632   : > { %v892_v51 = vunpack.c.l.bf16 %v1603_v50  ;;  %906 = vrot.lane.b32.xlu1 %v895_v49, %s1903_s4  ;;  %v896_v52 = vmul.f32 %v891_v48, %v2287_v58 }
 0x633   : > { %v1605_v53 = vpop.eup %1604 }
 0x634   : > { %v893_v54 = vunpack.c.l.bf16 %v1605_v53  ;;  %908 = vrot.lane.b32.xlu0 %v896_v52, %s1903_s4  ;;  %v897_v55 = vmul.f32 %v892_v51, %v2287_v58 }
 0x636   : > { %910 = vrot.lane.b32.xlu1 %v897_v55, %s1903_s4  ;;  %v898_v56 = vmul.f32 %v893_v54, %v2287_v58 }
 0x638   : > { %912 = vrot.lane.b32.xlu0 %v898_v56, %s1903_s4 }
 0x6a2   : > { %v905_v57 = vpop.permute.xlu0 %904 }
 0x6a3   : > { %v919_v59 = vsel %vm384_vm1, %v905_v57, 0.0 }
 0x6a4   : > { %920 = vadd.xlane.f32.xlu1 %v919_v59  ;;  %v907_v60 = vpop.permute.xlu1 %906 }
 0x6a5   : > { %v922_v61 = vsel %vm384_vm1, %v907_v60, 0.0 }
 0x6a6   : > { %v909_v62 = vpop.permute.xlu0 %908  ;;  %923 = vadd.xlane.f32.xlu0 %v922_v61 }
 0x6a7   : > { %v925_v1 = vsel %vm384_vm1, %v909_v62, 0.0 }
 0x6a8   : > { %v911_v63 = vpop.permute.xlu1 %910 }
 0x6a9   : > { %v928_v2 = vsel %vm384_vm1, %v911_v63, 0.0 }
 0x6aa   : > { %v913_v3 = vpop.permute.xlu0 %912  ;;  %926 = vadd.xlane.f32.xlu0 %v925_v1  ;;  %929 = vadd.xlane.f32.xlu1 %v928_v2 }
 0x6ab   : > { %v931_v58 = vsel %vm384_vm1, %v913_v3, 0.0 }
 0x6ae   : > { %932 = vadd.xlane.f32.xlu0 %v931_v58 }
 0x731   : > { %v921_v4 = vpop.xlane.xlu1 %920 }
 0x732   : > { %v942_v7 = vrot.slane %v921_v4, %v2308_v25 }
 0x733   : > { %v924_v5 = vpop.xlane.xlu0 %923 }
 0x734   : > { %v946_v6 = vrot.slane %v924_v5, %v2308_v25 }
 0x736   : > { %v959_v12 = vsel %vm624_vm2, %v946_v6, %v942_v7 }
 0x737   : > { %v927_v8 = vpop.xlane.xlu0 %926  ;;  %v930_v10 = vpop.xlane.xlu1 %929 }
 0x738   : > { %v950_v11 = vrot.slane %v927_v8, %v2308_v25  ;;  %v954_v15 = vrot.slane %v930_v10, %v2308_v25 }
 0x73a   : > { %v960_v16 = vsel %vm626_vm3, %v950_v11, %v959_v12 }
 0x73b   : > { %v933_v17 = vpop.xlane.xlu0 %932  ;;  %v961_v19 = vsel %vm628_vm4, %v954_v15, %v960_v16 }
 0x73c   : > { %v958_v18 = vrot.slane %v933_v17, %v2308_v25 }
 0x73e   : > { %v962_v20 = vsel %vm630_vm5, %v958_v18, %v961_v19  ;;  %v1428_v19 = vld [vmem:[#allocation13] ss:$0 sm:$0xff] }
 0x73f   : > { %v964_v21 = vsel %vm2317_vm6, %v962_v20, -1e+30 }
 0x740   : > { %v965_v22 = vsel %vm634_vm7, %v964_v21, -inf }
 0x741   : > { %966 = vmax.xlane.f32.xlu1 %v965_v22 }
 0x7ce   : > { %v967_v23 = vpop.xlane.xlu1 %966 }
 0x7cf   : > { %v971_v26 = vsub.f32 %v964_v21, %v967_v23  ;;  %v968_v34 = vsub.f32 -inf, %v967_v23 }
 0x7d1   : > { %v972_v27 = vmul.f32 1.442695, %v971_v26  ;;  %v969_v13 = vmul.f32 1.442695, %v968_v34 }
 0x7d3   : > { %1606 = vpow2.f32 %v972_v27 }
 0x7d4   : > { %1608 = vpow2.f32 %v969_v13 }
 0x7dd   : > { %v1607_v28 = vpop.eup %1606 }
 0x7de   : > { %1470 = vmatmul.mubr.msk.f32.vlgmr.msra.gmra.mrb[6].mxu0 %vm653_vm8, %v1607_v28  ;;  %v975_v29 = vsel %vm634_vm7, %v1607_v28, 0.0  ;;  %v1609_v35 = vpop.eup %1608 }
 0x7df   : > { %976 = vadd.xlane.f32.xlu0 %v975_v29  ;;  %v974_v38 = vmul.f32 0.0, %v1609_v35 }
 0x86c   : > { %v977_v36 = vpop.xlane.xlu0 %976 }
 0x86d   : > { %v978_v39 = vadd.f32 %v977_v36, %v974_v38 }
 0x86f   : > { %1610 = vrcp.f32 %v978_v39 }
 0x879   : > { %v1611_v43 = vpop.eup %1610 }
 0x8b1   : > { %v1048_v40 = vpop.f32.mrb[6].mxu0 }
 0x8b2   : > { %v1052_v41 = vadd.f32 %v1048_v40, %v974_v38  ;;  %v1471_v42 = vpop.f32.mrb[7].mxu0 }
 0x8b4   : > { %v1054_v44 = vmul.f32 %v1611_v43, %v1052_v41 }
 0x8b6   : > { %v1055_v45 = vpack.c.bf16 %v1054_v44, %v1054_v44 }
 0x8b8   : > { %1477 = vmatmul.mubr.msk.bf16.vlgmr.msra.gmra.mrb[4].mxu1 %vm384_vm1, %v1055_v45 }
 0x98b   : > { %v1095_v0 = vpop.f32.mrb[4].mxu1 }
 0x98c   : > { %v1102_v47 = vcombine.high %v1095_v0, %v1095_v0  ;;  %v1109_v48 = vrot.slane %v1095_v0, %v2257_v14  ;;  %v1478_v49 = vpop.f32.mrb[5].mxu1 }
 0x98d   : > { %v1098_v50 = vpop.f32.mrb[6].mxu1 }
 0x98e   : > { %v1116_v51 = vrot.slane %v1102_v47, %v2257_v14  ;;  %v1117_v52 = vcombine.high %v1109_v48, %v1109_v48  ;;  %v1124_v53 = vrot.slane %v1109_v48, %v2257_v14  ;;  %v1479_v54 = vpop.f32.mrb[7].mxu1 }
 0x990   : > { %v1131_v55 = vrot.slane %v1116_v51, %v2257_v14  ;;  %v1138_v56 = vrot.slane %v1117_v52, %v2257_v14  ;;  %v1139_v57 = vcombine.high %v1124_v53, %v1124_v53  ;;  %v1146_v59 = vpack.c.bf16 %v1124_v53, %v1124_v53 }
 0x992   : > { %v1140_v60 = vcombine.high %v1138_v56, %v1138_v56  ;;  %v1147_v61 = vpack.c.bf16 %v1138_v56, %v1138_v56  ;;  %v1148_v62 = vpack.c.bf16 %v1139_v57, %v1139_v57  ;;  %v1150_v63 = vpack.c.bf16 %v1131_v55, %v1131_v55 }
 0x993   : > { %v1152_v1 = vpack.i.b16 %v1146_v59, %v1146_v59 }
 0x994   : > { %v1149_v2 = vpack.c.bf16 %v1140_v60, %v1140_v60  ;;  %v1159_v3 = vpack.i.b16 %v1147_v61, %v1147_v61  ;;  %v1166_v58 = vpack.i.b16 %v1148_v62, %v1148_v62  ;;  %v1180_v4 = vpack.i.b16 %v1150_v63, %v1150_v63 }
 0x995   : > { %v1157_v5 = vrot.slane %v1152_v1, %v2263_v24 }
 0x996   : > { %v1171_v6 = vrot.slane %v1166_v58, %v2263_v24  ;;  %v1173_v7 = vpack.i.b16 %v1149_v2, %v1149_v2  ;;  %v1185_v8 = vrot.slane %v1180_v4, %v2263_v24  ;;  %v1164_v14 = vrot.slane %v1159_v3, %v2263_v24 }
 0x997   : > { %v1186_v10 = vadd.bf16 %v1157_v5, %v2280_v46 }
 0x998   : > { %v1187_v11 = vadd.bf16 %v1164_v14, %v2280_v46  ;;  %v1188_v12 = vadd.bf16 %v1171_v6, %v2280_v46  ;;  %v1178_v15 = vrot.slane %v1173_v7, %v2263_v24  ;;  %v1190_v16 = vadd.bf16 %v1185_v8, %v2280_v46 }
 0x999   : > { %1612 = vtanh.bf16 %v1186_v10 }
 0x99a   : > { %1614 = vtanh.bf16 %v1187_v11  ;;  %v1189_v17 = vadd.bf16 %v1178_v15, %v2280_v46 }
 0x99b   : > { %1616 = vtanh.bf16 %v1188_v12 }
 0x99c   : > { %1618 = vtanh.bf16 %v1189_v17 }
 0x99d   : > { %1620 = vtanh.bf16 %v1190_v16 }
 0x9a4   : > { %v1613_v18 = vpop.eup %1612 }
 0x9a5   : > { %v1615_v20 = vpop.eup %1614  ;;  %v1196_v21 = vunpack.c.l.bf16 %v1613_v18 }
 0x9a6   : > { %v1617_v22 = vpop.eup %1616  ;;  %v1197_v23 = vunpack.c.l.bf16 %v1615_v20 }
 0x9a7   : > { %v1619_v26 = vpop.eup %1618  ;;  %v1207_v27 = vmul.f32 %v1428_v19, %v1196_v21  ;;  %v1198_v28 = vunpack.c.l.bf16 %v1617_v22 }
 0x9a8   : > { %v1621_v29 = vpop.eup %1620  ;;  %v1208_v24 = vmul.f32 %v1428_v19, %v1197_v23  ;;  %v1199_v30 = vunpack.c.l.bf16 %v1619_v26 }
 0x9a9   : > { %v1212_v31 = vsel %vm384_vm1, %v1207_v27, 0.0  ;;  %v1209_v32 = vmul.f32 %v1428_v19, %v1198_v28  ;;  %v1200_v37 = vunpack.c.l.bf16 %v1621_v29 }
 0x9aa   : > { %1213 = vadd.xlane.f32.xlu1 %v1212_v31  ;;  %v1215_v46 = vsel %vm384_vm1, %v1208_v24, 0.0  ;;  %v1210_v33 = vmul.f32 %v1428_v19, %v1199_v30 }
 0x9ab   : > { %1216 = vadd.xlane.f32.xlu0 %v1215_v46  ;;  %v1218_v9 = vsel %vm384_vm1, %v1209_v32, 0.0  ;;  %v1211_v34 = vmul.f32 %v1428_v19, %v1200_v37 }
 0x9ac   : > { %v1221_v13 = vsel %vm384_vm1, %v1210_v33, 0.0 }
 0x9ad   : > { %v1224_v35 = vsel %vm384_vm1, %v1211_v34, 0.0 }
 0x9ae   : > { %1219 = vadd.xlane.f32.xlu1 %v1218_v9 }
 0x9af   : > { %1222 = vadd.xlane.f32.xlu0 %v1221_v13 }
 0x9b2   : > { %1225 = vadd.xlane.f32.xlu1 %v1224_v35 }
 0xa37   : > { %v1214_v36 = vpop.xlane.xlu1 %1213 }
 0xa38   : > { %v1217_v38 = vpop.xlane.xlu0 %1216  ;;  %v1235_v39 = vrot.slane %v1214_v36, %v2308_v25 }
 0xa39   : > { %v1239_v40 = vrot.slane %v1217_v38, %v2308_v25 }
 0xa3b   : > { %v1252_v41 = vsel %vm624_vm2, %v1239_v40, %v1235_v39  ;;  %v1220_v42 = vpop.xlane.xlu1 %1219 }
 0xa3c   : > { %v1243_v43 = vrot.slane %v1220_v42, %v2308_v25  ;;  %v1223_v44 = vpop.xlane.xlu0 %1222 }
 0xa3d   : > { %v1247_v45 = vrot.slane %v1223_v44, %v2308_v25 }
 0xa3e   : > { %v1253_v0 = vsel %vm626_vm3, %v1243_v43, %v1252_v41 }
 0xa3f   : > { %v1254_v47 = vsel %vm628_vm4, %v1247_v45, %v1253_v0  ;;  %v1226_v48 = vpop.xlane.xlu1 %1225 }
 0xa40   : > { %v1251_v49 = vrot.slane %v1226_v48, %v2308_v25 }
 0xa42   : > { %v1255_v50 = vsel %vm630_vm5, %v1251_v49, %v1254_v47 }
 0xa43   : > { %1257 = vst.msk [vmem:[%s362_s24] sm:$0x1f] %vm634_vm7, %v1255_v50 }
 0xa44   : > { %1817 = shalt.err (!%p1814_p9)
}
 0xa45   : > { %s1818_s26 = scalar_lea.hbm %s2418_s22, 128  ;;  %s1822_s27 = scalar_lea.hbm %s2471_s7, 256 }
 0xa46   : > { %p1819_p0 = scmp.ne.s32.totalorder %s2418_s22, %s1818_s26  ;;  %p1823_p1 = scmp.lt.u32.totalorder %s2418_s22, %s2471_s7 }
 0xa47   : > { %p1824_p6 = scmp.lt.u32.totalorder %s1822_s27, %s1818_s26  ;;  %p1826_p3 = scmp.lt.u32.totalorder %s1818_s26, %s2418_s22 }
 0xa48   : > { %p1820_p4 = pnand %p1819_p0, %p2501_p5 }
 0xa49   : > { %p1825_p2 = por %p1824_p6, %p1823_p1 }
 0xa4a   : > { %p1821_p12 = pneg %p1820_p4 }
 0xa4b   : > { %p1827_p7 = por %p1826_p3, %p1825_p2 }
 0xa4d   : > { %p1828_p13 = pnand %p1827_p7, %p1821_p12 }
 0xa4f   : > { %1831 = shalt.err (!%p1828_p13)
}
 0xa50   : > { %1500 = dma.vmem_to_hbm [thread:$0]  (%p2501_p5), %s2420_s19, 128, %s2418_s22, %s1259_s16  }
 0xa51 PF: > { %s1284_s4 = sand.u32 1, %s1876_s11   ;;  %p2502_p8 = scmp.ne.s32.totalorder %s2489_s21, 0 }
 0xa52   : > { %p2503_p10 = scmp.ge.s32.totalorder %s1888_s14, 2  ;;  %s1285_s30 = scalar_lea.sflag [#allocation6], %s1284_s4 }
 0xa54   : > { %p1523_p11 = pnand %p2503_p10, %p2502_p8 }
 0xa56   : > { %1871 = dma.done.wait (!%p1523_p11), %s1285_s30, 128  }
 0xa57   : > { %1873 = vsyncadd (!%p1523_p11), %s1285_s30, 4294967168  ;;  %p29_p9 = scmp.ge.s32.totalorder %s2104_s20, 4   ;;  %s2504_s11 = smov %s1880_s12 }
 0xa58   : > { %s2505_s12 = smov %s1884_s13  ;;  %s2506_s13 = smov %s2115_s15 }
 0xa59   : > { %s2507_s14 = smov %s2104_s20  ;;  %31 = sbr.rel (!%p29_p9) target bundleno = 22 (0x16), region = 118 }
 0xa60   :  { %1290 = vsyncpa [#allocation5], 1 }
 0xa61   :  { %1292 = vsyncpa [#allocation5 + $0x1], 1 }
 0xa62   :  { %1293 = vsyncpa [#allocation8], 1 }
 0xa63   :  { %1295 = vsyncpa [#allocation8 + $0x1], 1 }
 0xa64   :  { %1296 = vsyncpa [#allocation11], 1 }
 0xa65   :  { %1297 = vsyncpa [#allocation14], 1 }
 0xa66   :  { %1298 = vsyncpa [#allocation6], 1 }
 0xa67   :  { %1300 = vsyncpa [#allocation6 + $0x1], 1 }

// kernel: pointer_net_forward.4
= control target key start
LH: loop header
LB: loop body
LE: loop exit
PB: predicated region body
PF: predicated region fallthrough
CT: control target
= control target key end

     0   :  { %s3548_s0 = inlined_call_operand.hbm [shape: f32[2,5,16], index: 0, kind: input, shape index: {}]   ;;  %s3549_s1 = inlined_call_operand.hbm [shape: f32[2,2,32], index: 1, kind: input, shape index: {}]   ;;  %s3550_s2 = inlined_call_operand.hbm [shape: f32[2,2,32], index: 2, kind: input, shape index: {}]   ;;  %s3551_s3 = inlined_call_operand.hbm [shape: f32[16,128], index: 3, kind: input, shape index: {}]   ;;  %s3552_s4 = inlined_call_operand.hbm [shape: f32[32,128], index: 4, kind: input, shape index: {}]   ;;  %s3553_s5 = inlined_call_operand.hbm [shape: f32[1,128], index: 5, kind: input, shape index: {}]   ;;  %s3554_s6 = inlined_call_operand.hbm [shape: f32[32,128], index: 6, kind: input, shape index: {}]   ;;  %s3555_s7 = inlined_call_operand.hbm [shape: f32[32,128], index: 7, kind: input, shape index: {}]   ;;  %s3556_s8 = inlined_call_operand.hbm [shape: f32[1,128], index: 8, kind: input, shape index: {}]   ;;  %s3557_s9 = inlined_call_operand.hbm [shape: f32[2,5,32], index: 9, kind: output, shape index: {}]  }
   0x1   :  { %3584 = sst [smem:[#allocation34_spill]] %s3549_s1 }
   0x2   :  { %3585 = sst [smem:[#allocation35_spill]] %s3551_s3 }
   0x3   :  { %3586 = sst [smem:[#allocation36_spill]] %s3553_s5 }
   0x4   :  { %3587 = sst [smem:[#allocation37_spill]] %s3555_s7 }
   0x5   :  { %3588 = sst [smem:[#allocation38_spill]] %s3557_s9 }
   0x6   :  { %14 = vsyncpa [#allocation7], 0 }
   0x7   :  { %16 = vsyncpa [#allocation7 + $0x1], 0 }
   0x8   :  { %17 = vsyncpa [#allocation10], 0 }
   0x9   :  { %19 = vsyncpa [#allocation10 + $0x1], 0 }
   0xa   :  { %20 = vsyncpa [#allocation13], 0 }
   0xb   :  { %21 = vsyncpa [#allocation16], 0 }
   0xc   :  { %22 = vsyncpa [#allocation19], 0 }
   0xd   :  { %23 = vsyncpa [#allocation8], 0 }
   0xe   :  { %25 = vsyncpa [#allocation8 + $0x1], 0  ;;  %s2938_s30 = smov 0   ;;  %s2940_s10 = smov 0  }
   0xf   :  { %s2942_s11 = smov 0   ;;  %s2944_s12 = smov 0  }
  0x10 LB: > { %3589 = sst [smem:[#allocation28_spill]] %s2856_s30  ;;  %s2870_s13 = smov [#allocation12]   ;;  %s2868_s12 = sphi %s2944_s12, %s3632_s12   ;;  %s2864_s11 = sphi %s2942_s11, %s3634_s11   ;;  %s2860_s10 = sphi %s2940_s10, %s3636_s10   ;;  %s2856_s30 = sphi %s2938_s30, %s3635_s30  }
  0x11   : > { %3590 = sst [smem:[#allocation29_spill]] %s2864_s11  ;;  %s278_s14 = sshll.u32 %s2870_s13, 4  ;;  %s2964_s14 = int_to_ptr.vmem [resolvable:$true] %s278_s14 }
  0x12   : > { %s2959_s15 = sadd.s32 4294967295, %s2868_s12   ;;  %p2021_p0 = scmp.ge.s32.totalorder %s2868_s12, 1 }
  0x13   : > { %p3566_p1 = scmp.eq.s32.totalorder %s2959_s15, 0  ;;  %p266_p2 = scmp.lt.s32.totalorder %s2868_s12, 3 }
  0x14   : > { %s2871_s17 = smov [#allocation15]   ;;  %s2872_s20 = smov [#allocation18]  }
  0x15   : > { %p2966_p3 = pnand %p2021_p0, %p266_p2  ;;  %s305_s18 = sshll.u32 %s2871_s17, 4  ;;  %s2979_s18 = int_to_ptr.vmem [resolvable:$true] %s305_s18 }
  0x16   : > { %s328_s21 = sshll.u32 %s2872_s20, 4  ;;  %s3593_s3 = sld [smem:[#allocation35_spill]]  ;;  %s2981_s21 = int_to_ptr.vmem [resolvable:$true] %s328_s21 }
  0x17   : > { %s3591_s16 = scalar_select %p2966_p3, 1, 0 }
  0x18   : > { %p2355_p5 = pneg %p2966_p3 }
  0x1a   : > { %p2975_p6 = pnand %p2355_p5, %p3566_p1 }
  0x1c   : > { %s3592_s19 = scalar_select %p2975_p6, 1, 0 }
  0x1d   : > { %s2528_s24 = scalar_lea.hbm %s3593_s3, 256  ;;  %p2991_p8 = pneg %p2975_p6 }
  0x1e   : > { %p2529_p7 = scmp.ne.s32.totalorder %s3593_s3, %s2528_s24  ;;  %p2535_p11 = scmp.lt.u32.totalorder %s2528_s24, %s3593_s3 }
  0x1f   : > { %s3594_s27 = scalar_select %p2991_p8, 1, 0 }
  0x20   : > { %p2531_p9 = pnand %p2991_p8, %p2529_p7 }
  0x22   : > { %p2532_p10 = pneg %p2531_p9 }
  0x24   : > { %p2537_p12 = pnand %p2535_p11, %p2532_p10 }
  0x26   : > { %2540 = shalt.err (!%p2537_p12)
}
  0x27   : > { %s2541_s13 = scalar_lea.vmem %s2964_s14, 256  ;;  %p2549_p5 = scmp.lt.s32.totalorder %s2964_s14, %s2964_s14 }
  0x28   : > { %p2542_p13 = scmp.ne.s32.totalorder %s2964_s14, %s2541_s13  ;;  %p2550_p4 = scmp.lt.s32.totalorder %s2541_s13, %s2541_s13 }
  0x2a   : > { %p2544_p0 = pnand %p2542_p13, %p2991_p8  ;;  %p2551_p7 = por %p2550_p4, %p2549_p5 }
  0x2c   : > { %p2545_p2 = pneg %p2544_p0 }
  0x2e   : > { %p2552_p9 = pnand %p2551_p7, %p2545_p2 }
  0x30   : > { %2555 = shalt.err (!%p2552_p9)
}
  0x31   : > { %s3560_s17 = smov 128   ;;  %s3562_s20 = smov 8  }
  0x32   : > { %2358 = dma.hbm_to_vmem [thread:$0]  (!%p2975_p6), %s3593_s3, 256, %s2964_s14, [#allocation13], %s3560_s17, %s3560_s17, %s3562_s20  }
  0x33   : > { %s3595_s5 = sld [smem:[#allocation36_spill]] }
  0x39   : > { %s2556_s26 = scalar_lea.hbm %s3595_s5, 16 }
  0x3a   : > { %p2557_p4 = scmp.ne.s32.totalorder %s3595_s5, %s2556_s26  ;;  %p2563_p12 = scmp.lt.u32.totalorder %s2556_s26, %s3595_s5 }
  0x3c   : > { %p2559_p10 = pnand %p2557_p4, %p2991_p8 }
  0x3e   : > { %p2560_p11 = pneg %p2559_p10 }
  0x40   : > { %p2565_p13 = pnand %p2563_p12, %p2560_p11 }
  0x42   : > { %2568 = shalt.err (!%p2565_p13)
}
  0x43   : > { %s2569_s14 = scalar_lea.vmem %s2979_s18, 16  ;;  %s2576_s22 = scalar_lea.vmem %s2979_s18, 32 }
  0x44   : > { %p2570_p0 = scmp.ne.s32.totalorder %s2979_s18, %s2569_s14  ;;  %p2577_p7 = scmp.lt.s32.totalorder %s2979_s18, %s2979_s18 }
  0x45   : > { %p2578_p9 = scmp.lt.s32.totalorder %s2576_s22, %s2569_s14 }
  0x46   : > { %p2572_p2 = pnand %p2570_p0, %p2991_p8 }
  0x47   : > { %p2579_p4 = por %p2578_p9, %p2577_p7 }
  0x48   : > { %p2573_p5 = pneg %p2572_p2 }
  0x4a   : > { %p2580_p10 = pnand %p2579_p4, %p2573_p5 }
  0x4c   : > { %2583 = shalt.err (!%p2580_p10)
}
  0x4d   : > { %2364 = dma.hbm_to_vmem [thread:$0]  (!%p2975_p6), %s3595_s5, 16, %s2979_s18, [#allocation16]  }
  0x4e   : > { %s3596_s7 = sld [smem:[#allocation37_spill]] }
  0x54   : > { %s2584_s26 = scalar_lea.hbm %s3596_s7, 512 }
  0x55   : > { %p2585_p11 = scmp.ne.s32.totalorder %s3596_s7, %s2584_s26  ;;  %p2591_p0 = scmp.lt.u32.totalorder %s2584_s26, %s3596_s7 }
  0x57   : > { %p2587_p12 = pnand %p2585_p11, %p2991_p8 }
  0x59   : > { %p2588_p13 = pneg %p2587_p12 }
  0x5b   : > { %p2593_p2 = pnand %p2591_p0, %p2588_p13 }
  0x5d   : > { %2596 = shalt.err (!%p2593_p2)
}
  0x5e   : > { %s2597_s18 = scalar_lea.vmem %s2981_s21, 512  ;;  %p2605_p4 = scmp.lt.s32.totalorder %s2981_s21, %s2981_s21 }
  0x5f   : > { %p2598_p5 = scmp.ne.s32.totalorder %s2981_s21, %s2597_s18  ;;  %p2606_p10 = scmp.lt.s32.totalorder %s2597_s18, %s2597_s18 }
  0x61   : > { %p2600_p7 = pnand %p2598_p5, %p2991_p8  ;;  %p2607_p11 = por %p2606_p10, %p2605_p4 }
  0x63   : > { %p2601_p9 = pneg %p2600_p7 }
  0x65   : > { %p2608_p12 = pnand %p2607_p11, %p2601_p9 }
  0x67   : > { %2611 = shalt.err (!%p2608_p12)
}
  0x68   : > { %2370 = dma.hbm_to_vmem [thread:$0]  (!%p2975_p6), %s3596_s7, 512, %s2981_s21, [#allocation19], %s3560_s17, %s3560_s17, %s3562_s20  }
  0x69   : > { %s2020_s23 = sadd.s32 4294967294, %s2868_s12   ;;  %s3067_s24 = sadd.s32 1, %s2868_s12  }
  0x6a   : > { %3597 = sst [smem:[#allocation30_spill]] %s3067_s24  ;;  %s38_s25 = sadd.s32 1, %s2864_s11 }
  0x6b   : > { %s35_s26 = ssub.s32 %s2868_s12, %s3067_s24  ;;  %p45_p13 = scmp.ne.s32.totalorder %s2864_s11, %s2860_s10 }
  0x6c   : > { %p36_p0 = scmp.eq.s32.totalorder %s35_s26, 0  ;;  %p46_p2 = scmp.eq.s32.totalorder %s2868_s12, 0 }
  0x6d   : > { %p51_p5 = scmp.ne.s32.totalorder %s2860_s10, %s2856_s30  ;;  %p253_p7 = scmp.eq.s32.totalorder %s2959_s15, 1 }
  0x6e   : > { %s3079_s28 = scalar_select %p36_p0, %s2864_s11, %s38_s25  }
  0x6f   : > { %p47_p9 = por %p46_p2, %p45_p13  ;;  %p3083_p4 = por %p3566_p1, %p51_p5 }
  0x70   : > { %3598 = sst [smem:[#allocation31_spill]] %s3079_s28  ;;  %p3087_p10 = por %p253_p7, %p45_p13 }
  0x71   : > { %s3599_s21 = scalar_select %p3083_p4, 1, 0 }
  0x72   : > { %s3600_s29 = scalar_select %p3087_p10, 1, 0 }
  0x73   : > { %p259_p11 = scmp.eq.s32.totalorder %s2020_s23, 1  ;;  %p2394_p12 = scmp.lt.s32.totalorder %s2868_s12, 2 }
  0x74   : > { %3601 = sst [smem:[#allocation32_spill]] %s3600_s29  ;;  %s3093_s13 = sand.u32 1, %s2864_s11  }
  0x75   : > { %p3095_p3 = por %p259_p11, %p51_p5  ;;  %s371_s18 = sand.u32 1, %s2868_s12  }
  0x76   : > { %p3100_p0 = pnand %p2394_p12, %p47_p9  ;;  %s3564_s9 = sshll.u32 %s3093_s13, 1 }
  0x77   : > { %s3602_s14 = scalar_select %p3095_p3, 1, 0 }
  0x78   : > { %s3604_s22 = scalar_select %p3100_p0, 1, 0 }
  0x79   : > { %3603 = sst [smem:[#allocation33_spill]] %s3602_s14  ;;  %s3565_s25 = sshll.u32 %s2868_s12, 5 }
  0x7a   : > { %s3605_s1 = sld [smem:[#allocation34_spill]]  ;;  %s375_s20 = scalar_lea.vmem [#allocation9], %s3564_s9 }
  0x7b   : > { %s382_s3 = sshll.u32 %s375_s20, 4  ;;  %s3117_s5 = scalar_lea.sflag [#allocation10], %s371_s18  ;;  %s3115_s3 = int_to_ptr.vmem [resolvable:$true] %s382_s3 }
  0x7c   : > { %p3123_p2 = pneg %p3100_p0 }
  0x7e   : > { %s3606_s28 = scalar_select %p3123_p2, 1, 0 }
  0x80   : > { %s3111_s17 = scalar_lea.hbm %s3605_s1, %s3565_s25  ;;  %s2617_s9 = scalar_lea.hbm %s3605_s1, 64 }
  0x81   : > { %s2612_s7 = scalar_lea.hbm %s3111_s17, 32  ;;  %p2618_p9 = scmp.lt.u32.totalorder %s3111_s17, %s3605_s1 }
  0x82   : > { %p2613_p13 = scmp.ne.s32.totalorder %s3111_s17, %s2612_s7  ;;  %p2619_p11 = scmp.lt.u32.totalorder %s2617_s9, %s2612_s7 }
  0x83   : > { %p2621_p1 = scmp.lt.u32.totalorder %s2612_s7, %s3111_s17 }
  0x84   : > { %p2615_p5 = pnand %p3123_p2, %p2613_p13  ;;  %p2620_p12 = por %p2619_p11, %p2618_p9 }
  0x86   : > { %p2616_p7 = pneg %p2615_p5  ;;  %p2622_p3 = por %p2621_p1, %p2620_p12 }
  0x88   : > { %p2623_p10 = pnand %p2622_p3, %p2616_p7 }
  0x8a   : > { %2626 = shalt.err (!%p2623_p10)
}
  0x8b   : > { %s2627_s18 = scalar_lea.vmem %s3115_s3, 32  ;;  %s2875_s26 = smov [#allocation9]  }
  0x8c   : > { %p2628_p13 = scmp.ne.s32.totalorder %s3115_s3, %s2627_s18  ;;  %s2632_s23 = sshll.u32 %s2875_s26, 4  ;;  %s2633_s23 = int_to_ptr.vmem [resolvable:$false] %s2632_s23 }
  0x8d   : > { %s2634_s25 = scalar_lea.vmem %s2633_s23, 64  ;;  %p2635_p6 = scmp.lt.s32.totalorder %s3115_s3, %s2633_s23 }
  0x8e   : > { %p2630_p5 = pnand %p2628_p13, %p3123_p2  ;;  %p2636_p8 = scmp.lt.s32.totalorder %s2634_s25, %s2627_s18 }
  0x90   : > { %p2631_p4 = pneg %p2630_p5  ;;  %p2637_p9 = por %p2636_p8, %p2635_p6 }
  0x92   : > { %p2638_p11 = pnand %p2637_p9, %p2631_p4 }
  0x94   : > { %2641 = shalt.err (!%p2638_p11)
}
  0x95   : > { %2380 = dma.hbm_to_vmem [thread:$0]  (!%p3100_p0), %s3111_s17, 32, %s3115_s3, %s3117_s5  }
  0x96   : > { %s3607_s7 = sshll.u32 %s2868_s12, 5  ;;  %s2876_s1 = smov [#allocation14]  }
  0x97   : > { %s3152_s26 = scalar_lea.hbm %s3550_s2, %s3607_s7  ;;  %s291_s23 = sshll.u32 %s2876_s1, 4  ;;  %s292_s23 = int_to_ptr.vmem [resolvable:$true] %s291_s23 }
  0x98   : > { %s2877_s18 = smov [#allocation17]   ;;  %s2642_s14 = scalar_lea.hbm %s3552_s4, 512 }
  0x99   : > { %s315_s25 = sshll.u32 %s2877_s18, 4  ;;  %p2643_p1 = scmp.ne.s32.totalorder %s3552_s4, %s2642_s14  ;;  %s316_s25 = int_to_ptr.vmem [resolvable:$true] %s315_s25 }
  0x9a   : > { %p3608_p3 = scmp.ne.s32.totalorder %s3594_s27, 0  ;;  %p2649_p4 = scmp.lt.u32.totalorder %s2642_s14, %s3552_s4 }
  0x9c   : > { %p2645_p6 = pnand %p2643_p1, %p3608_p3 }
  0x9e   : > { %p2646_p8 = pneg %p2645_p6 }
  0xa0   : > { %p2651_p10 = pnand %p2649_p4, %p2646_p8 }
  0xa2   : > { %2654 = shalt.err (!%p2651_p10)
}
  0xa3   : > { %s2655_s1 = scalar_lea.vmem %s292_s23, 512  ;;  %p2663_p5 = scmp.lt.s32.totalorder %s292_s23, %s292_s23 }
  0xa4   : > { %p2656_p7 = scmp.ne.s32.totalorder %s292_s23, %s2655_s1  ;;  %p2664_p9 = scmp.lt.s32.totalorder %s2655_s1, %s2655_s1 }
  0xa6   : > { %p2658_p12 = pnand %p2656_p7, %p3608_p3  ;;  %p2665_p11 = por %p2664_p9, %p2663_p5 }
  0xa8   : > { %p2659_p13 = pneg %p2658_p12 }
  0xaa   : > { %p2666_p0 = pnand %p2665_p11, %p2659_p13 }
  0xac   : > { %2669 = shalt.err (!%p2666_p0)
}
  0xad   : > { %p3609_p1 = scmp.ne.s32.totalorder %s3592_s19, 0  ;;  %s3610_s30 = smov 8  }
  0xae   : > { %s3611_s11 = smov 128   ;;  %s2670_s9 = scalar_lea.hbm %s3554_s6, 512 }
  0xaf   : > { %2361 = dma.hbm_to_vmem [thread:$0]  (!%p3609_p1), %s3552_s4, 512, %s292_s23, [#allocation13], %s3611_s11, %s3611_s11, %s3610_s30  }
  0xb0   : > { %p2671_p6 = scmp.ne.s32.totalorder %s3554_s6, %s2670_s9  ;;  %p2677_p4 = scmp.lt.u32.totalorder %s2670_s9, %s3554_s6 }
  0xb2   : > { %p2673_p0 = pnand %p2671_p6, %p3608_p3 }
  0xb4   : > { %p2674_p8 = pneg %p2673_p0 }
  0xb6   : > { %p2679_p10 = pnand %p2677_p4, %p2674_p8 }
  0xb8   : > { %2682 = shalt.err (!%p2679_p10)
}
  0xb9   : > { %s2683_s1 = scalar_lea.vmem %s316_s25, 512  ;;  %p2691_p5 = scmp.lt.s32.totalorder %s316_s25, %s316_s25 }
  0xba   : > { %p2684_p7 = scmp.ne.s32.totalorder %s316_s25, %s2683_s1  ;;  %p2692_p9 = scmp.lt.s32.totalorder %s2683_s1, %s2683_s1 }
  0xbc   : > { %p2686_p12 = pnand %p2684_p7, %p3608_p3  ;;  %p2693_p11 = por %p2692_p9, %p2691_p5 }
  0xbe   : > { %p2687_p13 = pneg %p2686_p12 }
  0xc0   : > { %p2694_p2 = pnand %p2693_p11, %p2687_p13 }
  0xc2   : > { %2697 = shalt.err (!%p2694_p2)
}
  0xc3   : > { %2367 = dma.hbm_to_vmem [thread:$0]  (!%p3609_p1), %s3554_s6, 512, %s316_s25, [#allocation16], %s3611_s11, %s3611_s11, %s3610_s30  }
  0xc4   : > { %s2878_s29 = smov [#allocation20]   ;;  %s2029_s7 = sshll.u32 %s3093_s13, 3 }
  0xc5   : > { %s342_s14 = sshll.u32 %s2878_s29, 4  ;;  %s2698_s18 = scalar_lea.hbm %s3556_s8, 16  ;;  %s343_s14 = int_to_ptr.vmem [resolvable:$true] %s342_s14 }
  0xc6   : > { %p2699_p2 = scmp.ne.s32.totalorder %s3556_s8, %s2698_s18  ;;  %p2705_p8 = scmp.lt.u32.totalorder %s2698_s18, %s3556_s8 }
  0xc8   : > { %p2701_p6 = pnand %p2699_p2, %p3608_p3 }
  0xca   : > { %p2702_p0 = pneg %p2701_p6 }
  0xcc   : > { %p2707_p4 = pnand %p2705_p8, %p2702_p0 }
  0xce   : > { %2710 = shalt.err (!%p2707_p4)
}
  0xcf   : > { %s2711_s25 = scalar_lea.vmem %s343_s14, 16  ;;  %s2718_s30 = scalar_lea.vmem %s343_s14, 32 }
  0xd0   : > { %p2712_p10 = scmp.ne.s32.totalorder %s343_s14, %s2711_s25  ;;  %p2719_p13 = scmp.lt.s32.totalorder %s343_s14, %s343_s14 }
  0xd1   : > { %p2720_p5 = scmp.lt.s32.totalorder %s2718_s30, %s2711_s25 }
  0xd2   : > { %p2714_p7 = pnand %p2712_p10, %p3608_p3 }
  0xd3   : > { %p2721_p9 = por %p2720_p5, %p2719_p13 }
  0xd4   : > { %p2715_p12 = pneg %p2714_p7 }
  0xd6   : > { %p2722_p11 = pnand %p2721_p9, %p2715_p12 }
  0xd8   : > { %2725 = shalt.err (!%p2722_p11)
}
  0xd9   : > { %2373 = dma.hbm_to_vmem [thread:$0]  (!%p3609_p1), %s3556_s8, 16, %s343_s14, [#allocation19]  }
  0xda   : > { %s2030_s29 = sshll.u32 %s2868_s12, 7  ;;  %s357_s18 = scalar_lea.vmem [#allocation6], %s2029_s7 }
  0xdb   : > { %s3219_s20 = scalar_lea.hbm %s3548_s0, %s2030_s29  ;;  %s364_s19 = sshll.u32 %s357_s18, 4  ;;  %s3221_s19 = int_to_ptr.vmem [resolvable:$true] %s364_s19 }
  0xdc   : > { %s3612_s3 = sshll.u32 %s3093_s13, 1  ;;  %s354_s14 = scalar_lea.sflag [#allocation7], %s3093_s13 }
  0xdd   : > { %s3225_s17 = scalar_lea.vmem [#allocation11], %s3612_s3  ;;  %s2726_s23 = scalar_lea.hbm %s3219_s20, 128 }
  0xde   : > { %s400_s1 = sshll.u32 %s3225_s17, 4  ;;  %p2727_p3 = scmp.ne.s32.totalorder %s3219_s20, %s2726_s23  ;;  %s401_s1 = int_to_ptr.vmem [resolvable:$true] %s400_s1 }
  0xdf   : > { %p3613_p1 = scmp.ne.s32.totalorder %s3606_s28, 0  ;;  %s2731_s11 = scalar_lea.hbm %s3548_s0, 256 }
  0xe0   : > { %p2732_p0 = scmp.lt.u32.totalorder %s3219_s20, %s3548_s0  ;;  %p2733_p8 = scmp.lt.u32.totalorder %s2731_s11, %s2726_s23 }
  0xe1   : > { %p2729_p2 = pnand %p2727_p3, %p3613_p1  ;;  %p2735_p10 = scmp.lt.u32.totalorder %s2726_s23, %s3219_s20 }
  0xe2   : > { %p2734_p4 = por %p2733_p8, %p2732_p0 }
  0xe3   : > { %p2730_p6 = pneg %p2729_p2 }
  0xe4   : > { %p2736_p7 = por %p2735_p10, %p2734_p4 }
  0xe6   : > { %p2737_p12 = pnand %p2736_p7, %p2730_p6 }
  0xe8   : > { %2740 = shalt.err (!%p2737_p12)
}
  0xe9   : > { %s2741_s13 = scalar_lea.vmem %s3221_s19, 128  ;;  %s2879_s29 = smov [#allocation6]  }
  0xea   : > { %p2742_p13 = scmp.ne.s32.totalorder %s3221_s19, %s2741_s13  ;;  %s2746_s27 = sshll.u32 %s2879_s29, 4  ;;  %s2747_s27 = int_to_ptr.vmem [resolvable:$false] %s2746_s27 }
  0xeb   : > { %s2748_s9 = scalar_lea.vmem %s2747_s27, 256  ;;  %p2749_p11 = scmp.lt.s32.totalorder %s3221_s19, %s2747_s27 }
  0xec   : > { %p2744_p5 = pnand %p2742_p13, %p3613_p1  ;;  %p2750_p3 = scmp.lt.s32.totalorder %s2748_s9, %s2741_s13 }
  0xee   : > { %p2745_p9 = pneg %p2744_p5  ;;  %p2751_p2 = por %p2750_p3, %p2749_p11 }
  0xf0   : > { %p2752_p0 = pnand %p2751_p2, %p2745_p9 }
  0xf2   : > { %2755 = shalt.err (!%p2752_p0)
}
  0xf3   : > { %p3614_p6 = scmp.ne.s32.totalorder %s3604_s22, 0  ;;  %s2756_s18 = scalar_lea.hbm %s3152_s26, 32 }
  0xf4   : > { %p2757_p8 = scmp.ne.s32.totalorder %s3152_s26, %s2756_s18  ;;  %s2761_s25 = scalar_lea.hbm %s3550_s2, 64 }
  0xf5   : > { %2377 = dma.hbm_to_vmem [thread:$0]  (!%p3614_p6), %s3219_s20, 128, %s3221_s19, %s354_s14  }
  0xf6   : > { %p2759_p4 = pnand %p2757_p8, %p3613_p1  ;;  %p2762_p7 = scmp.lt.u32.totalorder %s3152_s26, %s3550_s2 }
  0xf7   : > { %p2763_p12 = scmp.lt.u32.totalorder %s2761_s25, %s2756_s18  ;;  %p2765_p5 = scmp.lt.u32.totalorder %s2756_s18, %s3152_s26 }
  0xf8   : > { %p2760_p10 = pneg %p2759_p4 }
  0xf9   : > { %p2764_p13 = por %p2763_p12, %p2762_p7 }
  0xfb   : > { %p2766_p9 = por %p2765_p5, %p2764_p13 }
  0xfd   : > { %p2767_p11 = pnand %p2766_p9, %p2760_p10 }
  0xff   : > { %2770 = shalt.err (!%p2767_p11)
}
 0x100   : > { %s2771_s20 = scalar_lea.vmem %s401_s1, 32  ;;  %s2880_s19 = smov [#allocation11]  }
 0x101   : > { %p2772_p3 = scmp.ne.s32.totalorder %s401_s1, %s2771_s20  ;;  %s2776_s17 = sshll.u32 %s2880_s19, 4  ;;  %s2777_s17 = int_to_ptr.vmem [resolvable:$false] %s2776_s17 }
 0x102   : > { %s2778_s14 = scalar_lea.vmem %s2777_s17, 64  ;;  %p2779_p8 = scmp.lt.s32.totalorder %s401_s1, %s2777_s17 }
 0x103   : > { %p2774_p2 = pnand %p2772_p3, %p3613_p1  ;;  %p2780_p4 = scmp.lt.s32.totalorder %s2778_s14, %s2771_s20 }
 0x105   : > { %p2775_p0 = pneg %p2774_p2  ;;  %p2781_p6 = por %p2780_p4, %p2779_p8 }
 0x107   : > { %p2782_p7 = pnand %p2781_p6, %p2775_p0 }
 0x109   : > { %2785 = shalt.err (!%p2782_p7)
}
 0x10a   : > { %p3615_p12 = scmp.ne.s32.totalorder %s3604_s22, 0  ;;  %p3616_p10 = scmp.ne.s32.totalorder %s3591_s16, 0 }
 0x10b   : > { %s3273_s28 = sand.u32 (!%p3616_p10), 1, %s2860_s10   ;;  %p3617_p1 = scmp.ne.s32.totalorder (!%p3616_p10), %s3599_s21, 0 }
 0x10c   : > { %2383 = dma.hbm_to_vmem [thread:$0]  (!%p3615_p12), %s3152_s26, 32, %s401_s1, %s3117_s5  }
 0x10d   : > { %409 = sbr.rel (%p3616_p10) target bundleno = 7423 (0x1cff), region = 56  ;;  %s2036_s24 = sshll.u32 (!%p3616_p10), %s3273_s28, 3 }
 0x10e   : > { %s412_s7 = scalar_lea.sflag (!%p3616_p10), [#allocation7], %s3273_s28  ;;  %s415_s13 = scalar_lea.vmem (!%p3616_p10), [#allocation6], %s2036_s24 }
 0x114   : > { %2831 = dma.done.wait (%p3617_p1), %s412_s7, 128  }
 0x115   : > { %2833 = vsyncadd (%p3617_p1), %s412_s7, 4294967168  ;;  %s420_s5 = sand.u32 1, %s2959_s15   ;;  %s2037_s16 = sshll.u32 %s3273_s28, 1 }
 0x116   : > { %s421_s22 = scalar_lea.sflag [#allocation10], %s420_s5  ;;  %s424_s26 = scalar_lea.vmem [#allocation9], %s2037_s16 }
 0x117   : > { %2835 = dma.done.wait (%p3617_p1), %s421_s22, 64  }
 0x118   : > { %2837 = vsyncadd (%p3617_p1), %s421_s22, 4294967232  ;;  %s3289_s1 = scalar_lea.vmem [#allocation11], %s2037_s16  ;;  %p3618_p6 = scmp.eq.s32.totalorder %s2959_s15, 0 }
 0x11a   : > { %2839 = dma.done.wait (%p3618_p6), [#allocation13], 768   ;;  %p3619_p13 = pmov %p3618_p6 }
 0x11b   : > { %p3620_p5 = pmov %p3618_p6 }
 0x11c   : > { %2841 = vsyncadd (%p3619_p13), [#allocation13], 4294966528 }
 0x11d   : > { %2843 = dma.done.wait (%p3620_p5), [#allocation16], 528   ;;  %p3621_p9 = pmov %p3620_p5 }
 0x11e   : > { %p3622_p11 = pmov %p3620_p5 }
 0x11f   : > { %2845 = vsyncadd (%p3621_p9), [#allocation16], 4294966768 }
 0x120   : > { %2847 = dma.done.wait (%p3622_p11), [#allocation19], 528   ;;  %p3623_p3 = pmov %p3620_p5 }
 0x121   : > { %v2881_v0 = vmov 0.0   ;;  %vm2882_vm0 = vmmov 0   ;;  %v2883_v1 = vmov 0.0|0.0   ;;  %v505_v2 = vld [vmem:[#allocation12] sm:$0xff]  ;;  %v506_v3 = vld [vmem:[#allocation12 + $0x8] sm:$0xff]  ;;  %vm566_vm1 = vcmask 253952  }
 0x122   : > { %2849 = vsyncadd (%p3623_p3), [#allocation19], 4294966768  ;;  %2139 = vmatprep.subr.bf16.mxu0 %v2881_v0  ;;  %2141 = vmatprep.mubr.msk.bf16.mxu0 %vm2882_vm0, %v2881_v0  ;;  %v512_v4 = vld [vmem:[%s415_s13] sm:$0x1f]  ;;  %v514_v5 = vpack.c.bf16 %v506_v3, %v505_v2  ;;  %v508_v7 = vld [vmem:[#allocation14 + $0x8] sm:$0xff]  ;;  %vm521_vm2 = vcmask 130048  }
 0x123   : > { %2263 = vmatprep.subr.bf16.mxu1 %v2883_v1  ;;  %2153 = vmatprep.mubr.msk.f32.mxu1 %vm2882_vm0, %v2881_v0  ;;  %v507_v6 = vld [vmem:[#allocation14] sm:$0xff]  ;;  %v509_v8 = vld [vmem:[#allocation14 + $0x10] sm:$0xff]  ;;  %v513_v9 = vpack.c.bf16 %v512_v4, %v512_v4  ;;  %v510_v11 = vld [vmem:[#allocation14 + $0x18] sm:$0xff]  ;;  %vm571_vm3 = vcmask 261120   ;;  %s2884_s21 = smov 64   ;;  %s2885_s29 = smov 32  }
 0x124   : > { %v3309_v10 = vpack.c.bf16 %v508_v7, %v507_v6  ;;  %v3311_v12 = vld [vmem:[%s424_s26] sm:$0x3]  ;;  %2140 = vmatpush3.bf16.msra.mxu0 %v514_v5  ;;  %v3316_v13 = vpack.c.bf16 %v510_v11, %v509_v8  ;;  %v3336_v15 = vld [vmem:[%s3289_s1] sm:$0x3]  ;;  %v2046_v16 = vld [vmem:[#allocation15] ss:$0 sm:$0xff] }
 0x125   : > { %567 = vst.msk [vmem:[#allocation4] sm:$0x1] %vm566_vm1, %v3311_v12  ;;  %2269 = vmatprep.subr.bf16.mxu0 %v2883_v1  ;;  %568 = vst.msk [vmem:[#allocation5] sm:$0x1] %vm566_vm1, %v3336_v15  ;;  %s2886_s27 = smov 96   ;;  %vm1233_vm4 = vcmask 254977  }
 0x126   : > { %2265 = vmatpush3.bf16.msra.mxu1 %v3309_v10  ;;  %s3442_s9 = scalar_lea.vmem [#allocation21], %s2036_s24  ;;  %s3624_s18 = sld [smem:[#allocation32_spill]] }
 0x127   : > { %2266 = vmatprep.subr.bf16.mxu1 %v2883_v1  ;;  %2142 = vmatmul.mubr.msk.bf16.vlgmr.msra.gmra.mrb[0].mxu0 %vm521_vm2, %v513_v9  ;;  %s2081_s3 = sshll.u32 %s2959_s15, 7  ;;  %s1850_s23 = sshll.u32 %s3442_s9, 4  ;;  %s3503_s23 = int_to_ptr.vmem [resolvable:$true] %s1850_s23 }
 0x128   : > { %2271 = vmatpush3.bf16.msra.mxu0 %v3309_v10  ;;  %2164 = vmatprep.mubr.msk.f32.mxu0 %vm2882_vm0, %v2881_v0  ;;  %s3625_s11 = sld [smem:[#allocation38_spill]]  ;;  %s1837_s17 = scalar_lea.sflag [#allocation8], %s3273_s28 }
 0x129   : > { %2272 = vmatprep.subr.bf16.mxu0 %v2883_v1  ;;  %s2786_s14 = scalar_lea.vmem %s3503_s23, 128  ;;  %s2887_s15 = smov [#allocation21]  }
 0x12a   : > { %2268 = vmatpush3.bf16.msra.mxu1 %v3316_v13  ;;  %p2787_p2 = scmp.ne.s32.totalorder %s3503_s23, %s2786_s14  ;;  %s2790_s24 = sshll.u32 %s2887_s15, 4  ;;  %s2791_s24 = int_to_ptr.vmem [resolvable:$false] %s2790_s24 }
 0x12b   : > { %2275 = vmatprep.subr.bf16.mxu1 %v2883_v1  ;;  %s2792_s7 = scalar_lea.vmem %s2791_s24, 256  ;;  %p2793_p7 = scmp.lt.s32.totalorder %s3503_s23, %s2791_s24 }
 0x12c   : > { %v570_v14 = vld [vmem:[#allocation4] sm:$0x1]  ;;  %2274 = vmatpush3.bf16.msra.mxu0 %v3316_v13  ;;  %v2050_v27 = vld [vmem:[#allocation5] ss:$0 sm:$0xff]  ;;  %p3627_p0 = scmp.ne.s32.totalorder %s3624_s18, 0  ;;  %p2794_p12 = scmp.lt.s32.totalorder %s2792_s7, %s2786_s14 }
 0x12d   : > { %2154 = vmatmul.mubr.msk.f32.vlgmr.msra.gmra.mrb[0].mxu1 %vm571_vm3, %v570_v14  ;;  %2281 = vmatprep.subr.bf16.mxu0 %v2883_v1 }
 0x12e   : > { %2277 = vmatpush3.bf16.msra.mxu1 %v3309_v10  ;;  %2175 = vmatprep.mubr.msk.f32.mxu1 %vm2882_vm0, %v2881_v0  ;;  %s3626_s20 = smov %s3625_s11  ;;  %s3501_s19 = scalar_lea.hbm %s3625_s11, %s2081_s3 }
 0x12f   : > { %2278 = vmatprep.subr.bf16.mxu1 %v2883_v1  ;;  %p2788_p8 = pnand %p2787_p2, %p3627_p0  ;;  %p2795_p10 = por %p2794_p12, %p2793_p7 }
 0x131   : > { %p2789_p4 = pneg %p2788_p8 }
 0x132   : > { %2280 = vmatpush3.bf16.msra.mxu1 %v3316_v13 }
 0x133   : > { %2287 = vmatprep.subr.bf16.mxu1 %v2883_v1  ;;  %p2796_p1 = pnand %p2795_p10, %p2789_p4 }
 0x1fa   : > { %v559_v17 = vpop.f32.mrb[0].mxu0 }
 0x1fb   : > { %v560_v18 = vadd.f32 %v2046_v16, %v559_v17  ;;  %v2143_v19 = vpop.f32.mrb[1].mxu0 }
 0x1fc   : > { %v562_v20 = vpop.f32.mrb[2].mxu0 }
 0x1fd   : > { %565 = vst [vmem:[#allocation2] sm:$0x1f] %v560_v18  ;;  %v2144_v21 = vpop.f32.mrb[3].mxu0 }
 0x200   : > { %v641_v22 = vpop.f32.mrb[0].mxu1 }
 0x201   : > { %v2155_v23 = vpop.f32.mrb[1].mxu1 }
 0x204   : > { %v569_v24 = vld [vmem:[#allocation2] sm:$0x1]  ;;  %v690_v45 = vld [vmem:[#allocation2 + $0x1] sm:$0x1]  ;;  %v810_v5 = vld [vmem:[#allocation2 + $0x2] sm:$0x1] }
 0x205   : > { %v645_v25 = vadd.f32 %v641_v22, %v569_v24 }
 0x207   : > { %2448 = vtanh.f32 %v645_v25  ;;  %v2049_v28 = vmul.f32 -1.442695, %v645_v25 }
 0x209   : > { %2450 = vpow2.f32 %v2049_v28 }
 0x211   : > { %v2449_v26 = vpop.eup %2448 }
 0x212   : > { %664 = vrot.lane.b32.xlu0 %v2449_v26, %s2884_s21 }
 0x213   : > { %v2451_v29 = vpop.eup %2450 }
 0x214   : > { %v649_v30 = vadd.f32 1.0, %v2451_v29  ;;  %v930_v29 = vld [vmem:[#allocation2 + $0x3] sm:$0x1] }
 0x216   : > { %659 = vrot.lane.b32.xlu0 %v2050_v27, %s2885_s29  ;;  %2452 = vrcp.f32 %v649_v30 }
 0x220   : > { %v2453_v31 = vpop.eup %2452 }
 0x284   : > { %v665_v32 = vpop.permute.xlu0 %664 }
 0x285   : > { %v667_v33 = vmul.f32 %v2453_v31, %v665_v32 }
 0x287   : > { %669 = vrot.lane.b32.xlu1 %v667_v33, %s2885_s29 }
 0x288   : > { %v660_v34 = vpop.permute.xlu0 %659 }
 0x289   : > { %v662_v35 = vmul.f32 %v2453_v31, %v660_v34 }
 0x2f9   : > { %v670_v36 = vpop.permute.xlu1 %669 }
 0x2fa   : > { %v672_v37 = vadd.f32 %v670_v36, %v662_v35 }
 0x2fc   : > { %2454 = vtanh.f32 %v672_v37 }
 0x306   : > { %v2455_v38 = vpop.eup %2454 }
 0x307   : > { %675 = vrot.lane.b32.xlu1 %v2455_v38, %s2884_s21 }
 0x30b   : > { %680 = vrot.lane.b32.xlu1 %v672_v37, %s2886_s27 }
 0x379   : > { %v676_v39 = vpop.permute.xlu1 %675 }
 0x37a   : > { %v678_v40 = vmul.f32 %v2453_v31, %v676_v39 }
 0x37c   : > { %685 = vrot.lane.b32.xlu0 %v678_v40, %s2885_s29 }
 0x37d   : > { %v681_v41 = vpop.permute.xlu1 %680 }
 0x37e   : > { %683 = vst.msk [vmem:[#allocation5] sm:$0x1] %vm566_vm1, %v681_v41 }
 0x385   : > { %v2053_v42 = vld [vmem:[#allocation5] ss:$0 sm:$0xff] }
 0x386   : > { %779 = vrot.lane.b32.xlu1 %v2053_v42, %s2885_s29 }
 0x3ee   : > { %v686_v43 = vpop.permute.xlu0 %685 }
 0x3ef   : > { %688 = vst.msk [vmem:[#allocation4] sm:$0x1] %vm566_vm1, %v686_v43  ;;  %689 = vst.msk [vmem:[#allocation3] sm:$0x1] %vm566_vm1, %v686_v43 }
 0x3f6   : > { %v691_v44 = vld [vmem:[#allocation4] sm:$0x1] }
 0x3f7   : > { %2165 = vmatmul.mubr.msk.f32.vlgmr.msra.gmra.mrb[4].mxu0 %vm571_vm3, %v691_v44 }
 0x3f8   : > { %2283 = vmatpush3.bf16.msra.mxu0 %v3309_v10  ;;  %2186 = vmatprep.mubr.msk.f32.mxu0 %vm2882_vm0, %v2881_v0  ;;  %v780_v56 = vpop.permute.xlu1 %779 }
 0x3f9   : > { %2284 = vmatprep.subr.bf16.mxu0 %v2883_v1 }
 0x3fc   : > { %2286 = vmatpush3.bf16.msra.mxu0 %v3316_v13 }
 0x3fd   : > { %2200 = vmatprep.subr.bf16.mxu0 %v2881_v0 }
 0x4ca   : > { %v761_v46 = vpop.f32.mrb[4].mxu0 }
 0x4cb   : > { %v765_v47 = vadd.f32 %v761_v46, %v690_v45  ;;  %v2166_v48 = vpop.f32.mrb[5].mxu0 }
 0x4cd   : > { %2456 = vtanh.f32 %v765_v47  ;;  %v2052_v50 = vmul.f32 -1.442695, %v765_v47 }
 0x4cf   : > { %2458 = vpow2.f32 %v2052_v50 }
 0x4d7   : > { %v2457_v49 = vpop.eup %2456 }
 0x4d8   : > { %784 = vrot.lane.b32.xlu0 %v2457_v49, %s2884_s21 }
 0x4d9   : > { %v2459_v51 = vpop.eup %2458 }
 0x4da   : > { %v769_v52 = vadd.f32 1.0, %v2459_v51  ;;  %v1050_v51 = vld [vmem:[#allocation2 + $0x4] sm:$0x1] }
 0x4dc   : > { %2460 = vrcp.f32 %v769_v52 }
 0x4e6   : > { %v2461_v53 = vpop.eup %2460 }
 0x4e7   : > { %v782_v57 = vmul.f32 %v2461_v53, %v780_v56 }
 0x54a   : > { %v785_v54 = vpop.permute.xlu0 %784 }
 0x54b   : > { %v787_v55 = vmul.f32 %v2461_v53, %v785_v54 }
 0x54d   : > { %789 = vrot.lane.b32.xlu0 %v787_v55, %s2885_s29 }
 0x5bf   : > { %v790_v58 = vpop.permute.xlu0 %789 }
 0x5c0   : > { %v792_v59 = vadd.f32 %v790_v58, %v782_v57 }
 0x5c2   : > { %2462 = vtanh.f32 %v792_v59 }
 0x5cc   : > { %v2463_v60 = vpop.eup %2462 }
 0x5cd   : > { %795 = vrot.lane.b32.xlu1 %v2463_v60, %s2884_s21 }
 0x5d1   : > { %800 = vrot.lane.b32.xlu1 %v792_v59, %s2886_s27 }
 0x63f   : > { %v796_v61 = vpop.permute.xlu1 %795 }
 0x640   : > { %v798_v62 = vmul.f32 %v2461_v53, %v796_v61 }
 0x642   : > { %805 = vrot.lane.b32.xlu0 %v798_v62, %s2885_s29 }
 0x643   : > { %v801_v63 = vpop.permute.xlu1 %800 }
 0x644   : > { %803 = vst.msk [vmem:[#allocation5] sm:$0x1] %vm566_vm1, %v801_v63 }
 0x64b   : > { %v2056_v2 = vld [vmem:[#allocation5] ss:$0 sm:$0xff] }
 0x64c   : > { %899 = vrot.lane.b32.xlu1 %v2056_v2, %s2885_s29 }
 0x6b4   : > { %v806_v3 = vpop.permute.xlu0 %805 }
 0x6b5   : > { %808 = vst.msk [vmem:[#allocation4] sm:$0x1] %vm566_vm1, %v806_v3  ;;  %809 = vst.msk [vmem:[#allocation3 + $0x1] sm:$0x1] %vm566_vm1, %v806_v3 }
 0x6bc   : > { %v811_v4 = vld [vmem:[#allocation4] sm:$0x1] }
 0x6bd   : > { %2176 = vmatmul.mubr.msk.f32.vlgmr.msra.gmra.mrb[2].mxu1 %vm571_vm3, %v811_v4 }
 0x6be   : > { %2289 = vmatpush3.bf16.msra.mxu1 %v3309_v10  ;;  %2197 = vmatprep.mubr.msk.f32.mxu1 %vm2882_vm0, %v2881_v0 }
 0x6bf   : > { %2290 = vmatprep.subr.bf16.mxu1 %v2883_v1 }
 0x6c2   : > { %2292 = vmatpush3.bf16.msra.mxu1 %v3316_v13  ;;  %v900_v13 = vpop.permute.xlu1 %899 }
 0x6c3   : > { %2293 = vmatprep.subr.bf16.mxu1 %v2883_v1 }
 0x790   : > { %v881_v6 = vpop.f32.mrb[2].mxu1 }
 0x791   : > { %v885_v7 = vadd.f32 %v881_v6, %v810_v5  ;;  %v2177_v8 = vpop.f32.mrb[3].mxu1  ;;  %v1170_v5 = vld [vmem:[#allocation17] sm:$0xff]  ;;  %v1171_v6 = vld [vmem:[#allocation17 + $0x8] sm:$0xff] }
 0x792   : > { %v1181_v8 = vpack.c.bf16 %v1171_v6, %v1170_v5 }
 0x793   : > { %2464 = vtanh.f32 %v885_v7  ;;  %v2055_v11 = vmul.f32 -1.442695, %v885_v7  ;;  %v1172_v7 = vld [vmem:[#allocation17 + $0x10] sm:$0xff] }
 0x795   : > { %2466 = vpow2.f32 %v2055_v11 }
 0x79d   : > { %v2465_v9 = vpop.eup %2464 }
 0x79e   : > { %904 = vrot.lane.b32.xlu0 %v2465_v9, %s2884_s21  ;;  %v1173_v9 = vld [vmem:[#allocation17 + $0x18] sm:$0xff] }
 0x79f   : > { %v2467_v10 = vpop.eup %2466  ;;  %v1182_v11 = vpack.c.bf16 %v1173_v9, %v1172_v7 }
 0x7a0   : > { %v889_v14 = vadd.f32 1.0, %v2467_v10 }
 0x7a2   : > { %2468 = vrcp.f32 %v889_v14  ;;  %v1174_v14 = vld [vmem:[#allocation18] sm:$0xff] }
 0x7ac   : > { %v2469_v16 = vpop.eup %2468 }
 0x7ad   : > { %v902_v19 = vmul.f32 %v2469_v16, %v900_v13 }
 0x810   : > { %v905_v17 = vpop.permute.xlu0 %904 }
 0x811   : > { %v907_v18 = vmul.f32 %v2469_v16, %v905_v17  ;;  %v1176_v17 = vld [vmem:[#allocation18 + $0x10] sm:$0xff] }
 0x813   : > { %909 = vrot.lane.b32.xlu0 %v907_v18, %s2885_s29 }
 0x885   : > { %v910_v20 = vpop.permute.xlu0 %909 }
 0x886   : > { %v912_v21 = vadd.f32 %v910_v20, %v902_v19  ;;  %v1177_v19 = vld [vmem:[#allocation18 + $0x18] sm:$0xff] }
 0x887   : > { %v3407_v20 = vpack.c.bf16 %v1177_v19, %v1176_v17 }
 0x888   : > { %2470 = vtanh.f32 %v912_v21 }
 0x892   : > { %v2471_v22 = vpop.eup %2470 }
 0x893   : > { %915 = vrot.lane.b32.xlu1 %v2471_v22, %s2884_s21 }
 0x897   : > { %920 = vrot.lane.b32.xlu1 %v912_v21, %s2886_s27 }
 0x905   : > { %v916_v23 = vpop.permute.xlu1 %915 }
 0x906   : > { %v918_v24 = vmul.f32 %v2469_v16, %v916_v23  ;;  %v1175_v16 = vld [vmem:[#allocation18 + $0x8] sm:$0xff] }
 0x907   : > { %v3403_v13 = vpack.c.bf16 %v1175_v16, %v1174_v14 }
 0x908   : > { %925 = vrot.lane.b32.xlu0 %v918_v24, %s2885_s29 }
 0x909   : > { %v921_v25 = vpop.permute.xlu1 %920 }
 0x90a   : > { %923 = vst.msk [vmem:[#allocation5] sm:$0x1] %vm566_vm1, %v921_v25 }
 0x911   : > { %v2059_v26 = vld [vmem:[#allocation5] ss:$0 sm:$0xff] }
 0x912   : > { %1019 = vrot.lane.b32.xlu1 %v2059_v26, %s2885_s29 }
 0x97a   : > { %v926_v27 = vpop.permute.xlu0 %925 }
 0x97b   : > { %928 = vst.msk [vmem:[#allocation4] sm:$0x1] %vm566_vm1, %v926_v27  ;;  %929 = vst.msk [vmem:[#allocation3 + $0x2] sm:$0x1] %vm566_vm1, %v926_v27 }
 0x982   : > { %v931_v28 = vld [vmem:[#allocation4] sm:$0x1] }
 0x983   : > { %2187 = vmatmul.mubr.msk.f32.vlgmr.msra.gmra.mrb[6].mxu0 %vm571_vm3, %v931_v28 }
 0x984   : > { %2204 = vmatprep.mubr.msk.bf16.mxu0 %vm2882_vm0, %v2881_v0  ;;  %v1020_v40 = vpop.permute.xlu1 %1019  ;;  %2201 = vmatpush3.bf16.msra.mxu0 %v1181_v8 }
 0x985   : > { %2202 = vmatprep.subr.bf16.mxu0 %v2881_v0 }
 0x988   : > { %2203 = vmatpush3.bf16.msra.mxu0 %v1182_v11 }
 0x989   : > { %2299 = vmatprep.subr.bf16.mxu0 %v2883_v1 }
 0xa56   : > { %v1001_v30 = vpop.f32.mrb[6].mxu0 }
 0xa57   : > { %v1005_v31 = vadd.f32 %v1001_v30, %v930_v29  ;;  %v2188_v32 = vpop.f32.mrb[7].mxu0 }
 0xa59   : > { %2472 = vtanh.f32 %v1005_v31  ;;  %v2058_v34 = vmul.f32 -1.442695, %v1005_v31 }
 0xa5b   : > { %2474 = vpow2.f32 %v2058_v34 }
 0xa63   : > { %v2473_v33 = vpop.eup %2472 }
 0xa64   : > { %1024 = vrot.lane.b32.xlu0 %v2473_v33, %s2884_s21 }
 0xa65   : > { %v2475_v35 = vpop.eup %2474 }
 0xa66   : > { %v1009_v36 = vadd.f32 1.0, %v2475_v35 }
 0xa68   : > { %2476 = vrcp.f32 %v1009_v36 }
 0xa72   : > { %v2477_v37 = vpop.eup %2476 }
 0xa73   : > { %v1022_v41 = vmul.f32 %v2477_v37, %v1020_v40 }
 0xad6   : > { %v1025_v38 = vpop.permute.xlu0 %1024 }
 0xad7   : > { %v1027_v39 = vmul.f32 %v2477_v37, %v1025_v38 }
 0xad9   : > { %1029 = vrot.lane.b32.xlu0 %v1027_v39, %s2885_s29 }
 0xb4b   : > { %v1030_v42 = vpop.permute.xlu0 %1029 }
 0xb4c   : > { %v1032_v43 = vadd.f32 %v1030_v42, %v1022_v41 }
 0xb4e   : > { %2478 = vtanh.f32 %v1032_v43 }
 0xb58   : > { %v2479_v44 = vpop.eup %2478 }
 0xb59   : > { %1035 = vrot.lane.b32.xlu1 %v2479_v44, %s2884_s21 }
 0xb5d   : > { %1040 = vrot.lane.b32.xlu1 %v1032_v43, %s2886_s27 }
 0xbcb   : > { %v1036_v45 = vpop.permute.xlu1 %1035 }
 0xbcc   : > { %v1038_v46 = vmul.f32 %v2477_v37, %v1036_v45 }
 0xbce   : > { %1045 = vrot.lane.b32.xlu0 %v1038_v46, %s2885_s29 }
 0xbcf   : > { %v1041_v47 = vpop.permute.xlu1 %1040 }
 0xbd0   : > { %1043 = vst.msk [vmem:[#allocation5] sm:$0x1] %vm566_vm1, %v1041_v47 }
 0xbd7   : > { %v2062_v48 = vld [vmem:[#allocation5] ss:$0 sm:$0xff] }
 0xbd8   : > { %1139 = vrot.lane.b32.xlu1 %v2062_v48, %s2885_s29 }
 0xc40   : > { %v1046_v49 = vpop.permute.xlu0 %1045 }
 0xc41   : > { %1048 = vst.msk [vmem:[#allocation4] sm:$0x1] %vm566_vm1, %v1046_v49  ;;  %1049 = vst.msk [vmem:[#allocation3 + $0x3] sm:$0x1] %vm566_vm1, %v1046_v49 }
 0xc48   : > { %v1051_v50 = vld [vmem:[#allocation4] sm:$0x1] }
 0xc49   : > { %2198 = vmatmul.mubr.msk.f32.vlgmr.msra.gmra.mrb[4].mxu1 %vm571_vm3, %v1051_v50 }
 0xc4a   : > { %2216 = vmatprep.mubr.msk.f32.mxu1 %vm2882_vm0, %v2881_v0  ;;  %v1140_v62 = vpop.permute.xlu1 %1139  ;;  %2295 = vmatpush3.bf16.msra.mxu1 %v3403_v13 }
 0xc4b   : > { %2296 = vmatprep.subr.bf16.mxu1 %v2883_v1 }
 0xc4e   : > { %2298 = vmatpush3.bf16.msra.mxu1 %v3407_v20 }
 0xc4f   : > { %2305 = vmatprep.subr.bf16.mxu1 %v2883_v1 }
 0xd1c   : > { %v1121_v52 = vpop.f32.mrb[4].mxu1 }
 0xd1d   : > { %v1125_v53 = vadd.f32 %v1121_v52, %v1050_v51  ;;  %v2199_v54 = vpop.f32.mrb[5].mxu1 }
 0xd1f   : > { %2480 = vtanh.f32 %v1125_v53  ;;  %v2061_v56 = vmul.f32 -1.442695, %v1125_v53 }
 0xd21   : > { %2482 = vpow2.f32 %v2061_v56 }
 0xd29   : > { %v2481_v55 = vpop.eup %2480 }
 0xd2a   : > { %1144 = vrot.lane.b32.xlu0 %v2481_v55, %s2884_s21 }
 0xd2b   : > { %v2483_v57 = vpop.eup %2482 }
 0xd2c   : > { %v1129_v58 = vadd.f32 1.0, %v2483_v57 }
 0xd2e   : > { %2484 = vrcp.f32 %v1129_v58 }
 0xd38   : > { %v2485_v59 = vpop.eup %2484 }
 0xd39   : > { %v1142_v63 = vmul.f32 %v2485_v59, %v1140_v62 }
 0xd9c   : > { %v1145_v60 = vpop.permute.xlu0 %1144 }
 0xd9d   : > { %v1147_v61 = vmul.f32 %v2485_v59, %v1145_v60 }
 0xd9f   : > { %1149 = vrot.lane.b32.xlu0 %v1147_v61, %s2885_s29 }
 0xe11   : > { %v1150_v2 = vpop.permute.xlu0 %1149 }
 0xe12   : > { %v1152_v3 = vadd.f32 %v1150_v2, %v1142_v63 }
 0xe14   : > { %2486 = vtanh.f32 %v1152_v3 }
 0xe1e   : > { %v2487_v4 = vpop.eup %2486 }
 0xe1f   : > { %1155 = vrot.lane.b32.xlu1 %v2487_v4, %s2884_s21 }
 0xe23   : > { %1160 = vrot.lane.b32.xlu1 %v1152_v3, %s2886_s27 }
 0xe91   : > { %v1156_v10 = vpop.permute.xlu1 %1155 }
 0xe92   : > { %v1158_v18 = vmul.f32 %v2485_v59, %v1156_v10 }
 0xe94   : > { %1165 = vrot.lane.b32.xlu0 %v1158_v18, %s2885_s29 }
 0xe95   : > { %v1161_v21 = vpop.permute.xlu1 %1160 }
 0xe96   : > { %1163 = vst.msk [vmem:[#allocation5] sm:$0x1] %vm566_vm1, %v1161_v21 }
 0xe97   : > { %1235 = vst.msk [vmem:[#allocation5 - $0x1] sm:$0x2] %vm1233_vm4, %v3336_v15 }
 0xe9e   : > { %v2067_v22 = vld [vmem:[#allocation5] ss:$0 sm:$0xff] }
 0xe9f   : > { %1325 = vrot.lane.b32.xlu1 %v2067_v22, %s2885_s29 }
 0xf06   : > { %v1166_v23 = vpop.permute.xlu0 %1165 }
 0xf07   : > { %1168 = vst.msk [vmem:[#allocation4] sm:$0x1] %vm566_vm1, %v1166_v23  ;;  %1169 = vst.msk [vmem:[#allocation3 + $0x4] sm:$0x1] %vm566_vm1, %v1166_v23 }
 0xf08   : > { %1234 = vst.msk [vmem:[#allocation4 - $0x1] sm:$0x2] %vm1233_vm4, %v3311_v12  ;;  %v2063_v12 = vld [vmem:[#allocation20] ss:$0 sm:$0xff] }
 0xf0e   : > { %v1179_v24 = vld [vmem:[#allocation3] sm:$0x1f] }
 0xf0f   : > { %v1180_v25 = vpack.c.bf16 %v1179_v24, %v1179_v24  ;;  %v1237_v26 = vld [vmem:[#allocation4] sm:$0x1] }
 0xf10   : > { %2217 = vmatmul.mubr.msk.f32.vlgmr.msra.gmra.mrb[6].mxu1 %vm571_vm3, %v1237_v26 }
 0xf11   : > { %2205 = vmatmul.mubr.msk.bf16.vlgmr.msra.gmra.mrb[8].mxu0 %vm571_vm3, %v1180_v25  ;;  %2307 = vmatpush3.bf16.msra.mxu1 %v3403_v13  ;;  %v1326_v42 = vpop.permute.xlu1 %1325 }
 0xf12   : > { %2301 = vmatpush3.bf16.msra.mxu0 %v3403_v13  ;;  %2227 = vmatprep.mubr.msk.f32.mxu0 %vm2882_vm0, %v2881_v0 }
 0xf13   : > { %2302 = vmatprep.subr.bf16.mxu0 %v2883_v1  ;;  %2308 = vmatprep.subr.bf16.mxu1 %v2883_v1 }
 0xf14   : > { %2238 = vmatprep.mubr.msk.f32.mxu1 %vm2882_vm0, %v2881_v0 }
 0xf15   : > { %2310 = vmatpush3.bf16.msra.mxu1 %v3407_v20 }
 0xf16   : > { %2304 = vmatpush3.bf16.msra.mxu0 %v3407_v20  ;;  %2317 = vmatprep.subr.bf16.mxu1 %v2883_v1 }
 0xf17   : > { %2311 = vmatprep.subr.bf16.mxu0 %v2883_v1 }
 0xfe3   : > { %v1307_v15 = vpop.f32.mrb[6].mxu1 }
 0xfe4   : > { %v1226_v27 = vpop.f32.mrb[8].mxu0  ;;  %v2218_v28 = vpop.f32.mrb[7].mxu1 }
 0xfe5   : > { %v1227_v29 = vadd.f32 %v2063_v12, %v1226_v27  ;;  %v2206_v30 = vpop.f32.mrb[9].mxu0 }
 0xfe6   : > { %v1229_v31 = vpop.f32.mrb[10].mxu0 }
 0xfe7   : > { %1232 = vst [vmem:[#allocation2] sm:$0x1f] %v1227_v29  ;;  %v2207_v32 = vpop.f32.mrb[11].mxu0 }
 0xfee   : > { %v1236_v33 = vld [vmem:[#allocation2] sm:$0x1]  ;;  %v1356_v53 = vld [vmem:[#allocation2 + $0x1] sm:$0x1]  ;;  %v1476_v16 = vld [vmem:[#allocation2 + $0x2] sm:$0x1] }
 0xfef   : > { %v1311_v34 = vadd.f32 %v1307_v15, %v1236_v33  ;;  %v1596_v33 = vld [vmem:[#allocation2 + $0x3] sm:$0x1] }
 0xff1   : > { %2488 = vtanh.f32 %v1311_v34  ;;  %v2066_v36 = vmul.f32 -1.442695, %v1311_v34 }
 0xff3   : > { %2490 = vpow2.f32 %v2066_v36 }
 0xffb   : > { %v2489_v35 = vpop.eup %2488 }
 0xffc   : > { %1330 = vrot.lane.b32.xlu0 %v2489_v35, %s2884_s21 }
 0xffd   : > { %v2491_v37 = vpop.eup %2490 }
 0xffe   : > { %v1315_v38 = vadd.f32 1.0, %v2491_v37 }
0x1000   : > { %2492 = vrcp.f32 %v1315_v38 }
0x100a   : > { %v2493_v39 = vpop.eup %2492 }
0x100b   : > { %v1328_v43 = vmul.f32 %v2493_v39, %v1326_v42 }
0x106e   : > { %v1331_v40 = vpop.permute.xlu0 %1330 }
0x106f   : > { %v1333_v41 = vmul.f32 %v2493_v39, %v1331_v40 }
0x1071   : > { %1335 = vrot.lane.b32.xlu0 %v1333_v41, %s2885_s29 }
0x10e3   : > { %v1336_v44 = vpop.permute.xlu0 %1335 }
0x10e4   : > { %v1338_v45 = vadd.f32 %v1336_v44, %v1328_v43 }
0x10e6   : > { %2494 = vtanh.f32 %v1338_v45 }
0x10f0   : > { %v2495_v46 = vpop.eup %2494 }
0x10f1   : > { %1341 = vrot.lane.b32.xlu1 %v2495_v46, %s2884_s21 }
0x10f5   : > { %1346 = vrot.lane.b32.xlu1 %v1338_v45, %s2886_s27 }
0x1163   : > { %v1342_v47 = vpop.permute.xlu1 %1341 }
0x1164   : > { %v1344_v48 = vmul.f32 %v2493_v39, %v1342_v47 }
0x1166   : > { %1351 = vrot.lane.b32.xlu0 %v1344_v48, %s2885_s29 }
0x1167   : > { %v1347_v49 = vpop.permute.xlu1 %1346 }
0x1168   : > { %1349 = vst.msk [vmem:[#allocation5] sm:$0x1] %vm566_vm1, %v1347_v49 }
0x116f   : > { %v2070_v50 = vld [vmem:[#allocation5] ss:$0 sm:$0xff] }
0x1170   : > { %1445 = vrot.lane.b32.xlu1 %v2070_v50, %s2885_s29 }
0x11d8   : > { %v1352_v51 = vpop.permute.xlu0 %1351 }
0x11d9   : > { %1354 = vst.msk [vmem:[#allocation4] sm:$0x1] %vm566_vm1, %v1352_v51  ;;  %1355 = vst.msk [vmem:[%s3442_s9] sm:$0x1] %vm566_vm1, %v1352_v51 }
0x11e0   : > { %v1357_v52 = vld [vmem:[#allocation4] sm:$0x1] }
0x11e1   : > { %2228 = vmatmul.mubr.msk.f32.vlgmr.msra.gmra.mrb[12].mxu0 %vm571_vm3, %v1357_v52 }
0x11e2   : > { %2313 = vmatpush3.bf16.msra.mxu0 %v3403_v13  ;;  %2249 = vmatprep.mubr.msk.f32.mxu0 %vm2882_vm0, %v2881_v0  ;;  %v1446_v2 = vpop.permute.xlu1 %1445 }
0x11e3   : > { %2314 = vmatprep.subr.bf16.mxu0 %v2883_v1 }
0x11e6   : > { %2316 = vmatpush3.bf16.msra.mxu0 %v3407_v20 }
0x12b4   : > { %v1427_v54 = vpop.f32.mrb[12].mxu0 }
0x12b5   : > { %v1431_v55 = vadd.f32 %v1427_v54, %v1356_v53  ;;  %v2229_v56 = vpop.f32.mrb[13].mxu0 }
0x12b7   : > { %2496 = vtanh.f32 %v1431_v55  ;;  %v2069_v58 = vmul.f32 -1.442695, %v1431_v55  ;;  %v1716_v55 = vld [vmem:[#allocation2 + $0x4] sm:$0x1] }
0x12b9   : > { %2498 = vpow2.f32 %v2069_v58 }
0x12c1   : > { %v2497_v57 = vpop.eup %2496 }
0x12c2   : > { %1450 = vrot.lane.b32.xlu0 %v2497_v57, %s2884_s21 }
0x12c3   : > { %v2499_v59 = vpop.eup %2498 }
0x12c4   : > { %v1435_v60 = vadd.f32 1.0, %v2499_v59 }
0x12c6   : > { %2500 = vrcp.f32 %v1435_v60 }
0x12d0   : > { %v2501_v61 = vpop.eup %2500 }
0x12d1   : > { %v1448_v3 = vmul.f32 %v2501_v61, %v1446_v2 }
0x1334   : > { %v1451_v62 = vpop.permute.xlu0 %1450 }
0x1335   : > { %v1453_v63 = vmul.f32 %v2501_v61, %v1451_v62 }
0x1337   : > { %1455 = vrot.lane.b32.xlu0 %v1453_v63, %s2885_s29 }
0x13a9   : > { %v1456_v4 = vpop.permute.xlu0 %1455 }
0x13aa   : > { %v1458_v5 = vadd.f32 %v1456_v4, %v1448_v3 }
0x13ac   : > { %2502 = vtanh.f32 %v1458_v5 }
0x13b6   : > { %v2503_v6 = vpop.eup %2502 }
0x13b7   : > { %1461 = vrot.lane.b32.xlu1 %v2503_v6, %s2884_s21 }
0x13bb   : > { %1466 = vrot.lane.b32.xlu1 %v1458_v5, %s2886_s27 }
0x1429   : > { %v1462_v7 = vpop.permute.xlu1 %1461 }
0x142a   : > { %v1464_v8 = vmul.f32 %v2501_v61, %v1462_v7 }
0x142c   : > { %1471 = vrot.lane.b32.xlu0 %v1464_v8, %s2885_s29 }
0x142d   : > { %v1467_v9 = vpop.permute.xlu1 %1466 }
0x142e   : > { %1469 = vst.msk [vmem:[#allocation5] sm:$0x1] %vm566_vm1, %v1467_v9 }
0x1435   : > { %v2073_v11 = vld [vmem:[#allocation5] ss:$0 sm:$0xff] }
0x1436   : > { %1565 = vrot.lane.b32.xlu1 %v2073_v11, %s2885_s29 }
0x149e   : > { %v1472_v10 = vpop.permute.xlu0 %1471 }
0x149f   : > { %1474 = vst.msk [vmem:[#allocation4] sm:$0x1] %vm566_vm1, %v1472_v10  ;;  %1475 = vst.msk [vmem:[%s3442_s9 + $0x1] sm:$0x1] %vm566_vm1, %v1472_v10 }
0x14a6   : > { %v1477_v14 = vld [vmem:[#allocation4] sm:$0x1] }
0x14a7   : > { %2239 = vmatmul.mubr.msk.f32.vlgmr.msra.gmra.mrb[8].mxu1 %vm571_vm3, %v1477_v14 }
0x14a8   : > { %2319 = vmatpush3.bf16.msra.mxu1 %v3403_v13  ;;  %2260 = vmatprep.mubr.msk.f32.mxu1 %vm2882_vm0, %v2881_v0 }
0x14a9   : > { %2320 = vmatprep.subr.bf16.mxu1 %v2883_v1  ;;  %v1566_v1 = vpop.permute.xlu1 %1565 }
0x14ac   : > { %2322 = vmatpush3.bf16.msra.mxu1 %v3407_v20 }
0x157a   : > { %v1547_v17 = vpop.f32.mrb[8].mxu1 }
0x157b   : > { %v1551_v18 = vadd.f32 %v1547_v17, %v1476_v16  ;;  %v2240_v19 = vpop.f32.mrb[9].mxu1 }
0x157d   : > { %2504 = vtanh.f32 %v1551_v18  ;;  %v2072_v22 = vmul.f32 -1.442695, %v1551_v18 }
0x157f   : > { %2506 = vpow2.f32 %v2072_v22 }
0x1587   : > { %v2505_v21 = vpop.eup %2504 }
0x1588   : > { %1570 = vrot.lane.b32.xlu0 %v2505_v21, %s2884_s21 }
0x1589   : > { %v2507_v23 = vpop.eup %2506 }
0x158a   : > { %v1555_v24 = vadd.f32 1.0, %v2507_v23 }
0x158c   : > { %2508 = vrcp.f32 %v1555_v24 }
0x1596   : > { %v2509_v13 = vpop.eup %2508 }
0x1597   : > { %v1568_v20 = vmul.f32 %v2509_v13, %v1566_v1 }
0x15fa   : > { %v1571_v25 = vpop.permute.xlu0 %1570 }
0x15fb   : > { %v1573_v0 = vmul.f32 %v2509_v13, %v1571_v25 }
0x15fd   : > { %1575 = vrot.lane.b32.xlu0 %v1573_v0, %s2885_s29 }
0x166f   : > { %v1576_v26 = vpop.permute.xlu0 %1575 }
0x1670   : > { %v1578_v12 = vadd.f32 %v1576_v26, %v1568_v20 }
0x1672   : > { %2510 = vtanh.f32 %v1578_v12 }
0x167c   : > { %v2511_v15 = vpop.eup %2510 }
0x167d   : > { %1581 = vrot.lane.b32.xlu1 %v2511_v15, %s2884_s21 }
0x1681   : > { %1586 = vrot.lane.b32.xlu1 %v1578_v12, %s2886_s27 }
0x16ef   : > { %v1582_v27 = vpop.permute.xlu1 %1581 }
0x16f0   : > { %v1584_v28 = vmul.f32 %v2509_v13, %v1582_v27 }
0x16f2   : > { %1591 = vrot.lane.b32.xlu0 %v1584_v28, %s2885_s29 }
0x16f3   : > { %v1587_v29 = vpop.permute.xlu1 %1586 }
0x16f4   : > { %1589 = vst.msk [vmem:[#allocation5] sm:$0x1] %vm566_vm1, %v1587_v29 }
0x16fb   : > { %v2076_v30 = vld [vmem:[#allocation5] ss:$0 sm:$0xff] }
0x16fc   : > { %1685 = vrot.lane.b32.xlu1 %v2076_v30, %s2885_s29 }
0x1764   : > { %v1592_v31 = vpop.permute.xlu0 %1591 }
0x1765   : > { %1594 = vst.msk [vmem:[#allocation4] sm:$0x1] %vm566_vm1, %v1592_v31  ;;  %1595 = vst.msk [vmem:[%s3442_s9 + $0x2] sm:$0x1] %vm566_vm1, %v1592_v31 }
0x176c   : > { %v1597_v32 = vld [vmem:[#allocation4] sm:$0x1] }
0x176d   : > { %2250 = vmatmul.mubr.msk.f32.vlgmr.msra.gmra.mrb[14].mxu0 %vm571_vm3, %v1597_v32 }
0x176e   : > { %v1686_v44 = vpop.permute.xlu1 %1685 }
0x1840   : > { %v1667_v34 = vpop.f32.mrb[14].mxu0 }
0x1841   : > { %v1671_v35 = vadd.f32 %v1667_v34, %v1596_v33  ;;  %v2251_v36 = vpop.f32.mrb[15].mxu0 }
0x1843   : > { %2512 = vtanh.f32 %v1671_v35  ;;  %v2075_v38 = vmul.f32 -1.442695, %v1671_v35 }
0x1845   : > { %2514 = vpow2.f32 %v2075_v38 }
0x184d   : > { %v2513_v37 = vpop.eup %2512 }
0x184e   : > { %1690 = vrot.lane.b32.xlu0 %v2513_v37, %s2884_s21 }
0x184f   : > { %v2515_v39 = vpop.eup %2514 }
0x1850   : > { %v1675_v40 = vadd.f32 1.0, %v2515_v39 }
0x1852   : > { %2516 = vrcp.f32 %v1675_v40 }
0x185c   : > { %v2517_v41 = vpop.eup %2516 }
0x185d   : > { %v1688_v45 = vmul.f32 %v2517_v41, %v1686_v44 }
0x18c0   : > { %v1691_v42 = vpop.permute.xlu0 %1690 }
0x18c1   : > { %v1693_v43 = vmul.f32 %v2517_v41, %v1691_v42 }
0x18c3   : > { %1695 = vrot.lane.b32.xlu0 %v1693_v43, %s2885_s29 }
0x1935   : > { %v1696_v46 = vpop.permute.xlu0 %1695 }
0x1936   : > { %v1698_v47 = vadd.f32 %v1696_v46, %v1688_v45 }
0x1938   : > { %2518 = vtanh.f32 %v1698_v47 }
0x1942   : > { %v2519_v48 = vpop.eup %2518 }
0x1943   : > { %1701 = vrot.lane.b32.xlu1 %v2519_v48, %s2884_s21 }
0x1947   : > { %1706 = vrot.lane.b32.xlu1 %v1698_v47, %s2886_s27 }
0x19b5   : > { %v1702_v49 = vpop.permute.xlu1 %1701 }
0x19b6   : > { %v1704_v50 = vmul.f32 %v2517_v41, %v1702_v49 }
0x19b8   : > { %1711 = vrot.lane.b32.xlu0 %v1704_v50, %s2885_s29 }
0x19b9   : > { %v1707_v51 = vpop.permute.xlu1 %1706 }
0x19ba   : > { %1709 = vst.msk [vmem:[#allocation5] sm:$0x1] %vm566_vm1, %v1707_v51 }
0x19c1   : > { %v2079_v52 = vld [vmem:[#allocation5] ss:$0 sm:$0xff] }
0x19c2   : > { %1805 = vrot.lane.b32.xlu1 %v2079_v52, %s2885_s29 }
0x1a2a   : > { %v1712_v53 = vpop.permute.xlu0 %1711 }
0x1a2b   : > { %1715 = vst.msk [vmem:[%s3442_s9 + $0x3] sm:$0x1] %vm566_vm1, %v1712_v53  ;;  %1714 = vst.msk [vmem:[#allocation4] sm:$0x1] %vm566_vm1, %v1712_v53 }
0x1a32   : > { %v1717_v54 = vld [vmem:[#allocation4] sm:$0x1] }
0x1a33   : > { %2261 = vmatmul.mubr.msk.f32.vlgmr.msra.gmra.mrb[10].mxu1 %vm571_vm3, %v1717_v54 }
0x1a34   : > { %v1806_v4 = vpop.permute.xlu1 %1805 }
0x1b06   : > { %v1787_v56 = vpop.f32.mrb[10].mxu1 }
0x1b07   : > { %v1791_v57 = vadd.f32 %v1787_v56, %v1716_v55  ;;  %v2262_v58 = vpop.f32.mrb[11].mxu1 }
0x1b09   : > { %2520 = vtanh.f32 %v1791_v57  ;;  %v2078_v60 = vmul.f32 -1.442695, %v1791_v57 }
0x1b0b   : > { %2522 = vpow2.f32 %v2078_v60 }
0x1b13   : > { %v2521_v59 = vpop.eup %2520 }
0x1b14   : > { %1810 = vrot.lane.b32.xlu0 %v2521_v59, %s2884_s21 }
0x1b15   : > { %v2523_v61 = vpop.eup %2522 }
0x1b16   : > { %v1795_v62 = vadd.f32 1.0, %v2523_v61 }
0x1b18   : > { %2524 = vrcp.f32 %v1795_v62 }
0x1b22   : > { %v2525_v63 = vpop.eup %2524 }
0x1b23   : > { %v1808_v5 = vmul.f32 %v2525_v63, %v1806_v4 }
0x1b86   : > { %v1811_v2 = vpop.permute.xlu0 %1810 }
0x1b87   : > { %v1813_v3 = vmul.f32 %v2525_v63, %v1811_v2 }
0x1b89   : > { %1815 = vrot.lane.b32.xlu0 %v1813_v3, %s2885_s29 }
0x1bfb   : > { %v1816_v6 = vpop.permute.xlu0 %1815 }
0x1bfc   : > { %v1818_v7 = vadd.f32 %v1816_v6, %v1808_v5 }
0x1bfe   : > { %2526 = vtanh.f32 %v1818_v7 }
0x1c08   : > { %v2527_v8 = vpop.eup %2526 }
0x1c09   : > { %1821 = vrot.lane.b32.xlu1 %v2527_v8, %s2884_s21 }
0x1c0d   : > { %1826 = vrot.lane.b32.xlu1 %v1818_v7, %s2886_s27 }
0x1c7b   : > { %v1822_v9 = vpop.permute.xlu1 %1821 }
0x1c7c   : > { %v1824_v11 = vmul.f32 %v2525_v63, %v1822_v9 }
0x1c7e   : > { %1831 = vrot.lane.b32.xlu0 %v1824_v11, %s2885_s29 }
0x1c7f   : > { %v1827_v10 = vpop.permute.xlu1 %1826 }
0x1c80   : > { %1829 = vst.msk [vmem:[#allocation5] sm:$0x1] %vm566_vm1, %v1827_v10 }
0x1cf0   : > { %v1832_v14 = vpop.permute.xlu0 %1831 }
0x1cf1   : > { %1834 = vst.msk [vmem:[#allocation4] sm:$0x1] %vm566_vm1, %v1832_v14  ;;  %1835 = vst.msk [vmem:[%s3442_s9 + $0x4] sm:$0x1] %vm566_vm1, %v1832_v14 }
0x1cf2   : > { %2799 = shalt.err (!%p2796_p1)
}
0x1cf3   : > { %s2800_s28 = scalar_lea.hbm %s3501_s19, 128  ;;  %s2804_s16 = scalar_lea.hbm %s3626_s20, 256 }
0x1cf4   : > { %p2801_p6 = scmp.ne.s32.totalorder %s3501_s19, %s2800_s28  ;;  %p2805_p9 = scmp.lt.u32.totalorder %s3501_s19, %s3626_s20 }
0x1cf5   : > { %p2806_p11 = scmp.lt.u32.totalorder %s2804_s16, %s2800_s28  ;;  %p2808_p2 = scmp.lt.u32.totalorder %s2800_s28, %s3501_s19 }
0x1cf6   : > { %p2802_p13 = pnand %p2801_p6, %p3627_p0 }
0x1cf7   : > { %p2807_p3 = por %p2806_p11, %p2805_p9 }
0x1cf8   : > { %p2803_p5 = pneg %p2802_p13 }
0x1cf9   : > { %p2809_p8 = por %p2808_p2, %p2807_p3 }
0x1cfb   : > { %p2810_p4 = pnand %p2809_p8, %p2803_p5 }
0x1cfd   : > { %2813 = shalt.err (!%p2810_p4)
}
0x1cfe   : > { %2353 = dma.vmem_to_hbm [thread:$0]  (%p3627_p0), %s3503_s23, 128, %s3501_s19, %s1837_s17  }
0x1cff PF: > { %s3628_s1 = sld [smem:[#allocation28_spill]]  ;;  %s3629_s21 = sld [smem:[#allocation33_spill]] }
0x1d00   : > { %p3631_p12 = scmp.ge.s32.totalorder %s2868_s12, 2 }
0x1d05   : > { %s1862_s29 = sand.u32 1, %s3628_s1   ;;  %p3630_p7 = scmp.ne.s32.totalorder %s3629_s21, 0 }
0x1d06   : > { %s1863_s27 = scalar_lea.sflag [#allocation8], %s1862_s29 }
0x1d07   : > { %p2385_p10 = pnand %p3631_p12, %p3630_p7 }
0x1d09   : > { %2851 = dma.done.wait (!%p2385_p10), %s1863_s27, 128  }
0x1d0a   : > { %2853 = vsyncadd (!%p2385_p10), %s1863_s27, 4294967168  ;;  %s3632_s12 = sld [smem:[#allocation30_spill]]  ;;  %s3633_s9 = sld [smem:[#allocation29_spill]] }
0x1d0b   : > { %s3634_s11 = sld [smem:[#allocation31_spill]]  ;;  %s3635_s30 = smov %s2860_s10 }
0x1d10   : > { %p28_p1 = scmp.ge.s32.totalorder %s3632_s12, 4   ;;  %s3636_s10 = smov %s3633_s9 }
0x1d12   :  { %30 = sbr.rel (!%p28_p1) target bundleno = 16 (0x10), region = 149 }
0x1d19   :  { %1868 = vsyncpa [#allocation7], 1 }
0x1d1a   :  { %1870 = vsyncpa [#allocation7 + $0x1], 1 }
0x1d1b   :  { %1871 = vsyncpa [#allocation10], 1 }
0x1d1c   :  { %1873 = vsyncpa [#allocation10 + $0x1], 1 }
0x1d1d   :  { %1874 = vsyncpa [#allocation13], 1 }
0x1d1e   :  { %1875 = vsyncpa [#allocation16], 1 }
0x1d1f   :  { %1876 = vsyncpa [#allocation19], 1 }
0x1d20   :  { %1877 = vsyncpa [#allocation8], 1 }
0x1d21   :  { %1879 = vsyncpa [#allocation8 + $0x1], 1 }

</bundles_post_ra>
